<compile_context>
chip_gen: v6e
topology: v6e:2x2x1
jax: 0.10.0
libtpu: 0.0.40
codegen_flags: <defaults>
</compile_context>

<pallas_src>
import math

import jax
import jax.numpy as jnp
from jax.experimental import pallas as pl
from jax.experimental.pallas import tpu as pltpu


def _round_up(x, m):
    return (x + m - 1) // m * m


def _min_token_tile(itemsize):
    if itemsize >= 4:
        return 8
    if itemsize == 2:
        return 16
    return 32


# -----------------------------------------------------------------------------
# Exact GELU inside the kernel (erf via Abramowitz & Stegun 7.1.26,
# |err| < ~1.5e-7).  The divide goes to the EUP as an approx reciprocal plus
# one Newton refinement step (back to ~f32 accuracy, off the VALU slot).
# -----------------------------------------------------------------------------
def _erf_poly(z):
    a1, a2, a3, a4, a5 = (0.254829592, -0.284496736, 1.421413741,
                          -1.453152027, 1.061405429)
    p = 0.3275911
    az = jnp.abs(z)
    d = 1.0 + p * az
    t = pl.reciprocal(d, approx=True)      # EUP slot (nearly free)
    t = t * (2.0 - d * t)                  # one Newton step -> ~f32 accurate
    poly = t * (a1 + t * (a2 + t * (a3 + t * (a4 + t * a5))))
    e = 1.0 - poly * jnp.exp(-az * az)
    return jnp.where(z >= 0, e, -e)


def _gelu_exact(x):
    return 0.5 * x * (1.0 + _erf_poly(x * (1.0 / math.sqrt(2.0))))


# -----------------------------------------------------------------------------
# Fused MLP kernel.  Grid = (token tiles i, hidden tiles k).
#   acc (f32, VMEM scratch) accumulates fc2 partial products over k;
#   per-slice GELU is valid because GELU is elementwise over hidden units.
# -----------------------------------------------------------------------------
def _mlp_kernel(x_ref, w1_ref, b1_ref, w2_ref, b2_ref, o_ref, acc_ref):
    k = pl.program_id(1)

    @pl.when(k == 0)
    def _init():
        acc_ref[...] = jnp.zeros_like(acc_ref)

    # fc1 slice on the MXU; f32 accumulation regardless of operand dtype.
    h = jnp.dot(x_ref[...], w1_ref[...], preferred_element_type=jnp.float32)
    h = h + b1_ref[...].astype(jnp.float32)
    h = _gelu_exact(h)                          # f32 activation math
    # Dropout with drop=0.0 (module default) is the identity.
    h = h.astype(w2_ref.dtype)                  # bf16 MXU operands if params bf16
    acc_ref[...] += jnp.dot(h, w2_ref[...], preferred_element_type=jnp.float32)

    @pl.when(k == pl.num_programs(1) - 1)
    def _finalize():
        o_ref[...] = (acc_ref[...] +
                      b2_ref[...].astype(jnp.float32)).astype(o_ref.dtype)


# -----------------------------------------------------------------------------
# Generation-aware VMEM budgeting and tile planning.
# -----------------------------------------------------------------------------
def _vmem_budget_and_limit():
    try:
        cap = int(pltpu.get_tpu_info().vmem_capacity_bytes)
    except Exception:
        cap = 64 << 20                      # conservative: v7x per-TC VMEM
    # ~96 MiB on 128-MiB parts (v5e/v6e), ~48 MiB on 64-MiB parts (v7x).
    limit = min(cap * 3 // 4, 100 << 20)
    budget = int(limit * 0.9)               # headroom for internal scratch
    return budget, limit


def _plan_tiles(n, d_in, d_hid, d_out, in_dtype, w_dtype, out_dtype):
    budget, limit = _vmem_budget_and_limit()
    in_isz = jnp.dtype(in_dtype).itemsize
    w_isz = jnp.dtype(w_dtype).itemsize
    out_isz = jnp.dtype(out_dtype).itemsize

    def weight_bytes(bh, nbuf):
        return nbuf * w_isz * (d_in * bh + bh * d_out + bh + d_out)

    # 1) Hidden tiling: keep full weights resident (DMA'd once, single buffer)
    #    when they fit ~2/3 of the budget; otherwise stream multiple-of-128
    #    slices of d_hid (double-buffered) and accumulate fc2 in f32 scratch.
    block_h = d_hid
    if weight_bytes(d_hid, 1) > (2 * budget) // 3:
        divisors = [m for m in range(128, d_hid, 128) if d_hid % m == 0]
        for m in reversed(divisors):
            if weight_bytes(m, 2) <= budget // 2:
                block_h = m
                break
        else:
            block_h = divisors[0] if divisors else d_hid
    nbuf_w = 1 if block_h == d_hid else 2
    remaining = max(budget - weight_bytes(block_h, nbuf_w), 0)

    # 2) Token tile: largest MXU-friendly power-of-two that fits the remaining
    #    budget; keep >=2 token-grid steps when n allows so both v7x TCs work.
    min_bm = _min_token_tile(in_isz)
    cap_bm = max(_round_up(n, min_bm), min_bm)

    def tile_bytes(bm):
        return (2 * in_isz * bm * d_in        # double-buffered x tile
                + 2 * out_isz * bm * d_out    # double-buffered out tile
                + 4 * bm * d_out              # f32 accumulator scratch
                + 3 * 4 * bm * block_h)       # f32 hidden value + GELU temps

    block_m = min_bm
    for bm in (1024, 512, 256, 128, 64, 32, 16, 8):
        if bm < min_bm:
            break
        if bm > cap_bm or tile_bytes(bm) > remaining:
            continue
        if bm >= n and bm > min_bm:
            continue                           # keep >=2 parallel grid steps
        block_m = bm
        break
    return block_m, block_h, limit


# -----------------------------------------------------------------------------
# Wrapper over flattened tokens.
# -----------------------------------------------------------------------------
def mlp_tokens(x2d, w1, b1, w2, b2, *, block_m=None, block_h=None,
               out_dtype=None):
    """x2d: (N, Din); w1: (Din, Dh); b1: (Dh,); w2: (Dh, Dout); b2: (Dout,)."""
    n, d_in = x2d.shape
    d_hid = w1.shape[1]
    d_out = w2.shape[1]
    out_dtype = out_dtype or x2d.dtype

    plan_bm, plan_bh, vmem_limit = _plan_tiles(
        n, d_in, d_hid, d_out, x2d.dtype, w1.dtype, out_dtype)
    block_m = plan_bm if block_m is None else block_m
    block_h = plan_bh if block_h is None else block_h

    min_bm = _min_token_tile(x2d.dtype.itemsize)
    if block_m % min_bm:
        raise ValueError(f"block_m={block_m} must be a multiple of {min_bm}")
    if block_h != d_hid and (d_hid % block_h or block_h % 128):
        raise ValueError("block_h must divide d_hid and be a multiple of 128")

    ni = pl.cdiv(n, block_m)        # ragged last token block is masked
    nk = d_hid // block_h
    const_w = nk == 1               # full weights resident, DMA'd once

    b1r = b1.reshape(1, d_hid)
    b2r = b2.reshape(1, d_out)

    w_isz = jnp.dtype(w1.dtype).itemsize
    cost = pl.CostEstimate(
        flops=2 * n * (d_in * d_hid + d_hid * d_out),
        transcendentals=n * d_hid,
        bytes_accessed=(n * d_in * x2d.dtype.itemsize
                        + n * d_out * jnp.dtype(out_dtype).itemsize
                        + (1 if const_w else ni) * w_isz
                        * (d_in * d_hid + d_hid * d_out)
                        + w_isz * (d_hid + d_out)),
    )

    def build(single_buffer_weights):
        def w_spec(shape, index_map):
            if single_buffer_weights:
                # Constant across the grid -> one VMEM buffer is enough.
                return pl.BlockSpec(shape, index_map,
                                    pipeline_mode=pl.Buffered(1))
            return pl.BlockSpec(shape, index_map)

        return pl.pallas_call(
            _mlp_kernel,
            out_shape=jax.ShapeDtypeStruct((n, d_out), out_dtype),
            grid_spec=pltpu.PrefetchScalarGridSpec(
                num_scalar_prefetch=0,
                grid=(ni, nk),
                in_specs=[
                    pl.BlockSpec((block_m, d_in), lambda i, k: (i, 0)),
                    w_spec((d_in, block_h), lambda i, k: (0, k)),
                    w_spec((1, block_h), lambda i, k: (0, k)),
                    w_spec((block_h, d_out), lambda i, k: (k, 0)),
                    w_spec((1, d_out), lambda i, k: (0, 0)),
                ],
                out_specs=pl.BlockSpec((block_m, d_out), lambda i, k: (i, 0)),
                scratch_shapes=[pltpu.VMEM((block_m, d_out), jnp.float32)],
            ),
            compiler_params=pltpu.CompilerParams(
                dimension_semantics=("parallel", "arbitrary"),
                vmem_limit_bytes=int(vmem_limit),
            ),
            cost_estimate=cost,
        )

    if const_w and hasattr(pl, "Buffered"):
        try:
            return build(True)(x2d, w1, b1r, w2, b2r)
        except Exception:
            pass    # fall back to default double-buffered weight blocks
    return build(False)(x2d, w1, b1r, w2, b2r)


def mlp_forward(x, w1, b1, w2, b2, *, channels_first=False, block_m=None,
                block_h=None):
    """Mlp.forward. channels_last: x (..., Din). channels_first: x (B,C,H,W)."""
    d_out = w2.shape[1]
    if channels_first:
        # 1x1 Conv2d == per-pixel linear.
        b, c, h, w = x.shape
        xt = jnp.transpose(x, (0, 2, 3, 1)).reshape(b * h * w, c)
        out = mlp_tokens(xt, w1, b1, w2, b2, block_m=block_m, block_h=block_h)
        return jnp.transpose(out.reshape(b, h, w, d_out), (0, 3, 1, 2))
    lead = x.shape[:-1]
    out = mlp_tokens(x.reshape(-1, x.shape[-1]), w1, b1, w2, b2,
                     block_m=block_m, block_h=block_h)
    return out.reshape(*lead, d_out)


# -----------------------------------------------------------------------------
# Pure-JAX reference (exact erf GELU) for checking.
# -----------------------------------------------------------------------------
def mlp_ref(x, w1, b1, w2, b2, *, channels_first=False):
    xf = x.astype(jnp.float32)
    if channels_first:
        xf = jnp.transpose(xf, (0, 2, 3, 1))
    hp = jax.lax.Precision.HIGHEST
    h = jnp.dot(xf, w1.astype(jnp.float32), precision=hp) + b1.astype(jnp.float32)
    h = 0.5 * h * (1.0 + jax.lax.erf(h * (1.0 / math.sqrt(2.0))))
    o = jnp.dot(h, w2.astype(jnp.float32), precision=hp) + b2.astype(jnp.float32)
    if channels_first:
        o = jnp.transpose(o, (0, 3, 1, 2))
    return o


if __name__ == "__main__":
    key = jax.random.PRNGKey(0)
    k1, k2, k3, k4, k5, k6 = jax.random.split(key, 6)

    # ---- channels_last (nn.Linear) config.  L=57 -> 114 tokens, deliberately
    # NOT a multiple of the token tile, to exercise the ragged-block masking
    # path (no wrapper-side padding).
    B, L, D_IN, D_HID = 2, 57, 128, 256
    D_OUT = D_IN  # out_features defaults to in_features

    x = jax.random.normal(k1, (B, L, D_IN), dtype=jnp.float32)
    # nn.Linear.weight is (out, in); we store the transpose so the kernel does x @ W.
    w1 = jax.random.normal(k2, (D_IN, D_HID), dtype=jnp.float32) / math.sqrt(D_IN)
    b1 = 0.02 * jax.random.normal(k3, (D_HID,), dtype=jnp.float32)
    w2 = jax.random.normal(k4, (D_HID, D_OUT), dtype=jnp.float32) / math.sqrt(D_HID)
    b2 = 0.02 * jax.random.normal(k5, (D_OUT,), dtype=jnp.float32)

    ref = mlp_ref(x, w1, b1, w2, b2)

    out = jax.block_until_ready(mlp_forward(x, w1, b1, w2, b2))
    assert out.shape == (B, L, D_OUT), out.shape
    assert jnp.allclose(out, ref, atol=2e-3, rtol=2e-3), float(
        jnp.max(jnp.abs(out - ref)))

    # ---- explicit hidden-dim tiling (reduction grid axis + f32 accumulator) -
    out_t = jax.block_until_ready(mlp_forward(x, w1, b1, w2, b2, block_h=128))
    assert jnp.allclose(out_t, ref, atol=2e-3, rtol=2e-3), float(
        jnp.max(jnp.abs(out_t - ref)))

    # ---- bf16 path: bf16 MXU operands, f32 accumulation, bf16 HBM I/O -------
    xb, w1b, b1b, w2b, b2b = (a.astype(jnp.bfloat16) for a in (x, w1, b1, w2, b2))
    out_bf = jax.block_until_ready(mlp_forward(xb, w1b, b1b, w2b, b2b))
    ref_bf = mlp_ref(xb, w1b, b1b, w2b, b2b)
    assert out_bf.dtype == jnp.bfloat16
    assert jnp.allclose(out_bf.astype(jnp.float32), ref_bf, atol=1e-1, rtol=1e-1), \
        float(jnp.max(jnp.abs(out_bf.astype(jnp.float32) - ref_bf)))

    # ---- channels_first (1x1 Conv2d) config ---------------------------------
    Bc, C, Hc, Wc, HIDc = 2, 32, 8, 8, 64
    kc1, kc2, kc3, kc4 = jax.random.split(k6, 4)
    xc = jax.random.normal(k6, (Bc, C, Hc, Wc), dtype=jnp.float32)
    wc1 = jax.random.normal(kc1, (C, HIDc), dtype=jnp.float32) / math.sqrt(C)
    bc1 = 0.02 * jax.random.normal(kc2, (HIDc,), dtype=jnp.float32)
    wc2 = jax.random.normal(kc3, (HIDc, C), dtype=jnp.float32) / math.sqrt(HIDc)
    bc2 = 0.02 * jax.random.normal(kc4, (C,), dtype=jnp.float32)

    outc = jax.block_until_ready(
        mlp_forward(xc, wc1, bc1, wc2, bc2, channels_first=True))
    refc = mlp_ref(xc, wc1, bc1, wc2, bc2, channels_first=True)
    assert outc.shape == (Bc, C, Hc, Wc), outc.shape
    assert jnp.allclose(outc, refc, atol=2e-3, rtol=2e-3), float(
        jnp.max(jnp.abs(outc - refc)))

    print("KERNEL_OK")
</pallas_src>

<mosaic_0001>
module attributes {stable_mosaic.version = 11 : i64} {
  func.func @_mlp_kernel(%arg0: i32, %arg1: i32, %arg2: memref<64x128xf32, #tpu.memory_space<vmem>>, %arg3: memref<128x256xf32, #tpu.memory_space<vmem>>, %arg4: memref<1x256xf32, #tpu.memory_space<vmem>>, %arg5: memref<256x128xf32, #tpu.memory_space<vmem>>, %arg6: memref<1x128xf32, #tpu.memory_space<vmem>>, %arg7: memref<64x128xf32, #tpu.memory_space<vmem>>, %arg8: memref<64x128xf32, #tpu.memory_space<vmem>>) attributes {dimension_semantics = [#tpu.dimension_semantics<parallel>, #tpu.dimension_semantics<arbitrary>], iteration_bounds = array<i64: 2, 1>, scalar_prefetch = 0 : i64, scratch_operands = 1 : i64, tpu.core_type = #tpu.core_type<tc>, window_params = [{transform_indices = @transform_0, window_bounds = array<i64: 64, 128>}, {pipeline_mode = #tpu.pipeline_mode<synchronous>, transform_indices = @transform_1, window_bounds = array<i64: 128, 256>}, {pipeline_mode = #tpu.pipeline_mode<synchronous>, transform_indices = @transform_2, window_bounds = array<i64: 1, 256>}, {pipeline_mode = #tpu.pipeline_mode<synchronous>, transform_indices = @transform_3, window_bounds = array<i64: 256, 128>}, {pipeline_mode = #tpu.pipeline_mode<synchronous>, transform_indices = @transform_4, window_bounds = array<i64: 1, 128>}, {transform_indices = @transform_5, window_bounds = array<i64: 64, 128>}]} {
    %c0_i32 = arith.constant 0 : i32
    %0 = arith.cmpi eq, %arg1, %c0_i32 : i32
    %1 = arith.extui %0 : i1 to i32
    %c0_i32_0 = arith.constant 0 : i32
    %2 = arith.cmpi ne, %1, %c0_i32_0 : i32
    scf.if %2 {
      %cst_30 = arith.constant 0.000000e+00 : f32
      %60 = vector.broadcast %cst_30 : f32 to vector<64x128xf32>
      %c0_31 = arith.constant 0 : index
      %c0_32 = arith.constant 0 : index
      %61 = vector.load %arg8[%c0_31, %c0_32] : memref<64x128xf32, #tpu.memory_space<vmem>>, vector<64x128xf32>
      tpu.vector_store %arg8[%c0_31, %c0_32], %60 {strides = array<i32>} : memref<64x128xf32, #tpu.memory_space<vmem>>, vector<64x128xf32>,
    } else {
    }
    %c0 = arith.constant 0 : index
    %c0_1 = arith.constant 0 : index
    %3 = vector.load %arg2[%c0, %c0_1] : memref<64x128xf32, #tpu.memory_space<vmem>>, vector<64x128xf32>
    %c0_2 = arith.constant 0 : index
    %c0_3 = arith.constant 0 : index
    %4 = vector.load %arg3[%c0_2, %c0_3] : memref<128x256xf32, #tpu.memory_space<vmem>>, vector<128x256xf32>
    %cst = arith.constant dense<0.000000e+00> : vector<64x256xf32>
    %5 = tpu.matmul %3, %4, %cst {dimension_numbers = #tpu.dot_dimension_numbers<[1], [0], [0], [1], [0, 0, 1, 1], [], []>} : vector<64x128xf32>, vector<128x256xf32>, vector<64x256xf32> -> vector<64x256xf32>
    %c0_4 = arith.constant 0 : index
    %c0_5 = arith.constant 0 : index
    %6 = vector.load %arg4[%c0_4, %c0_5] : memref<1x256xf32, #tpu.memory_space<vmem>>, vector<1x256xf32>
    %7 = vector.broadcast %6 : vector<1x256xf32> to vector<64x256xf32>
    %8 = arith.addf %5, %7 : vector<64x256xf32>
    %cst_6 = arith.constant 5.000000e-01 : f32
    %9 = vector.broadcast %cst_6 : f32 to vector<64x256xf32>
    %10 = arith.mulf %9, %8 : vector<64x256xf32>
    %cst_7 = arith.constant 0.707106769 : f32
    %11 = vector.broadcast %cst_7 : f32 to vector<64x256xf32>
    %12 = arith.mulf %8, %11 : vector<64x256xf32>
    %13 = math.absf %12 : vector<64x256xf32>
    %cst_8 = arith.constant 0.327591091 : f32
    %14 = vector.broadcast %cst_8 : f32 to vector<64x256xf32>
    %15 = arith.mulf %14, %13 : vector<64x256xf32>
    %cst_9 = arith.constant 1.000000e+00 : f32
    %16 = vector.broadcast %cst_9 : f32 to vector<64x256xf32>
    %17 = arith.addf %16, %15 : vector<64x256xf32>
    %18 = tpu.reciprocal %17 {approx = true} : vector<64x256xf32> -> vector<64x256xf32>
    %19 = arith.mulf %17, %18 : vector<64x256xf32>
    %cst_10 = arith.constant 2.000000e+00 : f32
    %20 = vector.broadcast %cst_10 : f32 to vector<64x256xf32>
    %21 = arith.subf %20, %19 : vector<64x256xf32>
    %22 = arith.mulf %18, %21 : vector<64x256xf32>
    %cst_11 = arith.constant 1.06140542 : f32
    %23 = vector.broadcast %cst_11 : f32 to vector<64x256xf32>
    %24 = arith.mulf %22, %23 : vector<64x256xf32>
    %cst_12 = arith.constant -1.45315206 : f32
    %25 = vector.broadcast %cst_12 : f32 to vector<64x256xf32>
    %26 = arith.addf %25, %24 : vector<64x256xf32>
    %27 = arith.mulf %22, %26 : vector<64x256xf32>
    %cst_13 = arith.constant 1.42141378 : f32
    %28 = vector.broadcast %cst_13 : f32 to vector<64x256xf32>
    %29 = arith.addf %28, %27 : vector<64x256xf32>
    %30 = arith.mulf %22, %29 : vector<64x256xf32>
    %cst_14 = arith.constant -0.284496725 : f32
    %31 = vector.broadcast %cst_14 : f32 to vector<64x256xf32>
    %32 = arith.addf %31, %30 : vector<64x256xf32>
    %33 = arith.mulf %22, %32 : vector<64x256xf32>
    %cst_15 = arith.constant 0.254829586 : f32
    %34 = vector.broadcast %cst_15 : f32 to vector<64x256xf32>
    %35 = arith.addf %34, %33 : vector<64x256xf32>
    %36 = arith.mulf %22, %35 : vector<64x256xf32>
    %cst_16 = arith.constant 0.000000e+00 : f32
    %37 = vector.broadcast %cst_16 : f32 to vector<64x256xf32>
    %38 = arith.subf %37, %13 : vector<64x256xf32>
    %39 = arith.mulf %38, %13 : vector<64x256xf32>
    %40 = math.exp %39 : vector<64x256xf32>
    %41 = arith.mulf %36, %40 : vector<64x256xf32>
    %cst_17 = arith.constant 1.000000e+00 : f32
    %42 = vector.broadcast %cst_17 : f32 to vector<64x256xf32>
    %43 = arith.subf %42, %41 : vector<64x256xf32>
    %cst_18 = arith.constant 0.000000e+00 : f32
    %44 = vector.broadcast %cst_18 : f32 to vector<64x256xf32>
    %45 = arith.cmpf oge, %12, %44 : vector<64x256xf32>
    %cst_19 = arith.constant 0.000000e+00 : f32
    %46 = vector.broadcast %cst_19 : f32 to vector<64x256xf32>
    %47 = arith.subf %46, %43 : vector<64x256xf32>
    %48 = arith.select %45, %43, %47 : vector<64x256xi1>, vector<64x256xf32>
    %cst_20 = arith.constant 1.000000e+00 : f32
    %49 = vector.broadcast %cst_20 : f32 to vector<64x256xf32>
    %50 = arith.addf %49, %48 : vector<64x256xf32>
    %51 = arith.mulf %10, %50 : vector<64x256xf32>
    %c0_21 = arith.constant 0 : index
    %c0_22 = arith.constant 0 : index
    %52 = vector.load %arg8[%c0_21, %c0_22] : memref<64x128xf32, #tpu.memory_space<vmem>>, vector<64x128xf32>
    %c0_23 = arith.constant 0 : index
    %c0_24 = arith.constant 0 : index
    %53 = vector.load %arg5[%c0_23, %c0_24] : memref<256x128xf32, #tpu.memory_space<vmem>>, vector<256x128xf32>
    %cst_25 = arith.constant dense<0.000000e+00> : vector<64x128xf32>
    %54 = tpu.matmul %51, %53, %cst_25 {dimension_numbers = #tpu.dot_dimension_numbers<[1], [0], [0], [1], [0, 0, 1, 1], [], []>} : vector<64x256xf32>, vector<256x128xf32>, vector<64x128xf32> -> vector<64x128xf32>
    %55 = arith.addf %52, %54 : vector<64x128xf32>
    %c0_26 = arith.constant 0 : index
    %c0_27 = arith.constant 0 : index
    %56 = vector.load %arg8[%c0_26, %c0_27] : memref<64x128xf32, #tpu.memory_space<vmem>>, vector<64x128xf32>
    tpu.vector_store %arg8[%c0_26, %c0_27], %55 {strides = array<i32>} : memref<64x128xf32, #tpu.memory_space<vmem>>, vector<64x128xf32>,
    %c0_i32_28 = arith.constant 0 : i32
    %57 = arith.cmpi eq, %arg1, %c0_i32_28 : i32
    %58 = arith.extui %57 : i1 to i32
    %c0_i32_29 = arith.constant 0 : i32
    %59 = arith.cmpi ne, %58, %c0_i32_29 : i32
    scf.if %59 {
      %c0_30 = arith.constant 0 : index
      %c0_31 = arith.constant 0 : index
      %60 = vector.load %arg8[%c0_30, %c0_31] : memref<64x128xf32, #tpu.memory_space<vmem>>, vector<64x128xf32>
      %c0_32 = arith.constant 0 : index
      %c0_33 = arith.constant 0 : index
      %61 = vector.load %arg6[%c0_32, %c0_33] : memref<1x128xf32, #tpu.memory_space<vmem>>, vector<1x128xf32>
      %62 = vector.broadcast %61 : vector<1x128xf32> to vector<64x128xf32>
      %63 = arith.addf %60, %62 : vector<64x128xf32>
      %c0_34 = arith.constant 0 : index
      %c0_35 = arith.constant 0 : index
      %64 = vector.load %arg7[%c0_34, %c0_35] : memref<64x128xf32, #tpu.memory_space<vmem>>, vector<64x128xf32>
      tpu.vector_store %arg7[%c0_34, %c0_35], %63 {strides = array<i32>} : memref<64x128xf32, #tpu.memory_space<vmem>>, vector<64x128xf32>,
    } else {
    }
    return
  }
  func.func @transform_0(%arg0: i32, %arg1: i32) -> (i32, i32) {
    %c0_i32 = arith.constant 0 : i32
    %c0_i32_0 = arith.constant 0 : i32
    return %arg0, %c0_i32 : i32, i32
  }
  func.func @transform_1(%arg0: i32, %arg1: i32) -> (i32, i32) {
    %c0_i32 = arith.constant 0 : i32
    %c0_i32_0 = arith.constant 0 : i32
    return %c0_i32, %arg1 : i32, i32
  }
  func.func @transform_2(%arg0: i32, %arg1: i32) -> (i32, i32) {
    %c0_i32 = arith.constant 0 : i32
    %c0_i32_0 = arith.constant 0 : i32
    return %c0_i32, %arg1 : i32, i32
  }
  func.func @transform_3(%arg0: i32, %arg1: i32) -> (i32, i32) {
    %c0_i32 = arith.constant 0 : i32
    %c0_i32_0 = arith.constant 0 : i32
    return %arg1, %c0_i32 : i32, i32
  }
  func.func @transform_4(%arg0: i32, %arg1: i32) -> (i32, i32) {
    %c0_i32 = arith.constant 0 : i32
    %c0_i32_0 = arith.constant 0 : i32
    %c0_i32_1 = arith.constant 0 : i32
    return %c0_i32, %c0_i32_0 : i32, i32
  }
  func.func @transform_5(%arg0: i32, %arg1: i32) -> (i32, i32) {
    %c0_i32 = arith.constant 0 : i32
    %c0_i32_0 = arith.constant 0 : i32
    return %arg0, %c0_i32 : i32, i32
  }
}

module attributes {stable_mosaic.version = 11 : i64} {
  func.func @_mlp_kernel(%arg0: i32, %arg1: i32, %arg2: memref<64x128xf32, #tpu.memory_space<vmem>>, %arg3: memref<128x256xf32, #tpu.memory_space<vmem>>, %arg4: memref<1x256xf32, #tpu.memory_space<vmem>>, %arg5: memref<256x128xf32, #tpu.memory_space<vmem>>, %arg6: memref<1x128xf32, #tpu.memory_space<vmem>>, %arg7: memref<64x128xf32, #tpu.memory_space<vmem>>, %arg8: memref<64x128xf32, #tpu.memory_space<vmem>>) attributes {dimension_semantics = [#tpu.dimension_semantics<parallel>, #tpu.dimension_semantics<arbitrary>], iteration_bounds = array<i64: 2, 1>, scalar_prefetch = 0 : i64, scratch_operands = 1 : i64, tpu.core_type = #tpu.core_type<tc>, window_params = [{transform_indices = @transform_0, window_bounds = array<i64: 64, 128>}, {transform_indices = @transform_1, window_bounds = array<i64: 128, 256>}, {transform_indices = @transform_2, window_bounds = array<i64: 1, 256>}, {transform_indices = @transform_3, window_bounds = array<i64: 256, 128>}, {pipeline_mode = #tpu.pipeline_mode<synchronous>, transform_indices = @transform_4, window_bounds = array<i64: 1, 128>}, {transform_indices = @transform_5, window_bounds = array<i64: 64, 128>}]} {
    %c0_i32 = arith.constant 0 : i32
    %0 = arith.cmpi eq, %arg1, %c0_i32 : i32
    %1 = arith.extui %0 : i1 to i32
    %c0_i32_0 = arith.constant 0 : i32
    %2 = arith.cmpi ne, %1, %c0_i32_0 : i32
    scf.if %2 {
      %cst_30 = arith.constant 0.000000e+00 : f32
      %60 = vector.broadcast %cst_30 : f32 to vector<64x128xf32>
      %c0_31 = arith.constant 0 : index
      %c0_32 = arith.constant 0 : index
      %61 = vector.load %arg8[%c0_31, %c0_32] : memref<64x128xf32, #tpu.memory_space<vmem>>, vector<64x128xf32>
      tpu.vector_store %arg8[%c0_31, %c0_32], %60 {strides = array<i32>} : memref<64x128xf32, #tpu.memory_space<vmem>>, vector<64x128xf32>,
    } else {
    }
    %c0 = arith.constant 0 : index
    %c0_1 = arith.constant 0 : index
    %3 = vector.load %arg2[%c0, %c0_1] : memref<64x128xf32, #tpu.memory_space<vmem>>, vector<64x128xf32>
    %c0_2 = arith.constant 0 : index
    %c0_3 = arith.constant 0 : index
    %4 = vector.load %arg3[%c0_2, %c0_3] : memref<128x256xf32, #tpu.memory_space<vmem>>, vector<128x256xf32>
    %cst = arith.constant dense<0.000000e+00> : vector<64x256xf32>
    %5 = tpu.matmul %3, %4, %cst {dimension_numbers = #tpu.dot_dimension_numbers<[1], [0], [0], [1], [0, 0, 1, 1], [], []>} : vector<64x128xf32>, vector<128x256xf32>, vector<64x256xf32> -> vector<64x256xf32>
    %c0_4 = arith.constant 0 : index
    %c0_5 = arith.constant 0 : index
    %6 = vector.load %arg4[%c0_4, %c0_5] : memref<1x256xf32, #tpu.memory_space<vmem>>, vector<1x256xf32>
    %7 = vector.broadcast %6 : vector<1x256xf32> to vector<64x256xf32>
    %8 = arith.addf %5, %7 : vector<64x256xf32>
    %cst_6 = arith.constant 5.000000e-01 : f32
    %9 = vector.broadcast %cst_6 : f32 to vector<64x256xf32>
    %10 = arith.mulf %9, %8 : vector<64x256xf32>
    %cst_7 = arith.constant 0.707106769 : f32
    %11 = vector.broadcast %cst_7 : f32 to vector<64x256xf32>
    %12 = arith.mulf %8, %11 : vector<64x256xf32>
    %13 = math.absf %12 : vector<64x256xf32>
    %cst_8 = arith.constant 0.327591091 : f32
    %14 = vector.broadcast %cst_8 : f32 to vector<64x256xf32>
    %15 = arith.mulf %14, %13 : vector<64x256xf32>
    %cst_9 = arith.constant 1.000000e+00 : f32
    %16 = vector.broadcast %cst_9 : f32 to vector<64x256xf32>
    %17 = arith.addf %16, %15 : vector<64x256xf32>
    %18 = tpu.reciprocal %17 {approx = true} : vector<64x256xf32> -> vector<64x256xf32>
    %19 = arith.mulf %17, %18 : vector<64x256xf32>
    %cst_10 = arith.constant 2.000000e+00 : f32
    %20 = vector.broadcast %cst_10 : f32 to vector<64x256xf32>
    %21 = arith.subf %20, %19 : vector<64x256xf32>
    %22 = arith.mulf %18, %21 : vector<64x256xf32>
    %cst_11 = arith.constant 1.06140542 : f32
    %23 = vector.broadcast %cst_11 : f32 to vector<64x256xf32>
    %24 = arith.mulf %22, %23 : vector<64x256xf32>
    %cst_12 = arith.constant -1.45315206 : f32
    %25 = vector.broadcast %cst_12 : f32 to vector<64x256xf32>
    %26 = arith.addf %25, %24 : vector<64x256xf32>
    %27 = arith.mulf %22, %26 : vector<64x256xf32>
    %cst_13 = arith.constant 1.42141378 : f32
    %28 = vector.broadcast %cst_13 : f32 to vector<64x256xf32>
    %29 = arith.addf %28, %27 : vector<64x256xf32>
    %30 = arith.mulf %22, %29 : vector<64x256xf32>
    %cst_14 = arith.constant -0.284496725 : f32
    %31 = vector.broadcast %cst_14 : f32 to vector<64x256xf32>
    %32 = arith.addf %31, %30 : vector<64x256xf32>
    %33 = arith.mulf %22, %32 : vector<64x256xf32>
    %cst_15 = arith.constant 0.254829586 : f32
    %34 = vector.broadcast %cst_15 : f32 to vector<64x256xf32>
    %35 = arith.addf %34, %33 : vector<64x256xf32>
    %36 = arith.mulf %22, %35 : vector<64x256xf32>
    %cst_16 = arith.constant 0.000000e+00 : f32
    %37 = vector.broadcast %cst_16 : f32 to vector<64x256xf32>
    %38 = arith.subf %37, %13 : vector<64x256xf32>
    %39 = arith.mulf %38, %13 : vector<64x256xf32>
    %40 = math.exp %39 : vector<64x256xf32>
    %41 = arith.mulf %36, %40 : vector<64x256xf32>
    %cst_17 = arith.constant 1.000000e+00 : f32
    %42 = vector.broadcast %cst_17 : f32 to vector<64x256xf32>
    %43 = arith.subf %42, %41 : vector<64x256xf32>
    %cst_18 = arith.constant 0.000000e+00 : f32
    %44 = vector.broadcast %cst_18 : f32 to vector<64x256xf32>
    %45 = arith.cmpf oge, %12, %44 : vector<64x256xf32>
    %cst_19 = arith.constant 0.000000e+00 : f32
    %46 = vector.broadcast %cst_19 : f32 to vector<64x256xf32>
    %47 = arith.subf %46, %43 : vector<64x256xf32>
    %48 = arith.select %45, %43, %47 : vector<64x256xi1>, vector<64x256xf32>
    %cst_20 = arith.constant 1.000000e+00 : f32
    %49 = vector.broadcast %cst_20 : f32 to vector<64x256xf32>
    %50 = arith.addf %49, %48 : vector<64x256xf32>
    %51 = arith.mulf %10, %50 : vector<64x256xf32>
    %c0_21 = arith.constant 0 : index
    %c0_22 = arith.constant 0 : index
    %52 = vector.load %arg8[%c0_21, %c0_22] : memref<64x128xf32, #tpu.memory_space<vmem>>, vector<64x128xf32>
    %c0_23 = arith.constant 0 : index
    %c0_24 = arith.constant 0 : index
    %53 = vector.load %arg5[%c0_23, %c0_24] : memref<256x128xf32, #tpu.memory_space<vmem>>, vector<256x128xf32>
    %cst_25 = arith.constant dense<0.000000e+00> : vector<64x128xf32>
    %54 = tpu.matmul %51, %53, %cst_25 {dimension_numbers = #tpu.dot_dimension_numbers<[1], [0], [0], [1], [0, 0, 1, 1], [], []>} : vector<64x256xf32>, vector<256x128xf32>, vector<64x128xf32> -> vector<64x128xf32>
    %55 = arith.addf %52, %54 : vector<64x128xf32>
    %c0_26 = arith.constant 0 : index
    %c0_27 = arith.constant 0 : index
    %56 = vector.load %arg8[%c0_26, %c0_27] : memref<64x128xf32, #tpu.memory_space<vmem>>, vector<64x128xf32>
    tpu.vector_store %arg8[%c0_26, %c0_27], %55 {strides = array<i32>} : memref<64x128xf32, #tpu.memory_space<vmem>>, vector<64x128xf32>,
    %c0_i32_28 = arith.constant 0 : i32
    %57 = arith.cmpi eq, %arg1, %c0_i32_28 : i32
    %58 = arith.extui %57 : i1 to i32
    %c0_i32_29 = arith.constant 0 : i32
    %59 = arith.cmpi ne, %58, %c0_i32_29 : i32
    scf.if %59 {
      %c0_30 = arith.constant 0 : index
      %c0_31 = arith.constant 0 : index
      %60 = vector.load %arg8[%c0_30, %c0_31] : memref<64x128xf32, #tpu.memory_space<vmem>>, vector<64x128xf32>
      %c0_32 = arith.constant 0 : index
      %c0_33 = arith.constant 0 : index
      %61 = vector.load %arg6[%c0_32, %c0_33] : memref<1x128xf32, #tpu.memory_space<vmem>>, vector<1x128xf32>
      %62 = vector.broadcast %61 : vector<1x128xf32> to vector<64x128xf32>
      %63 = arith.addf %60, %62 : vector<64x128xf32>
      %c0_34 = arith.constant 0 : index
      %c0_35 = arith.constant 0 : index
      %64 = vector.load %arg7[%c0_34, %c0_35] : memref<64x128xf32, #tpu.memory_space<vmem>>, vector<64x128xf32>
      tpu.vector_store %arg7[%c0_34, %c0_35], %63 {strides = array<i32>} : memref<64x128xf32, #tpu.memory_space<vmem>>, vector<64x128xf32>,
    } else {
    }
    return
  }
  func.func @transform_0(%arg0: i32, %arg1: i32) -> (i32, i32) {
    %c0_i32 = arith.constant 0 : i32
    %c0_i32_0 = arith.constant 0 : i32
    return %arg0, %c0_i32 : i32, i32
  }
  func.func @transform_1(%arg0: i32, %arg1: i32) -> (i32, i32) {
    %c0_i32 = arith.constant 0 : i32
    %c0_i32_0 = arith.constant 0 : i32
    return %c0_i32, %arg1 : i32, i32
  }
  func.func @transform_2(%arg0: i32, %arg1: i32) -> (i32, i32) {
    %c0_i32 = arith.constant 0 : i32
    %c0_i32_0 = arith.constant 0 : i32
    return %c0_i32, %arg1 : i32, i32
  }
  func.func @transform_3(%arg0: i32, %arg1: i32) -> (i32, i32) {
    %c0_i32 = arith.constant 0 : i32
    %c0_i32_0 = arith.constant 0 : i32
    return %arg1, %c0_i32 : i32, i32
  }
  func.func @transform_4(%arg0: i32, %arg1: i32) -> (i32, i32) {
    %c0_i32 = arith.constant 0 : i32
    %c0_i32_0 = arith.constant 0 : i32
    %c0_i32_1 = arith.constant 0 : i32
    return %c0_i32, %c0_i32_0 : i32, i32
  }
  func.func @transform_5(%arg0: i32, %arg1: i32) -> (i32, i32) {
    %c0_i32 = arith.constant 0 : i32
    %c0_i32_0 = arith.constant 0 : i32
    return %arg0, %c0_i32 : i32, i32
  }
}

</mosaic_0001>

<bundles_post_ra>
// kernel: tpu_custom_call.1
= control target key start
LH: loop header
LB: loop body
LE: loop exit
PB: predicated region body
PF: predicated region fallthrough
CT: control target
= control target key end

     0   :  { %10 = vsyncpa [#allocation4], 0  ;;  %s2410_s0 = inlined_call_operand.hbm [shape: f32[114,128], index: 0, kind: input, shape index: {}]   ;;  %s2411_s1 = inlined_call_operand.hbm [shape: f32[128,256], index: 1, kind: input, shape index: {}]   ;;  %s2412_s2 = inlined_call_operand.vmem [shape: f32[1,256], index: 2, kind: input, shape index: {}]   ;;  %s2413_s3 = inlined_call_operand.hbm [shape: f32[256,128], index: 3, kind: input, shape index: {}]   ;;  %s2414_s4 = inlined_call_operand.vmem [shape: f32[1,128], index: 4, kind: input, shape index: {}]   ;;  %s2415_s5 = inlined_call_operand.hbm [shape: f32[114,128], index: 5, kind: output, shape index: {}]  }
   0x1   :  { %12 = vsyncpa [#allocation4 + $0x1], 0 }
   0x2   :  { %13 = vsyncpa [#allocation7], 0 }
   0x3   :  { %14 = vsyncpa [#allocation5], 0 }
   0x4   :  { %16 = vsyncpa [#allocation5 + $0x1], 0  ;;  %s1752_s18 = smov 0   ;;  %s1754_s19 = smov 0  }
   0x5   :  { %s1756_s20 = smov 0   ;;  %s1758_s21 = smov 0  }
   0x6   :  { %s1760_s22 = smov 0   ;;  %s1762_s23 = smov 0  }
   0x7 LB: > { %s1309_s24 = sadd.s32 4294967295, %s1707_s23   ;;  %s1310_s25 = sadd.s32 4294967294, %s1707_s23   ;;  %s1707_s23 = sphi %s1762_s23, %s22_s23   ;;  %s1703_s22 = sphi %s1760_s22, %s2496_s22   ;;  %s1699_s21 = sphi %s1758_s21, %s2495_s21   ;;  %s1695_s20 = sphi %s1756_s20, %s2494_s20   ;;  %s1691_s19 = sphi %s1754_s19, %s2493_s19   ;;  %s1687_s18 = sphi %s1752_s18, %s2492_s18  }
   0x8   : > { %s34_s26 = sadd.s32 1, %s1703_s22  ;;  %s41_s27 = sadd.s32 1, %s1695_s20 }
   0x9   : > { %p36_p0 = scmp.ge.s32.totalorder %s34_s26, 2  ;;  %p48_p1 = scmp.ne.s32.totalorder %s1695_s20, %s1691_s19 }
   0xa   : > { %p49_p2 = scmp.eq.s32.totalorder %s1707_s23, 0  ;;  %p54_p3 = scmp.ne.s32.totalorder %s1691_s19, %s1687_s18 }
   0xb   : > { %s2498_s26 = smov (%p36_p0, %s34_s26), 0  ;;  %p1797_p5 = scmp.eq.s32.totalorder %s1309_s24, 0 }
   0xc   : > { %2435 = sst [smem:[#allocation13_spill]] %s2498_s26  ;;  %p1793_p4 = por %p49_p2, %p48_p1 }
   0xd   : > { %s2437_s29 = scalar_select %p1797_p5, 1, 0 }
   0xe   : > { %s38_s30 = ssub.s32 %s1703_s22, %s2498_s26  ;;  %p177_p6 = scmp.eq.s32.totalorder %s1309_s24, 1 }
   0xf   : > { %p39_p7 = scmp.eq.s32.totalorder %s38_s30, 0  ;;  %p1805_p8 = por %p1797_p5, %p54_p3 }
  0x10   : > { %p1809_p9 = por %p177_p6, %p48_p1  ;;  %p183_p10 = scmp.eq.s32.totalorder %s1310_s25, 1 }
  0x11   : > { %s2438_s6 = scalar_select %p1805_p8, 1, 0 }
  0x12   : > { %s2439_s7 = scalar_select %p1809_p9, 1, 0 }
  0x13   : > { %s1814_s8 = scalar_select %p39_p7, %s1695_s20, %s41_s27  }
  0x14   : > { %p1816_p11 = por %p183_p10, %p54_p3  ;;  %p1311_p12 = scmp.ge.s32.totalorder %s1707_s23, 1 }
  0x15   : > { %p190_p13 = scmp.lt.s32.totalorder %s1707_s23, 3  ;;  %s1709_s11 = smov [#allocation6]  }
  0x16   : > { %s2440_s9 = scalar_select %p1816_p11, 1, 0 }
  0x17   : > { %p1822_p0 = pnand %p1311_p12, %p190_p13  ;;  %s205_s12 = sshll.u32 %s1709_s11, 4  ;;  %s206_s12 = int_to_ptr.vmem [resolvable:$true] %s205_s12 }
  0x18   : > { %s1710_s13 = smov [#allocation8]   ;;  %s1556_s16 = scalar_lea.vmem %s206_s12, 4096 }
  0x19   : > { %p1406_p1 = pneg %p1822_p0  ;;  %s229_s14 = sshll.u32 %s1710_s13, 4  ;;  %s230_s14 = int_to_ptr.vmem [resolvable:$true] %s229_s14 }
  0x1a   : > { %p1557_p6 = scmp.ne.s32.totalorder %s206_s12, %s1556_s16  ;;  %p1564_p12 = scmp.lt.s32.totalorder %s206_s12, %s206_s12 }
  0x1b   : > { %p1830_p2 = pnand %p1406_p1, %p1797_p5  ;;  %p1565_p13 = scmp.lt.s32.totalorder %s1556_s16, %s1556_s16 }
  0x1d   : > { %p1547_p3 = pneg %p1830_p2  ;;  %p1566_p11 = por %p1565_p13, %p1564_p12 }
  0x1f   : > { %p1559_p7 = pnand %p1557_p6, %p1547_p3 }
  0x21   : > { %p1560_p10 = pneg %p1559_p7 }
  0x23   : > { %p1567_p9 = pnand %p1566_p11, %p1560_p10 }
  0x25   : > { %1570 = shalt.err (!%p1567_p9)
}
  0x26   : > { %s1711_s17 = smov 256   ;;  %s1712_s24 = smov 16  }
  0x27   : > { %1409 = dma.hbm_to_vmem [thread:$0]  (!%p1830_p2), %s2411_s1, 4096, %s206_s12, [#allocation7], %s1711_s17, %s1711_s17, %s1712_s24  }
  0x28   : > { %s1582_s30 = scalar_lea.vmem %s230_s14, 4096  ;;  %p1590_p5 = scmp.lt.s32.totalorder %s230_s14, %s230_s14 }
  0x29   : > { %p1583_p1 = scmp.ne.s32.totalorder %s230_s14, %s1582_s30  ;;  %p1591_p8 = scmp.lt.s32.totalorder %s1582_s30, %s1582_s30 }
  0x2b   : > { %p1585_p6 = pnand %p1583_p1, %p1547_p3  ;;  %p1592_p12 = por %p1591_p8, %p1590_p5 }
  0x2d   : > { %p1586_p7 = pneg %p1585_p6 }
  0x2f   : > { %p1593_p11 = pnand %p1592_p12, %p1586_p7 }
  0x31   : > { %1596 = shalt.err (!%p1593_p11)
}
  0x32   : > { %s1713_s11 = smov 128   ;;  %s1714_s13 = smov 8  }
  0x33   : > { %1412 = dma.hbm_to_vmem [thread:$0]  (!%p1830_p2), %s2413_s3, 4096, %s230_s14, [#allocation7], %s1713_s11, %s1713_s11, %s1714_s13  }
  0x34   : > { %p1315_p9 = scmp.ge.s32.totalorder %s1707_s23, 2 }
  0x36   : > { %242 = sbr.rel (%p1315_p9) target bundleno = 91 (0x5b), region = 32 }
  0x3b   : > { %245 = sbr.rel (!%p1793_p4) target bundleno = 91 (0x5b), region = 36  ;;  %s246_s12 = sand.u32 (%p1793_p4), 1, %s1695_s20  }
  0x3c   : > { %s1317_s17 = sshll.u32 (%p1793_p4), %s1703_s22, 3  ;;  %s1316_s24 = sshll.u32 (%p1793_p4), %s246_s12, 6 }
  0x3d   : > { %s252_s25 = ssub.s32 (%p1793_p4), 15, %s1317_s17  ;;  %s1862_s14 = scalar_lea.sflag (%p1793_p4), [#allocation4], %s246_s12 }
  0x3e   : > { %p253_p5 = scmp.lt.s32.totalorder (%p1793_p4), %s252_s25, 8  ;;  %s250_s27 = scalar_lea.vmem (%p1793_p4), [#allocation3], %s1316_s24 }
  0x40   : > { %s2500_s25 = smov (!%p253_p5, %s252_s25), 8 }
  0x41   : > { %s1859_s15 = sshll.u32 %s2500_s25, 7 }
  0x42   : > { %s257_s26 = ssub.s32 1024, %s1859_s15 }
  0x43   : > { %258 = vsyncadd %s1862_s14, %s257_s26  ;;  %p1319_p4 = scmp.ne.s32.totalorder %s1859_s15, 0  ;;  %s1338_s28 = sshll.u32 %s1703_s22, 10 }
  0x44   : > { %s1870_s13 = scalar_lea.hbm %s2410_s0, %s1338_s28  ;;  %s263_s16 = sshll.u32 %s250_s27, 4  ;;  %s1872_s16 = int_to_ptr.vmem [resolvable:$true] %s263_s16 }
  0x45   : > { %s1597_s12 = scalar_lea.hbm %s1870_s13, %s1859_s15  ;;  %s1601_s25 = scalar_lea.hbm %s2410_s0, 1920 }
  0x46   : > { %p1598_p8 = scmp.ne.s32.totalorder %s1870_s13, %s1597_s12  ;;  %p1603_p10 = scmp.lt.s32.totalorder %s1601_s25, %s1597_s12 }
  0x48   : > { %p1599_p2 = pnand %p1598_p8, %p1319_p4 }
  0x4a   : > { %p1600_p3 = pneg %p1599_p2 }
  0x4c   : > { %p1605_p13 = pnand %p1603_p10, %p1600_p3 }
  0x4e   : > { %1608 = shalt.err (!%p1605_p13)
}
  0x4f   : > { %s1609_s26 = scalar_lea.vmem %s1872_s16, %s1859_s15  ;;  %s1715_s27 = smov [#allocation3]  }
  0x50   : > { %p1610_p1 = scmp.ne.s32.totalorder %s1872_s16, %s1609_s26  ;;  %s1613_s28 = sshll.u32 %s1715_s27, 4  ;;  %s1614_s28 = int_to_ptr.vmem [resolvable:$false] %s1613_s28 }
  0x51   : > { %s1615_s30 = scalar_lea.vmem %s1614_s28, 2048  ;;  %p1616_p12 = scmp.lt.s32.totalorder %s1872_s16, %s1614_s28 }
  0x52   : > { %p1611_p6 = pnand %p1610_p1, %p1319_p4  ;;  %p1617_p11 = scmp.lt.s32.totalorder %s1615_s30, %s1609_s26 }
  0x54   : > { %p1612_p7 = pneg %p1611_p6  ;;  %p1618_p5 = por %p1617_p11, %p1616_p12 }
  0x56   : > { %p1619_p8 = pnand %p1618_p5, %p1612_p7 }
  0x58   : > { %1622 = shalt.err (!%p1619_p8)
}
  0x59   : > { %s1716_s11 = smov 128   ;;  %s1717_s12 = smov 8  }
  0x5a   : > { %269 = dma.hbm_to_vmem [thread:$0]  (%p1319_p4), %s1870_s13, %s1859_s15, %s1872_s16, %s1862_s14, %s1716_s11, %s1716_s11, %s1717_s12  }
  0x5b PF: > { %275 = sbr.rel (%p1822_p0) target bundleno = 695 (0x2b7), region = 40 }
  0x60   : > { %s1897_s17 = sand.u32 1, %s1691_s19   ;;  %p2443_p2 = scmp.ne.s32.totalorder %s2438_s6, 0 }
  0x61   : > { %s1324_s24 = sshll.u32 %s1897_s17, 6  ;;  %s278_s25 = scalar_lea.sflag [#allocation4], %s1897_s17 }
  0x62   : > { %s1903_s26 = scalar_lea.vmem [#allocation3], %s1324_s24 }
  0x63   : > { %1674 = dma.done.wait (%p2443_p2), %s278_s25, 1024  }
  0x64   : > { %1676 = vsyncadd (%p2443_p2), %s278_s25, 4294966272  ;;  %p2444_p4 = scmp.ne.s32.totalorder %s2437_s29, 0 }
  0x66   : > { %1678 = dma.done.wait (%p2444_p4), [#allocation7], 8192  }
  0x67   : > { %1680 = vsyncadd (%p2444_p4), [#allocation7], 4294959104  ;;  %v1718_v0 = vmov 0.0   ;;  %v388_v1 = vld [vmem:[#allocation6 + $0xf8] sm:$0xff]  ;;  %v387_v2 = vld [vmem:[#allocation6 + $0xf0] sm:$0xff]  ;;  %s2333_s14 = scalar_lea.vmem [#allocation9], %s1324_s24 }
  0x68   : > { %465 = vmatprep.mubr.f32.mxu0 %v1718_v0  ;;  %v386_v3 = vld [vmem:[#allocation6 + $0xe8] sm:$0xff]  ;;  %401 = vmatprep.subr.mxu0 %v388_v1  ;;  %v385_v4 = vld [vmem:[#allocation6 + $0xe0] sm:$0xff]  ;;  %v384_v5 = vld [vmem:[#allocation6 + $0xd8] sm:$0xff]  ;;  %s1174_s13 = scalar_lea.sflag [#allocation5], %s1897_s17  ;;  %p2489_p0 = scmp.ne.s32.totalorder %s2439_s7, 0 }
  0x69   : > { %402 = vmatpush1.msra.mxu0 %v387_v2  ;;  %v383_v6 = vld [vmem:[#allocation6 + $0xd0] sm:$0xff]  ;;  %v382_v7 = vld [vmem:[#allocation6 + $0xc8] sm:$0xff]  ;;  %v381_v8 = vld [vmem:[#allocation6 + $0xc0] sm:$0xff]  ;;  %s1330_s16 = sshll.u32 (%p2489_p0), %s1699_s21, 3 }
  0x6a   : > { %403 = vmatprep.subr.mxu0 %v386_v3  ;;  %v380_v9 = vld [vmem:[#allocation6 + $0xb8] sm:$0xff]  ;;  %v379_v10 = vld [vmem:[#allocation6 + $0xb0] sm:$0xff]  ;;  %v378_v11 = vld [vmem:[#allocation6 + $0xa8] sm:$0xff]  ;;  %s1182_s27 = ssub.s32 (%p2489_p0), 15, %s1330_s16 }
  0x6b   : > { %404 = vmatpush1.msra.mxu0 %v385_v4  ;;  %v377_v12 = vld [vmem:[#allocation6 + $0xa0] sm:$0xff]  ;;  %v376_v13 = vld [vmem:[#allocation6 + $0x98] sm:$0xff]  ;;  %v375_v14 = vld [vmem:[#allocation6 + $0x90] sm:$0xff]  ;;  %p1183_p3 = scmp.lt.s32.totalorder (%p2489_p0), %s1182_s27, 8 }
  0x6c   : > { %405 = vmatprep.subr.mxu0 %v384_v5  ;;  %v374_v15 = vld [vmem:[#allocation6 + $0x88] sm:$0xff]  ;;  %v373_v16 = vld [vmem:[#allocation6 + $0x80] sm:$0xff]  ;;  %v372_v17 = vld [vmem:[#allocation6 + $0x78] sm:$0xff] }
  0x6d   : > { %406 = vmatpush1.msra.mxu0 %v383_v6  ;;  %v371_v18 = vld [vmem:[#allocation6 + $0x70] sm:$0xff]  ;;  %v370_v19 = vld [vmem:[#allocation6 + $0x68] sm:$0xff]  ;;  %v369_v20 = vld [vmem:[#allocation6 + $0x60] sm:$0xff] }
  0x6e   : > { %407 = vmatprep.subr.mxu0 %v382_v7  ;;  %v368_v21 = vld [vmem:[#allocation6 + $0x58] sm:$0xff]  ;;  %v367_v22 = vld [vmem:[#allocation6 + $0x50] sm:$0xff]  ;;  %v366_v23 = vld [vmem:[#allocation6 + $0x48] sm:$0xff] }
  0x6f   : > { %408 = vmatpush1.msra.mxu0 %v381_v8  ;;  %v365_v24 = vld [vmem:[#allocation6 + $0x40] sm:$0xff]  ;;  %v364_v25 = vld [vmem:[#allocation6 + $0x38] sm:$0xff]  ;;  %v363_v26 = vld [vmem:[#allocation6 + $0x30] sm:$0xff] }
  0x70   : > { %409 = vmatprep.subr.mxu0 %v380_v9  ;;  %v362_v27 = vld [vmem:[#allocation6 + $0x28] sm:$0xff]  ;;  %v361_v28 = vld [vmem:[#allocation6 + $0x20] sm:$0xff]  ;;  %v360_v29 = vld [vmem:[#allocation6 + $0x18] sm:$0xff]  ;;  %v391_v9 = vlaneseq }
  0x71   : > { %410 = vmatpush1.msra.mxu0 %v379_v10  ;;  %v359_v30 = vld [vmem:[#allocation6 + $0x10] sm:$0xff]  ;;  %v358_v31 = vld [vmem:[#allocation6 + $0x8] sm:$0xff]  ;;  %v357_v32 = vld [vmem:[#allocation6] sm:$0xff] }
  0x72   : > { %411 = vmatprep.subr.mxu0 %v378_v11  ;;  %v349_v33 = vld [vmem:[%s1903_s26] sm:$0xff]  ;;  %v350_v34 = vld [vmem:[%s1903_s26 + $0x8] sm:$0xff]  ;;  %v351_v35 = vld [vmem:[%s1903_s26 + $0x10] sm:$0xff]  ;;  %v392_v10 = vshrl.u32 %v391_v9, 7 }
  0x73   : > { %412 = vmatpush1.msra.mxu0 %v377_v12  ;;  %v352_v36 = vld [vmem:[%s1903_s26 + $0x18] sm:$0xff]  ;;  %v353_v37 = vld [vmem:[%s1903_s26 + $0x20] sm:$0xff]  ;;  %v354_v38 = vld [vmem:[%s1903_s26 + $0x28] sm:$0xff] }
  0x74   : > { %413 = vmatprep.subr.mxu0 %v376_v13  ;;  %v355_v39 = vld [vmem:[%s1903_s26 + $0x30] sm:$0xff]  ;;  %v356_v40 = vld [vmem:[%s1903_s26 + $0x38] sm:$0xff]  ;;  %v1015_v45 = vld [vmem:[#allocation8 + $0xe8] sm:$0xff]  ;;  %v393_v11 = vsub.s32 0, %v392_v10  ;;  %v397_v13 = vsub.s32 1, %v392_v10 }
  0x75   : > { %414 = vmatpush1.msra.mxu0 %v375_v14  ;;  %v1017_v41 = vld [vmem:[#allocation8 + $0xf8] sm:$0xff]  ;;  %v1016_v43 = vld [vmem:[#allocation8 + $0xf0] sm:$0xff]  ;;  %v999_v46 = vld [vmem:[#allocation8 + $0x68] sm:$0xff] }
  0x76   : > { %415 = vmatprep.subr.mxu0 %v374_v15  ;;  %1340 = vmatprep.subr.mxu1 %v1017_v41  ;;  %v1001_v42 = vld [vmem:[#allocation8 + $0x78] sm:$0xff]  ;;  %v1000_v44 = vld [vmem:[#allocation8 + $0x70] sm:$0xff]  ;;  %v1014_v47 = vld [vmem:[#allocation8 + $0xe0] sm:$0xff] }
  0x77   : > { %416 = vmatpush1.msra.mxu0 %v373_v16  ;;  %1341 = vmatpush3.msra.mxu1 %v1001_v42  ;;  %v998_v48 = vld [vmem:[#allocation8 + $0x60] sm:$0xff]  ;;  %v1013_v49 = vld [vmem:[#allocation8 + $0xd8] sm:$0xff]  ;;  %v1012_v51 = vld [vmem:[#allocation8 + $0xd0] sm:$0xff] }
  0x78   : > { %417 = vmatprep.subr.mxu0 %v372_v17  ;;  %1342 = vmatprep.subr.mxu1 %v1016_v43  ;;  %v997_v50 = vld [vmem:[#allocation8 + $0x58] sm:$0xff]  ;;  %v996_v52 = vld [vmem:[#allocation8 + $0x50] sm:$0xff]  ;;  %v1011_v53 = vld [vmem:[#allocation8 + $0xc8] sm:$0xff] }
  0x79   : > { %418 = vmatpush1.msra.mxu0 %v371_v18  ;;  %1343 = vmatpush3.msra.mxu1 %v1000_v44  ;;  %v995_v54 = vld [vmem:[#allocation8 + $0x48] sm:$0xff]  ;;  %v1010_v55 = vld [vmem:[#allocation8 + $0xc0] sm:$0xff]  ;;  %v1009_v57 = vld [vmem:[#allocation8 + $0xb8] sm:$0xff] }
  0x7a   : > { %419 = vmatprep.subr.mxu0 %v370_v19  ;;  %1344 = vmatprep.subr.mxu1 %v1015_v45  ;;  %v994_v56 = vld [vmem:[#allocation8 + $0x40] sm:$0xff]  ;;  %v993_v58 = vld [vmem:[#allocation8 + $0x38] sm:$0xff]  ;;  %v1008_v59 = vld [vmem:[#allocation8 + $0xb0] sm:$0xff] }
  0x7b   : > { %420 = vmatpush1.msra.mxu0 %v369_v20  ;;  %1345 = vmatpush3.msra.mxu1 %v999_v46  ;;  %v992_v60 = vld [vmem:[#allocation8 + $0x30] sm:$0xff]  ;;  %v1007_v61 = vld [vmem:[#allocation8 + $0xa8] sm:$0xff]  ;;  %v1006_v63 = vld [vmem:[#allocation8 + $0xa0] sm:$0xff] }
  0x7c   : > { %421 = vmatprep.subr.mxu0 %v368_v21  ;;  %1346 = vmatprep.subr.mxu1 %v1014_v47  ;;  %v991_v62 = vld [vmem:[#allocation8 + $0x28] sm:$0xff]  ;;  %v1005_v1 = vld [vmem:[#allocation8 + $0x98] sm:$0xff]  ;;  %v1004_v3 = vld [vmem:[#allocation8 + $0x90] sm:$0xff] }
  0x7d   : > { %422 = vmatpush1.msra.mxu0 %v367_v22  ;;  %1347 = vmatpush3.msra.mxu1 %v998_v48  ;;  %v989_v2 = vld [vmem:[#allocation8 + $0x18] sm:$0xff]  ;;  %v988_v4 = vld [vmem:[#allocation8 + $0x10] sm:$0xff]  ;;  %v1003_v5 = vld [vmem:[#allocation8 + $0x88] sm:$0xff] }
  0x7e   : > { %423 = vmatprep.subr.mxu0 %v366_v23  ;;  %1348 = vmatprep.subr.mxu1 %v1013_v49  ;;  %v987_v6 = vld [vmem:[#allocation8 + $0x8] sm:$0xff]  ;;  %v1002_v7 = vld [vmem:[#allocation8 + $0x80] sm:$0xff] }
  0x7f   : > { %424 = vmatpush1.msra.mxu0 %v365_v24  ;;  %1349 = vmatpush3.msra.mxu1 %v997_v50  ;;  %v986_v8 = vld [vmem:[#allocation8] sm:$0xff] }
  0x80   : > { %425 = vmatprep.subr.mxu0 %v364_v25  ;;  %1350 = vmatprep.subr.mxu1 %v1012_v51  ;;  %v389_v12 = vld [vmem:[%s2412_s2] sm:$0x3] }
  0x81   : > { %426 = vmatpush1.msra.mxu0 %v363_v26  ;;  %1351 = vmatpush3.msra.mxu1 %v996_v52  ;;  %v1932_v14 = vrot.slane %v389_v12, %v393_v11  ;;  %v1934_v15 = vrot.slane %v389_v12, %v397_v13 }
  0x82   : > { %427 = vmatprep.subr.mxu0 %v362_v27  ;;  %1352 = vmatprep.subr.mxu1 %v1011_v53 }
  0x83   : > { %428 = vmatpush1.msra.mxu0 %v361_v28  ;;  %1353 = vmatpush3.msra.mxu1 %v995_v54 }
  0x84   : > { %429 = vmatprep.subr.mxu0 %v360_v29  ;;  %1354 = vmatprep.subr.mxu1 %v1010_v55 }
  0x85   : > { %430 = vmatpush1.msra.mxu0 %v359_v30  ;;  %1355 = vmatpush3.msra.mxu1 %v994_v56 }
  0x86   : > { %431 = vmatprep.subr.mxu0 %v358_v31  ;;  %1356 = vmatprep.subr.mxu1 %v1009_v57 }
  0x87   : > { %432 = vmatpush1.msra.mxu0 %v357_v32  ;;  %1357 = vmatpush3.msra.mxu1 %v993_v58 }
  0x88   : > { %466 = vmatmul.mubr.f32.vlgmr.msra.gmra.mxu0 %v349_v33  ;;  %1358 = vmatprep.subr.mxu1 %v1008_v59 }
  0x89   : > { %471 = vmatprep.mubr.f32.mxu0 %v1718_v0  ;;  %1359 = vmatpush3.msra.mxu1 %v992_v60 }
  0x8a   : > { %1360 = vmatprep.subr.mxu1 %v1007_v61 }
  0x8b   : > { %1361 = vmatpush3.msra.mxu1 %v991_v62 }
  0x8c   : > { %472 = vmatmul.mubr.f32.gmra.mxu0 %v350_v34  ;;  %1362 = vmatprep.subr.mxu1 %v1006_v63 }
  0x8d   : > { %477 = vmatprep.mubr.f32.mxu0 %v1718_v0 }
  0x90   : > { %478 = vmatmul.mubr.f32.gmra.mxu0 %v351_v35 }
  0x91   : > { %483 = vmatprep.mubr.f32.mxu0 %v1718_v0 }
  0x94   : > { %484 = vmatmul.mubr.f32.gmra.mxu0 %v352_v36 }
  0x95   : > { %489 = vmatprep.mubr.f32.mxu0 %v1718_v0 }
  0x98   : > { %490 = vmatmul.mubr.f32.gmra.mxu0 %v353_v37 }
  0x99   : > { %495 = vmatprep.mubr.f32.mxu0 %v1718_v0 }
  0x9c   : > { %496 = vmatmul.mubr.f32.gmra.mxu0 %v354_v38 }
  0x9d   : > { %501 = vmatprep.mubr.f32.mxu0 %v1718_v0 }
  0xa0   : > { %502 = vmatmul.mubr.f32.gmra.mxu0 %v355_v39 }
  0xa1   : > { %507 = vmatprep.mubr.f32.mxu0 %v1718_v0  ;;  %v990_v0 = vld [vmem:[#allocation8 + $0x20] sm:$0xff] }
  0xa2   : > { %1363 = vmatpush3.msra.mxu1 %v990_v0 }
  0xa3   : > { %1364 = vmatprep.subr.mxu1 %v1005_v1 }
  0xa4   : > { %508 = vmatmul.mubr.f32.gmra.mxu0 %v356_v40  ;;  %1365 = vmatpush3.msra.mxu1 %v989_v2 }
  0xa5   : > { %1366 = vmatprep.subr.mxu1 %v1004_v3 }
  0xa6   : > { %1367 = vmatpush3.msra.mxu1 %v988_v4 }
  0xa7   : > { %1368 = vmatprep.subr.mxu1 %v1003_v5 }
  0xa8   : > { %1369 = vmatpush3.msra.mxu1 %v987_v6 }
  0xa9   : > { %1370 = vmatprep.subr.mxu1 %v1002_v7 }
  0xaa   : > { %1371 = vmatpush3.msra.mxu1 %v986_v8 }
 0x148   : > { %v467_v16 = vpop.f32.mrf.mxu0 }
 0x149   : > { %v468_v17 = vadd.f32 %v467_v16, %v1932_v14 }
 0x14a   : > { %v469_v18 = vpop.f32.mrf.mxu0 }
 0x14b   : > { %v1937_v19 = vmul.f32 0.70710677, %v468_v17  ;;  %v470_v20 = vadd.f32 %v469_v18, %v1934_v15  ;;  %v1976_v57 = vmul.f32 0.5, %v468_v17 }
 0x14c   : > { %v473_v21 = vpop.f32.mrf.mxu0 }
 0x14d   : > { %v546_v22 = vand.u32 2147483647, %v1937_v19  ;;  %v1941_v23 = vmul.f32 0.70710677, %v470_v20  ;;  %v474_v24 = vadd.f32 %v473_v21, %v1932_v14  ;;  %v1991_v10 = vmul.f32 0.5, %v470_v20 }
 0x14e   : > { %v475_v25 = vpop.f32.mrf.mxu0  ;;  %vm898_vm1 = vcmp.ge.f32.partialorder %v1937_v19, 0.0 }
 0x14f   : > { %v562_v26 = vmul.f32 0.3275911, %v546_v22  ;;  %v547_v27 = vand.u32 2147483647, %v1941_v23  ;;  %v1945_v28 = vmul.f32 0.70710677, %v474_v24  ;;  %v1948_v29 = vadd.f32 %v475_v25, %v1934_v15 }
 0x150   : > { %v479_v30 = vpop.f32.mrf.mxu0  ;;  %v802_v36 = vsub.f32 0.0, %v546_v22  ;;  %v1995_v17 = vmul.f32 0.5, %v474_v24  ;;  %vm899_vm0 = vcmp.ge.f32.partialorder %v1941_v23, 0.0 }
 0x151   : > { %v1950_v31 = vadd.f32 1.0, %v562_v26  ;;  %v563_v32 = vmul.f32 0.3275911, %v547_v27  ;;  %v548_v33 = vand.u32 2147483647, %v1945_v28  ;;  %v803_v37 = vsub.f32 0.0, %v547_v27 }
 0x152   : > { %v1954_v34 = vmul.f32 0.70710677, %v1948_v29  ;;  %v481_v35 = vpop.f32.mrf.mxu0  ;;  %v480_v42 = vadd.f32 %v479_v30, %v1932_v14  ;;  %v818_v48 = vmul.f32 %v802_v36, %v546_v22  ;;  %v2005_v24 = vmul.f32 0.5, %v1948_v29 }
 0x153   : > { %1481 = vrcp.f32 %v1950_v31  ;;  %v1957_v38 = vadd.f32 1.0, %v563_v32  ;;  %v564_v39 = vmul.f32 0.3275911, %v548_v33  ;;  %v1962_v43 = vadd.f32 %v481_v35, %v1934_v15 }
 0x154   : > { %v549_v40 = vand.u32 2147483647, %v1954_v34  ;;  %v485_v41 = vpop.f32.mrf.mxu0  ;;  %v1966_v47 = vmul.f32 0.70710677, %v480_v42  ;;  %v819_v49 = vmul.f32 %v803_v37, %v547_v27  ;;  %v804_v50 = vsub.f32 0.0, %v548_v33 }
 0x155   : > { %v1964_v46 = vadd.f32 1.0, %v564_v39  ;;  %1483 = vrcp.f32 %v1957_v38  ;;  %v1973_v54 = vmul.f32 0.70710677, %v1962_v43  ;;  %v486_v55 = vadd.f32 %v485_v41, %v1932_v14 }
 0x156   : > { %v565_v44 = vmul.f32 0.3275911, %v549_v40  ;;  %v487_v45 = vpop.f32.mrf.mxu0  ;;  %v805_v52 = vsub.f32 0.0, %v549_v40  ;;  %v550_v53 = vand.u32 2147483647, %v1966_v47  ;;  %v820_v61 = vmul.f32 %v804_v50, %v548_v33 }
 0x157   : > { %1485 = vrcp.f32 %v1964_v46  ;;  %v488_v59 = vadd.f32 %v487_v45, %v1934_v15  ;;  %v834_v60 = vmul.f32 1.442695, %v818_v48  ;;  %v551_v62 = vand.u32 2147483647, %v1973_v54 }
 0x158   : > { %v1969_v51 = vadd.f32 1.0, %v565_v44  ;;  %v491_v56 = vpop.f32.mrf.mxu0  ;;  %v566_v58 = vmul.f32 0.3275911, %v550_v53  ;;  %v1981_v63 = vmul.f32 0.70710677, %v486_v55  ;;  %v821_v1 = vmul.f32 %v805_v52, %v549_v40 }
 0x159   : > { %v836_v0 = vmul.f32 1.442695, %v819_v49  ;;  %v806_v3 = vsub.f32 0.0, %v550_v53  ;;  %v567_v4 = vmul.f32 0.3275911, %v551_v62  ;;  %v807_v5 = vsub.f32 0.0, %v551_v62 }
 0x15a   : > { %1487 = vrcp.f32 %v1969_v51  ;;  %v1984_v2 = vadd.f32 1.0, %v566_v58  ;;  %v552_v6 = vand.u32 2147483647, %v1981_v63  ;;  %v493_v7 = vpop.f32.mrf.mxu0  ;;  %v1988_v8 = vmul.f32 0.70710677, %v488_v59 }
 0x15b   : > { %v492_v9 = vadd.f32 %v491_v56, %v1932_v14  ;;  %v838_v11 = vmul.f32 1.442695, %v820_v61  ;;  %v1993_v12 = vadd.f32 1.0, %v567_v4  ;;  %v840_v22 = vmul.f32 1.442695, %v821_v1 }
 0x15c   : > { %1489 = vrcp.f32 %v1984_v2  ;;  %v568_v13 = vmul.f32 0.3275911, %v552_v6  ;;  %v808_v18 = vsub.f32 0.0, %v552_v6  ;;  %v553_v21 = vand.u32 2147483647, %v1988_v8  ;;  %v497_v30 = vpop.f32.mrf.mxu0 }
 0x15d   : > { %1491 = vpow2.f32 %v834_v60  ;;  %v822_v25 = vmul.f32 %v806_v3, %v550_v53  ;;  %v823_v26 = vmul.f32 %v807_v5, %v551_v62  ;;  %v2001_v33 = vmul.f32 0.70710677, %v492_v9 }
 0x15e   : > { %1493 = vpow2.f32 %v836_v0  ;;  %v1998_v27 = vadd.f32 1.0, %v568_v13  ;;  %v569_v20 = vmul.f32 0.3275911, %v553_v21  ;;  %v809_v32 = vsub.f32 0.0, %v553_v21  ;;  %v499_v48 = vpop.f32.mrf.mxu0 }
 0x15f   : > { %1495 = vrcp.f32 %v1993_v12  ;;  %v2007_v36 = vmul.f32 0.5, %v480_v42  ;;  %v824_v39 = vmul.f32 %v808_v18, %v552_v6  ;;  %v494_v41 = vadd.f32 %v493_v7, %v1934_v15 }
 0x160   : > { %v1482_v16 = vpop.eup %1481  ;;  %1497 = vpow2.f32 %v838_v11  ;;  %v2010_v40 = vadd.f32 1.0, %v569_v20  ;;  %v842_v44 = vmul.f32 1.442695, %v822_v25  ;;  %v2014_v45 = vmul.f32 0.5, %v1962_v43  ;;  %v503_v4 = vpop.f32.mrf.mxu0 }
 0x161   : > { %v610_v35 = vmul.f32 %v1482_v16, %v1950_v31  ;;  %1499 = vrcp.f32 %v1998_v27  ;;  %v554_v31 = vand.u32 2147483647, %v2001_v33  ;;  %v844_v29 = vmul.f32 1.442695, %v823_v26 }
 0x162   : > { %v1484_v37 = vpop.eup %1483  ;;  %1501 = vpow2.f32 %v840_v22  ;;  %v2017_v49 = vmul.f32 0.5, %v486_v55  ;;  %v825_v42 = vmul.f32 %v809_v32, %v553_v21  ;;  %v2021_v56 = vmul.f32 0.5, %v488_v59  ;;  %v505_v20 = vpop.f32.mrf.mxu0 }
 0x163   : > { %1503 = vrcp.f32 %v2010_v40  ;;  %v626_v52 = vsub.f32 2.0, %v610_v35  ;;  %v611_v53 = vmul.f32 %v1484_v37, %v1957_v38  ;;  %v570_v58 = vmul.f32 0.3275911, %v554_v31 }
 0x164   : > { %2445 = vst [vmem:[#allocation14_spill] sm:$0xff] %v2017_v49  ;;  %v1486_v50 = vpop.eup %1485  ;;  %v846_v60 = vmul.f32 1.442695, %v824_v39  ;;  %v2023_v61 = vmul.f32 0.5, %v492_v9  ;;  %v2025_v43 = vmul.f32 0.70710677, %v494_v41  ;;  %v2028_v62 = vadd.f32 %v497_v30, %v1932_v14 }
 0x165   : > { %1505 = vpow2.f32 %v842_v44  ;;  %v2030_v0 = vadd.f32 1.0, %v570_v58  ;;  %v810_v1 = vsub.f32 0.0, %v554_v31  ;;  %v500_v3 = vadd.f32 %v499_v48, %v1934_v15 }
 0x166   : > { %2446 = vst [vmem:[#allocation15_spill] sm:$0xff] %v2023_v61  ;;  %2447 = vst [vmem:[#allocation16_spill] sm:$0xff] %v2025_v43  ;;  %v612_v38 = vmul.f32 %v1486_v50, %v1964_v46  ;;  %1507 = vpow2.f32 %v844_v29  ;;  %v848_v59 = vmul.f32 1.442695, %v825_v42  ;;  %v555_v5 = vand.u32 2147483647, %v2025_v43 }
 0x167   : > { %2448 = vst [vmem:[#allocation17_spill] sm:$0xff] %v2028_v62  ;;  %v1488_v55 = vpop.eup %1487  ;;  %v2035_v7 = vmul.f32 %v1482_v16, %v626_v52  ;;  %v627_v9 = vsub.f32 2.0, %v611_v53  ;;  %1509 = vrcp.f32 %v2030_v0  ;;  %v2039_v11 = vmul.f32 0.70710677, %v2028_v62 }
 0x168   : > { %v613_v18 = vmul.f32 %v1488_v55, %v1969_v51  ;;  %1511 = vpow2.f32 %v846_v60  ;;  %v571_v21 = vmul.f32 0.3275911, %v555_v5  ;;  %v811_v46 = vsub.f32 0.0, %v555_v5 }
 0x169   : > { %v1490_v6 = vpop.eup %1489  ;;  %2449 = vst [vmem:[#allocation18_spill] sm:$0xff] %v2039_v11  ;;  %v826_v25 = vmul.f32 %v810_v1, %v554_v31  ;;  %v2046_v26 = vmul.f32 0.5, %v494_v41  ;;  %v556_v16 = vand.u32 2147483647, %v2039_v11  ;;  %v2049_v30 = vmul.f32 0.70710677, %v500_v3 }
 0x16a   : > { %v2041_v13 = vpop.eup %1491  ;;  %v628_v32 = vsub.f32 2.0, %v612_v38  ;;  %v614_v35 = vmul.f32 %v1490_v6, %v1984_v2  ;;  %1513 = vpow2.f32 %v848_v59  ;;  %v2052_v39 = vadd.f32 1.0, %v571_v21  ;;  %v509_v59 = vpop.f32.mrf.mxu0 }
 0x16b   : > { %v2044_v22 = vpop.eup %1493  ;;  %2450 = vst [vmem:[#allocation19_spill] sm:$0xff] %v2046_v26  ;;  %2451 = vst [vmem:[#allocation20_spill] sm:$0xff] %v2049_v30  ;;  %v827_v44 = vmul.f32 %v811_v46, %v555_v5  ;;  %v572_v48 = vmul.f32 0.3275911, %v556_v16  ;;  %v812_v29 = vsub.f32 0.0, %v556_v16  ;;  %v2057_v41 = vmul.f32 %v1484_v37, %v627_v9 }
 0x16c   : > { %v1496_v51 = vpop.eup %1495  ;;  %v557_v42 = vand.u32 2147483647, %v2049_v30  ;;  %v629_v52 = vsub.f32 2.0, %v613_v18  ;;  %1515 = vrcp.f32 %v2052_v39  ;;  %v2061_v53 = vadd.f32 %v503_v4, %v1932_v14 }
 0x16d   : > { %v2055_v31 = vpop.eup %1497  ;;  %v850_v58 = vmul.f32 1.442695, %v826_v25  ;;  %v2063_v60 = vadd.f32 1.0, %v572_v48  ;;  %v828_v1 = vmul.f32 %v812_v29, %v556_v16  ;;  %v2067_v21 = vmul.f32 %v1486_v50, %v628_v32  ;;  %v511_v32 = vpop.f32.mrf.mxu0 }
 0x16e   : > { %2452 = vst [vmem:[#allocation21_spill] sm:$0xff] %v2061_v53  ;;  %v1500_v2 = vpop.eup %1499  ;;  %v573_v38 = vmul.f32 0.3275911, %v557_v42  ;;  %v615_v37 = vmul.f32 %v1496_v51, %v1993_v12  ;;  %v2070_v9 = vmul.f32 0.5, %v500_v3  ;;  %v813_v18 = vsub.f32 0.0, %v557_v42 }
 0x16f   : > { %v2065_v5 = vpop.eup %1501  ;;  %v630_v62 = vsub.f32 2.0, %v614_v35  ;;  %v852_v4 = vmul.f32 1.442695, %v827_v44  ;;  %1517 = vrcp.f32 %v2063_v60  ;;  %v616_v16 = vmul.f32 %v1500_v2, %v1998_v27 }
 0x170   : > { %2453 = vst [vmem:[#allocation22_spill] sm:$0xff] %v2070_v9  ;;  %v1504_v46 = vpop.eup %1503  ;;  %v2073_v25 = vadd.f32 1.0, %v573_v38  ;;  %v854_v48 = vmul.f32 1.442695, %v828_v1  ;;  %v829_v29 = vmul.f32 %v813_v18, %v557_v42  ;;  %v2077_v61 = vmul.f32 0.70710677, %v2061_v53 }
 0x171   : > { %v2079_v50 = vmul.f32 %v1488_v55, %v629_v52  ;;  %1519 = vpow2.f32 %v850_v58  ;;  %v2082_v12 = vadd.f32 %v505_v20, %v1934_v15  ;;  %v2085_v3 = vadd.f32 %v509_v59, %v1932_v14 }
 0x172   : > { %2454 = vst [vmem:[#allocation23_spill] sm:$0xff] %v2077_v61  ;;  %v2087_v35 = vpop.eup %1505  ;;  %v631_v44 = vsub.f32 2.0, %v615_v37  ;;  %v617_v27 = vmul.f32 %v1504_v46, %v2010_v40  ;;  %1521 = vrcp.f32 %v2073_v25  ;;  %v856_v42 = vmul.f32 1.442695, %v829_v29 }
 0x173   : > { %2455 = vst [vmem:[#allocation24_spill] sm:$0xff] %v2082_v12  ;;  %2456 = vst [vmem:[#allocation25_spill] sm:$0xff] %v2085_v3  ;;  %v2091_v1 = vpop.eup %1507  ;;  %v2093_v55 = vmul.f32 %v1490_v6, %v630_v62  ;;  %1523 = vpow2.f32 %v852_v4  ;;  %v558_v20 = vand.u32 2147483647, %v2077_v61  ;;  %v2097_v52 = vmul.f32 0.70710677, %v2082_v12 }
 0x174   : > { %v1510_v14 = vpop.eup %1509  ;;  %v632_v58 = vsub.f32 2.0, %v616_v16  ;;  %1525 = vpow2.f32 %v854_v48  ;;  %v2100_v38 = vmul.f32 0.70710677, %v2085_v3  ;;  %v2103_v40 = vadd.f32 %v511_v32, %v1934_v15 }
 0x175   : > { %2457 = vst [vmem:[#allocation26_spill] sm:$0xff] %v2097_v52  ;;  %v2105_v59 = vpop.eup %1511  ;;  %v618_v62 = vmul.f32 %v1510_v14, %v2030_v0  ;;  %v574_v6 = vmul.f32 0.3275911, %v558_v20  ;;  %v814_v37 = vsub.f32 0.0, %v558_v20  ;;  %v559_v18 = vand.u32 2147483647, %v2097_v52 }
 0x176   : > { %2458 = vst [vmem:[#allocation27_spill] sm:$0xff] %v2100_v38  ;;  %2459 = vst [vmem:[#allocation28_spill] sm:$0xff] %v2103_v40  ;;  %v2109_v4 = vmul.f32 %v1496_v51, %v631_v44  ;;  %v633_v29 = vsub.f32 2.0, %v617_v27  ;;  %1527 = vpow2.f32 %v856_v42  ;;  %v560_v16 = vand.u32 2147483647, %v2100_v38 }
 0x177   : > { %v2112_v48 = vpop.eup %1513  ;;  %v634_v3 = vsub.f32 2.0, %v618_v62  ;;  %v2114_v53 = vadd.f32 1.0, %v574_v6  ;;  %v830_v15 = vmul.f32 %v814_v37, %v558_v20  ;;  %v575_v32 = vmul.f32 0.3275911, %v559_v18 }
 0x178   : > { %v815_v61 = vsub.f32 0.0, %v559_v18  ;;  %v576_v12 = vmul.f32 0.3275911, %v560_v16  ;;  %v816_v0 = vsub.f32 0.0, %v560_v16  ;;  %v2117_v9 = vmul.f32 0.70710677, %v2103_v40 }
 0x179   : > { %v1516_v52 = vpop.eup %1515  ;;  %v2119_v51 = vmul.f32 %v1500_v2, %v632_v58  ;;  %1529 = vrcp.f32 %v2114_v53  ;;  %v858_v44 = vmul.f32 1.442695, %v830_v15  ;;  %v2122_v27 = vadd.f32 1.0, %v575_v32 }
 0x17a   : > { %2460 = vst [vmem:[#allocation29_spill] sm:$0xff] %v2117_v9  ;;  %v619_v42 = vmul.f32 %v1516_v52, %v2052_v39  ;;  %v831_v62 = vmul.f32 %v815_v61, %v559_v18  ;;  %v2125_v6 = vadd.f32 1.0, %v576_v12  ;;  %v832_v20 = vmul.f32 %v816_v0, %v560_v16 }
 0x17b   : > { %v2127_v37 = vmul.f32 %v1504_v46, %v633_v29  ;;  %1531 = vpow2.f32 %v858_v44  ;;  %v561_v38 = vand.u32 2147483647, %v2117_v9  ;;  %v659_v40 = vmul.f32 1.0614054, %v2057_v41 }
 0x17c   : > { %v1518_v2 = vpop.eup %1517  ;;  %v2131_v58 = vmul.f32 %v1510_v14, %v634_v3  ;;  %v635_v26 = vsub.f32 2.0, %v619_v42  ;;  %1533 = vrcp.f32 %v2122_v27  ;;  %v860_v15 = vmul.f32 1.442695, %v831_v62 }
 0x17d   : > { %v620_v39 = vmul.f32 %v1518_v2, %v2063_v60  ;;  %1535 = vrcp.f32 %v2125_v6  ;;  %v577_v61 = vmul.f32 0.3275911, %v561_v38  ;;  %v817_v12 = vsub.f32 0.0, %v561_v38 }
 0x17e   : > { %v2136_v46 = vpop.eup %1519  ;;  %v2138_v18 = vmul.f32 %v1516_v52, %v635_v26  ;;  %v2140_v29 = vmul.f32 1.442695, %v832_v20  ;;  %v675_v16 = vadd.f32 -1.4531521, %v659_v40  ;;  %v658_v3 = vmul.f32 1.0614054, %v2035_v7 }
 0x17f   : > { %2461 = vst [vmem:[#allocation30_spill] sm:$0xff] %v2136_v46  ;;  %v1522_v14 = vpop.eup %1521  ;;  %v636_v32 = vsub.f32 2.0, %v620_v39  ;;  %1537 = vpow2.f32 %v860_v15  ;;  %v2143_v0 = vadd.f32 1.0, %v577_v61  ;;  %v833_v44 = vmul.f32 %v817_v12, %v561_v38 }
 0x180   : > { %2462 = vst [vmem:[#allocation31_spill] sm:$0xff] %v2140_v29  ;;  %v2145_v60 = vpop.eup %1523  ;;  %v621_v42 = vmul.f32 %v1522_v14, %v2073_v25  ;;  %v691_v62 = vmul.f32 %v675_v16, %v2057_v41  ;;  %v674_v9 = vadd.f32 -1.4531521, %v658_v3  ;;  %v661_v26 = vmul.f32 1.0614054, %v2079_v50 }
 0x181   : > { %2463 = vst [vmem:[#allocation32_spill] sm:$0xff] %v2145_v60  ;;  %v2150_v52 = vpop.eup %1525  ;;  %v2152_v40 = vmul.f32 %v1518_v2, %v636_v32  ;;  %1539 = vrcp.f32 %v2143_v0  ;;  %v864_v20 = vmul.f32 1.442695, %v833_v44  ;;  %v660_v15 = vmul.f32 1.0614054, %v2067_v21 }
 0x182   : > { %2464 = vst [vmem:[#allocation33_spill] sm:$0xff] %v2150_v52  ;;  %v637_v39 = vsub.f32 2.0, %v621_v42  ;;  %v707_v38 = vadd.f32 1.4214138, %v691_v62  ;;  %v690_v61 = vmul.f32 %v674_v9, %v2035_v7  ;;  %v677_v12 = vadd.f32 -1.4531521, %v661_v26 }
 0x183   : > { %v2157_v25 = vpop.eup %1527  ;;  %1541 = vpow2.f32 %v864_v20  ;;  %v676_v16 = vadd.f32 -1.4531521, %v660_v15  ;;  %v663_v3 = vmul.f32 1.0614054, %v2109_v4  ;;  %v662_v29 = vmul.f32 1.0614054, %v2093_v55 }
 0x184   : > { %2465 = vst [vmem:[#allocation34_spill] sm:$0xff] %v2157_v25  ;;  %v2161_v2 = vmul.f32 %v1522_v14, %v637_v39  ;;  %v723_v32 = vmul.f32 %v707_v38, %v2057_v41  ;;  %v706_v44 = vadd.f32 1.4214138, %v690_v61  ;;  %v693_v52 = vmul.f32 %v677_v12, %v2079_v50 }
 0x185   : > { %v692_v42 = vmul.f32 %v676_v16, %v2067_v21  ;;  %v679_v62 = vadd.f32 -1.4531521, %v663_v3  ;;  %v678_v9 = vadd.f32 -1.4531521, %v662_v29  ;;  %v665_v26 = vmul.f32 1.0614054, %v2127_v37 }
 0x186   : > { %v1530_v25 = vpop.eup %1529  ;;  %v739_v20 = vadd.f32 -0.28449672, %v723_v32  ;;  %v722_v15 = vmul.f32 %v706_v44, %v2035_v7  ;;  %v709_v49 = vadd.f32 1.4214138, %v693_v52  ;;  %v2169_v46 = vmul.f32 1.0614054, %v2119_v51 }
 0x187   : > { %v622_v14 = vmul.f32 %v1530_v25, %v2114_v53  ;;  %v708_v39 = vadd.f32 1.4214138, %v692_v42  ;;  %v695_v38 = vmul.f32 %v679_v62, %v2109_v4  ;;  %v694_v61 = vmul.f32 %v678_v9, %v2093_v55 }
 0x188   : > { %v2174_v12 = vpop.eup %1531  ;;  %v755_v29 = vmul.f32 %v739_v20, %v2057_v41  ;;  %v738_v16 = vadd.f32 -0.28449672, %v722_v15  ;;  %v725_v3 = vmul.f32 %v709_v49, %v2079_v50  ;;  %v681_v32 = vadd.f32 -1.4531521, %v665_v26 }
 0x189   : > { %2466 = vst [vmem:[#allocation35_spill] sm:$0xff] %v2174_v12  ;;  %v1534_v44 = vpop.eup %1533  ;;  %v638_v52 = vsub.f32 2.0, %v622_v14  ;;  %v724_v60 = vmul.f32 %v708_v39, %v2067_v21  ;;  %v711_v30 = vadd.f32 1.4214138, %v695_v38  ;;  %v710_v11 = vadd.f32 1.4214138, %v694_v61 }
 0x18a   : > { %v1536_v53 = vpop.eup %1535  ;;  %v623_v42 = vmul.f32 %v1534_v44, %v2122_v27  ;;  %v771_v62 = vadd.f32 0.2548296, %v755_v29  ;;  %v754_v9 = vmul.f32 %v738_v16, %v2035_v7  ;;  %v741_v43 = vadd.f32 -0.28449672, %v725_v3 }
 0x18b   : > { %v2181_v12 = vmul.f32 %v1530_v25, %v638_v52  ;;  %v624_v20 = vmul.f32 %v1536_v53, %v2125_v6  ;;  %v740_v49 = vadd.f32 -0.28449672, %v724_v60  ;;  %v727_v26 = vmul.f32 %v711_v30, %v2109_v4 }
 0x18c   : > { %v2186_v15 = vpop.eup %1537  ;;  %v639_v14 = vsub.f32 2.0, %v623_v42  ;;  %v787_v39 = vmul.f32 %v771_v62, %v2057_v41  ;;  %v770_v38 = vadd.f32 0.2548296, %v754_v9  ;;  %v757_v27 = vmul.f32 %v741_v43, %v2079_v50 }
 0x18d   : > { %v640_v61 = vsub.f32 2.0, %v624_v20  ;;  %v756_v25 = vmul.f32 %v740_v49, %v2067_v21  ;;  %v743_v29 = vadd.f32 -0.28449672, %v727_v26  ;;  %v726_v6 = vmul.f32 %v710_v11, %v2093_v55 }
 0x18e   : > { %v1540_v16 = vpop.eup %1539  ;;  %v2193_v60 = vmul.f32 %v1534_v44, %v639_v14  ;;  %v867_v30 = vmul.f32 %v2044_v22, %v787_v39  ;;  %v786_v3 = vmul.f32 %v770_v38, %v2035_v7  ;;  %v773_v52 = vadd.f32 0.2548296, %v757_v27 }
 0x18f   : > { %vm901_vm2 = vcmp.ge.f32.partialorder %v1954_v34, 0.0  ;;  %v2198_v41 = vmul.f32 %v1536_v53, %v640_v61  ;;  %v625_v43 = vmul.f32 %v1540_v16, %v2143_v0  ;;  %v772_v42 = vadd.f32 0.2548296, %v756_v25 }
 0x190   : > { %v759_v62 = vmul.f32 %v743_v29, %v2109_v4  ;;  %v2202_v9 = vpop.eup %1541  ;;  %vm900_vm3 = vcmp.ge.f32.partialorder %v1945_v28, 0.0  ;;  %v883_v11 = vsub.f32 1.0, %v867_v30  ;;  %v866_v44 = vmul.f32 %v2041_v13, %v786_v3 }
 0x191   : > { %v789_v22 = vmul.f32 %v773_v52, %v2079_v50  ;;  %v742_v7 = vadd.f32 -0.28449672, %v726_v6  ;;  %v641_v20 = vsub.f32 2.0, %v625_v43  ;;  %v788_v49 = vmul.f32 %v772_v42, %v2067_v21 }
 0x192   : > { %v775_v53 = vadd.f32 0.2548296, %v759_v62  ;;  %v697_v26 = vmul.f32 %v681_v32, %v2127_v37  ;;  %vm903_vm4 = vcmp.ge.f32.partialorder %v1973_v54, 0.0  ;;  %v915_v0 = vsub.f32 0.0, %v883_v11 }
 0x193   : > { %v882_v14 = vsub.f32 1.0, %v866_v44  ;;  %v869_v39 = vmul.f32 %v2065_v5, %v789_v22  ;;  %v758_v38 = vmul.f32 %v742_v7, %v2093_v55  ;;  %v2212_v27 = vmul.f32 %v1540_v16, %v641_v20 }
 0x194   : > { %v868_v13 = vmul.f32 %v2055_v31, %v788_v49  ;;  %v791_v50 = vmul.f32 %v775_v53, %v2109_v4  ;;  %v713_v61 = vadd.f32 1.4214138, %v697_v26  ;;  %v931_v21 = vsel %vm899_vm0, %v883_v11, %v915_v0 }
 0x195   : > { %v914_v25 = vsub.f32 0.0, %v882_v14  ;;  %v885_v32 = vsub.f32 1.0, %v869_v39  ;;  %v774_v29 = vadd.f32 0.2548296, %v758_v38  ;;  %vm902_vm5 = vcmp.ge.f32.partialorder %v1966_v47, 0.0 }
 0x196   : > { %v947_v6 = vadd.f32 1.0, %v931_v21  ;;  %v884_v30 = vsub.f32 1.0, %v868_v13  ;;  %v871_v5 = vmul.f32 %v2091_v1, %v791_v50  ;;  %v729_v16 = vmul.f32 %v713_v61, %v2127_v37 }
 0x197   : > { %v930_v31 = vsel %vm898_vm1, %v882_v14, %v914_v25  ;;  %v917_v3 = vsub.f32 0.0, %v885_v32  ;;  %v790_v4 = vmul.f32 %v774_v29, %v2093_v55  ;;  %v680_v23 = vadd.f32 -1.4531521, %v2169_v46 }
 0x198   : > { %v963_v52 = vmul.f32 %v947_v6, %v1991_v10  ;;  %v946_v43 = vadd.f32 1.0, %v930_v31  ;;  %v916_v42 = vsub.f32 0.0, %v884_v30  ;;  %v887_v62 = vsub.f32 1.0, %v871_v5 }
 0x199   : > { %v933_v11 = vsel %vm901_vm2, %v885_v32, %v917_v3  ;;  %v870_v1 = vmul.f32 %v2087_v35, %v790_v4  ;;  %v745_v44 = vadd.f32 -0.28449672, %v729_v16  ;;  %v696_v22 = vmul.f32 %v680_v23, %v2119_v51 }
 0x19a   : > { %1082 = vmatprep.mubr.f32.mxu1 %v963_v52  ;;  %v962_v19 = vmul.f32 %v946_v43, %v1976_v57  ;;  %v949_v7 = vadd.f32 1.0, %v933_v11  ;;  %v932_v55 = vsel %vm900_vm3, %v884_v30, %v916_v42  ;;  %v919_v46 = vsub.f32 0.0, %v887_v62 }
 0x19b   : > { %v948_v10 = vadd.f32 1.0, %v932_v55  ;;  %v886_v20 = vsub.f32 1.0, %v870_v1  ;;  %v761_v49 = vmul.f32 %v745_v44, %v2127_v37  ;;  %v712_v53 = vadd.f32 1.4214138, %v696_v22 }
 0x19c   : > { %1083 = vmatmul.mubr.f32.vlgmr.msra.gmra.mxu1 %v962_v19  ;;  %v965_v34 = vmul.f32 %v949_v7, %v2005_v24  ;;  %v935_v35 = vsel %vm903_vm4, %v887_v62, %v919_v46  ;;  %v667_v26 = vmul.f32 1.0614054, %v2138_v18  ;;  %v666_v57 = vmul.f32 1.0614054, %v2131_v58 }
 0x19d   : > { %v964_v0 = vmul.f32 %v948_v10, %v1995_v17  ;;  %v951_v28 = vadd.f32 1.0, %v935_v35  ;;  %v918_v14 = vsub.f32 0.0, %v886_v20  ;;  %v777_v39 = vadd.f32 0.2548296, %v761_v49 }
 0x19e   : > { %vm905_vm6 = vcmp.ge.f32.partialorder %v1988_v8, 0.0  ;;  %1087 = vmatprep.mubr.f32.mxu1 %v965_v34  ;;  %v728_v38 = vmul.f32 %v712_v53, %v2119_v51  ;;  %v683_v13 = vadd.f32 -1.4531521, %v667_v26  ;;  %v682_v50 = vadd.f32 -1.4531521, %v666_v57 }
 0x19f   : > { %v669_v24 = vmul.f32 1.0614054, %v2161_v2  ;;  %v967_v54 = vmul.f32 %v951_v28, %v2014_v45  ;;  %v934_v61 = vsel %vm902_vm5, %v886_v20, %v918_v14  ;;  %v793_v21 = vmul.f32 %v777_v39, %v2127_v37 }
 0x1a0   : > { %v668_v17 = vmul.f32 1.0614054, %v2152_v40  ;;  %1088 = vmatmul.mubr.f32.gmra.mxu1 %v964_v0  ;;  %v950_v25 = vadd.f32 1.0, %v934_v61  ;;  %v744_v32 = vadd.f32 -0.28449672, %v728_v38  ;;  %v699_v29 = vmul.f32 %v683_v13, %v2138_v18 }
 0x1a1   : > { %v698_v6 = vmul.f32 %v682_v50, %v2131_v58  ;;  %1092 = vmatprep.mubr.f32.mxu1 %v967_v54  ;;  %v873_v30 = vmul.f32 %v2112_v48, %v793_v21  ;;  %v685_v5 = vadd.f32 -1.4531521, %v669_v24  ;;  %v671_v45 = vmul.f32 1.0614054, %v2193_v60  ;;  %v2467_v50 = vld [vmem:[#allocation16_spill] sm:$0xff] }
 0x1a2   : > { %v684_v16 = vadd.f32 -1.4531521, %v668_v17  ;;  %v966_v47 = vmul.f32 %v950_v25, %v2007_v36  ;;  %v760_v37 = vmul.f32 %v744_v32, %v2119_v51  ;;  %v715_v31 = vadd.f32 1.4214138, %v699_v29 }
 0x1a3   : > { %v714_v3 = vadd.f32 1.4214138, %v698_v6  ;;  %v889_v4 = vsub.f32 1.0, %v873_v30  ;;  %v701_v23 = vmul.f32 %v685_v5, %v2161_v2  ;;  %v687_v43 = vadd.f32 -1.4531521, %v671_v45  ;;  %v2468_v5 = vld [vmem:[#allocation18_spill] sm:$0xff] }
 0x1a4   : > { %v700_v52 = vmul.f32 %v684_v16, %v2152_v40  ;;  %1093 = vmatmul.mubr.f32.gmra.mxu1 %v966_v47  ;;  %v776_v42 = vadd.f32 0.2548296, %v760_v37  ;;  %v731_v48 = vmul.f32 %v715_v31, %v2138_v18  ;;  %v670_v11 = vmul.f32 1.0614054, %v2181_v12  ;;  %v2469_v16 = vld [vmem:[#allocation20_spill] sm:$0xff] }
 0x1a5   : > { %v730_v62 = vmul.f32 %v714_v3, %v2131_v58  ;;  %vm904_vm7 = vcmp.ge.f32.partialorder %v1981_v63, 0.0  ;;  %v921_v36 = vsub.f32 0.0, %v889_v4  ;;  %v717_v1 = vadd.f32 1.4214138, %v701_v23  ;;  %v2470_v47 = vld [vmem:[#allocation32_spill] sm:$0xff]  ;;  %v2473_v63 = vld [vmem:[#allocation34_spill] sm:$0xff] }
 0x1a6   : > { %v716_v44 = vadd.f32 1.4214138, %v700_v52  ;;  %v703_v22 = vmul.f32 %v687_v43, %v2193_v60  ;;  %v792_v19 = vmul.f32 %v776_v42, %v2119_v51  ;;  %v747_v7 = vadd.f32 -0.28449672, %v731_v48 }
 0x1a7   : > { %v746_v55 = vadd.f32 -0.28449672, %v730_v62  ;;  %v686_v46 = vadd.f32 -1.4531521, %v670_v11  ;;  %v937_v10 = vsel %vm905_vm6, %v889_v4, %v921_v36  ;;  %v733_v20 = vmul.f32 %v717_v1, %v2161_v2  ;;  %v2472_v11 = vld [vmem:[#allocation14_spill] sm:$0xff] }
 0x1a8   : > { %v732_v49 = vmul.f32 %v716_v44, %v2152_v40  ;;  %v719_v53 = vadd.f32 1.4214138, %v703_v22  ;;  %v953_v34 = vadd.f32 1.0, %v937_v10  ;;  %v872_v35 = vmul.f32 %v2105_v59, %v792_v19  ;;  %v2474_v44 = vld [vmem:[#allocation33_spill] sm:$0xff] }
 0x1a9   : > { %v763_v26 = vmul.f32 %v747_v7, %v2138_v18  ;;  %v762_v57 = vmul.f32 %v746_v55, %v2131_v58  ;;  %v749_v0 = vadd.f32 -0.28449672, %v733_v20  ;;  %v702_v14 = vmul.f32 %v686_v46, %v2181_v12 }
 0x1aa   : > { %v748_v51 = vadd.f32 -0.28449672, %v732_v49  ;;  %v735_v28 = vmul.f32 %v719_v53, %v2193_v60  ;;  %v969_v8 = vmul.f32 %v953_v34, %v2021_v56  ;;  %v888_v39 = vsub.f32 1.0, %v872_v35 }
 0x1ab   : > { %v779_v38 = vadd.f32 0.2548296, %v763_v26  ;;  %v778_v13 = vadd.f32 0.2548296, %v762_v57  ;;  %vm906_vm8 = vcmp.ge.f32.partialorder %v2001_v33, 0.0  ;;  %vm907_vm9 = vcmp.ge.f32.partialorder %v2467_v50, 0.0 }
 0x1ac   : > { %v765_v59 = vmul.f32 %v749_v0, %v2161_v2  ;;  %v764_v24 = vmul.f32 %v748_v51, %v2152_v40  ;;  %v751_v54 = vadd.f32 -0.28449672, %v735_v28  ;;  %v718_v61 = vadd.f32 1.4214138, %v702_v14  ;;  %1097 = vmatprep.mubr.f32.mxu1 %v969_v8 }
 0x1ad   : > { %v920_v21 = vsub.f32 0.0, %v888_v39  ;;  %v795_v17 = vmul.f32 %v779_v38, %v2138_v18  ;;  %v794_v25 = vmul.f32 %v778_v13, %v2131_v58  ;;  %v673_v56 = vmul.f32 1.0614054, %v2212_v27  ;;  %v2471_v18 = vld [vmem:[#allocation30_spill] sm:$0xff]  ;;  %v2476_v13 = vld [vmem:[#allocation15_spill] sm:$0xff] }
 0x1ae   : > { %v781_v32 = vadd.f32 0.2548296, %v765_v59  ;;  %v780_v29 = vadd.f32 0.2548296, %v764_v24  ;;  %v767_v6 = vmul.f32 %v751_v54, %v2193_v60  ;;  %v734_v30 = vmul.f32 %v718_v61, %v2181_v12 }
 0x1af   : > { %vm908_vm10 = vcmp.ge.f32.partialorder %v2468_v5, 0.0  ;;  %vm909_vm11 = vcmp.ge.f32.partialorder %v2469_v16, 0.0  ;;  %v936_v45 = vsel %vm904_vm7, %v888_v39, %v920_v21  ;;  %v875_v37 = vmul.f32 %v2470_v47, %v795_v17  ;;  %v2475_v39 = vld [vmem:[#allocation19_spill] sm:$0xff]  ;;  %v2482_v47 = vld [vmem:[#allocation24_spill] sm:$0xff] }
 0x1b0   : > { %v874_v31 = vmul.f32 %v2471_v18, %v794_v25  ;;  %v689_v58 = vadd.f32 -1.4531521, %v673_v56  ;;  %v952_v3 = vadd.f32 1.0, %v936_v45  ;;  %v797_v4 = vmul.f32 %v781_v32, %v2161_v2  ;;  %v2477_v21 = vld [vmem:[#allocation35_spill] sm:$0xff]  ;;  %v2478_v25 = vld [vmem:[#allocation26_spill] sm:$0xff] }
 0x1b1   : > { %v796_v23 = vmul.f32 %v780_v29, %v2152_v40  ;;  %v783_v52 = vadd.f32 0.2548296, %v767_v6  ;;  %v891_v43 = vsub.f32 1.0, %v875_v37  ;;  %v750_v48 = vadd.f32 -0.28449672, %v734_v30  ;;  %v2480_v29 = vld [vmem:[#allocation17_spill] sm:$0xff] }
 0x1b2   : > { %v890_v42 = vsub.f32 1.0, %v874_v31  ;;  %v705_v62 = vmul.f32 %v689_v58, %v2212_v27  ;;  %v968_v36 = vmul.f32 %v952_v3, %v2472_v11  ;;  %v877_v1 = vmul.f32 %v2473_v63, %v797_v4  ;;  %v2481_v30 = vld [vmem:[#allocation22_spill] sm:$0xff] }
 0x1b3   : > { %v876_v22 = vmul.f32 %v2474_v44, %v796_v23  ;;  %v799_v19 = vmul.f32 %v783_v52, %v2193_v60  ;;  %v923_v7 = vsub.f32 0.0, %v891_v43  ;;  %v766_v2 = vmul.f32 %v750_v48, %v2181_v12  ;;  %v2483_v23 = vld [vmem:[#allocation23_spill] sm:$0xff] }
 0x1b4   : > { %v922_v55 = vsub.f32 0.0, %v890_v42  ;;  %v721_v46 = vadd.f32 1.4214138, %v705_v62  ;;  %1098 = vmatmul.mubr.f32.gmra.mxu1 %v968_v36  ;;  %v893_v40 = vsub.f32 1.0, %v877_v1  ;;  %v672_v49 = vmul.f32 1.0614054, %v2198_v41 }
 0x1b5   : > { %v892_v10 = vsub.f32 1.0, %v876_v22  ;;  %v879_v20 = vmul.f32 %v2186_v15, %v799_v19  ;;  %v939_v53 = vsel %vm907_vm9, %v891_v43, %v923_v7  ;;  %v782_v35 = vadd.f32 0.2548296, %v766_v2  ;;  %v2484_v62 = vld [vmem:[#allocation21_spill] sm:$0xff] }
 0x1b6   : > { %v938_v34 = vsel %vm906_vm8, %v890_v42, %v922_v55  ;;  %v737_v60 = vmul.f32 %v721_v46, %v2212_v27  ;;  %v955_v26 = vadd.f32 1.0, %v939_v53  ;;  %v925_v0 = vsub.f32 0.0, %v893_v40  ;;  %v2485_v2 = vld [vmem:[#allocation29_spill] sm:$0xff] }
 0x1b7   : > { %v954_v57 = vadd.f32 1.0, %v938_v34  ;;  %v924_v51 = vsub.f32 0.0, %v892_v10  ;;  %v895_v28 = vsub.f32 1.0, %v879_v20  ;;  %v798_v14 = vmul.f32 %v782_v35, %v2181_v12  ;;  %v2479_v12 = vld [vmem:[#allocation31_spill] sm:$0xff] }
 0x1b8   : > { %v753_v8 = vadd.f32 -0.28449672, %v737_v60  ;;  %v688_v15 = vadd.f32 -1.4531521, %v672_v49  ;;  %v971_v38 = vmul.f32 %v955_v26, %v2475_v39  ;;  %v941_v33 = vsel %vm909_vm11, %v893_v40, %v925_v0  ;;  %v2487_v60 = vld [vmem:[#allocation27_spill] sm:$0xff] }
 0x1b9   : > { %v970_v50 = vmul.f32 %v954_v57, %v2476_v13  ;;  %v940_v59 = vsel %vm908_vm10, %v892_v10, %v924_v51  ;;  %v957_v24 = vadd.f32 1.0, %v941_v33  ;;  %v927_v61 = vsub.f32 0.0, %v895_v28  ;;  %v2486_v10 = vld [vmem:[#allocation28_spill] sm:$0xff]  ;;  %v2488_v57 = vld [vmem:[#allocation25_spill] sm:$0xff] }
 0x1ba   : > { %v956_v54 = vadd.f32 1.0, %v940_v59  ;;  %v878_v17 = vmul.f32 %v2477_v21, %v798_v14  ;;  %vm911_vm12 = vcmp.ge.f32.partialorder %v2478_v25, 0.0  ;;  %1543 = vpow2.f32 %v2479_v12  ;;  %1102 = vmatprep.mubr.f32.mxu1 %v971_v38 }
 0x1bb   : > { %v769_v56 = vmul.f32 %v753_v8, %v2212_v27  ;;  %v704_v32 = vmul.f32 %v688_v15, %v2198_v41  ;;  %v524_v6 = vmul.f32 0.5, %v2480_v29  ;;  %1103 = vmatmul.mubr.f32.gmra.mxu1 %v970_v50  ;;  %v973_v5 = vmul.f32 %v957_v24, %v2481_v30  ;;  %v1328_v8 = vld [vmem:[%s2414_s4] ss:$0 sm:$0xff] }
 0x1bc   : > { %v943_v16 = vsel %vm911_vm12, %v895_v28, %v927_v61  ;;  %v894_v45 = vsub.f32 1.0, %v878_v17  ;;  %v527_v37 = vmul.f32 0.5, %v2482_v47  ;;  %vm910_vm13 = vcmp.ge.f32.partialorder %v2483_v23, 0.0 }
 0x1bd   : > { %v959_v18 = vadd.f32 1.0, %v943_v16  ;;  %v785_v31 = vadd.f32 0.2548296, %v769_v56  ;;  %v720_v58 = vadd.f32 1.4214138, %v704_v32  ;;  %1107 = vmatprep.mubr.f32.mxu1 %v973_v5  ;;  %v972_v3 = vmul.f32 %v956_v54, %v524_v6 }
 0x1be   : > { %v926_v4 = vsub.f32 0.0, %v894_v45  ;;  %v526_v11 = vmul.f32 0.5, %v2484_v62  ;;  %vm913_vm14 = vcmp.ge.f32.partialorder %v2485_v2, 0.0  ;;  %v529_v20 = vmul.f32 0.5, %v2486_v10 }
 0x1bf   : > { %v975_v52 = vmul.f32 %v959_v18, %v527_v37  ;;  %v801_v43 = vmul.f32 %v785_v31, %v2212_v27  ;;  %v736_v42 = vmul.f32 %v720_v58, %v2198_v41  ;;  %1108 = vmatmul.mubr.f32.gmra.mxu1 %v972_v3  ;;  %vm912_vm15 = vcmp.ge.f32.partialorder %v2487_v60, 0.0 }
 0x1c0   : > { %v942_v48 = vsel %vm910_vm13, %v894_v45, %v926_v4  ;;  %v528_v0 = vmul.f32 0.5, %v2488_v57 }
 0x1c1   : > { %1112 = vmatprep.mubr.f32.mxu1 %v975_v52  ;;  %v958_v36 = vadd.f32 1.0, %v942_v48  ;;  %v881_v63 = vmul.f32 %v2202_v9, %v801_v43  ;;  %v752_v1 = vadd.f32 -0.28449672, %v736_v42 }
 0x1c3   : > { %v974_v44 = vmul.f32 %v958_v36, %v526_v11  ;;  %v897_v22 = vsub.f32 1.0, %v881_v63  ;;  %v768_v19 = vmul.f32 %v752_v1, %v2198_v41 }
 0x1c5   : > { %1113 = vmatmul.mubr.f32.gmra.mxu1 %v974_v44  ;;  %v929_v7 = vsub.f32 0.0, %v897_v22  ;;  %v784_v55 = vadd.f32 0.2548296, %v768_v19 }
 0x1c7   : > { %v945_v27 = vsel %vm913_vm14, %v897_v22, %v929_v7  ;;  %v800_v46 = vmul.f32 %v784_v55, %v2198_v41  ;;  %v1544_v40 = vpop.eup %1543 }
 0x1c8   : > { %v961_v49 = vadd.f32 1.0, %v945_v27 }
 0x1c9   : > { %v880_v53 = vmul.f32 %v1544_v40, %v800_v46 }
 0x1ca   : > { %v977_v34 = vmul.f32 %v961_v49, %v529_v20 }
 0x1cb   : > { %v896_v9 = vsub.f32 1.0, %v880_v53 }
 0x1cc   : > { %1117 = vmatprep.mubr.f32.mxu1 %v977_v34 }
 0x1cd   : > { %v928_v35 = vsub.f32 0.0, %v896_v9 }
 0x1cf   : > { %v944_v26 = vsel %vm912_vm15, %v896_v9, %v928_v35 }
 0x1d0   : > { %v960_v51 = vadd.f32 1.0, %v944_v26 }
 0x1d2   : > { %v976_v28 = vmul.f32 %v960_v51, %v528_v0 }
 0x1d4   : > { %1118 = vmatmul.mubr.f32.gmra.mxu1 %v976_v28 }
 0x25c   : > { %v1372_v14 = vpop.f32.mrf.mxu1 }
 0x25e   : > { %v1373_v41 = vpop.f32.mrf.mxu1 }
 0x25f   : > { %v1374_v15 = vadd.f32 %v1373_v41, %v1372_v14 }
 0x260   : > { %v1375_v39 = vpop.f32.mrf.mxu1 }
 0x261   : > { %v1157_v38 = vadd.f32 %v1374_v15, %v1328_v8 }
 0x262   : > { %v1376_v13 = vpop.f32.mrf.mxu1 }
 0x263   : > { %1165 = vst [vmem:[%s2333_s14] sm:$0xff] %v1157_v38  ;;  %v1377_v50 = vadd.f32 %v1376_v13, %v1375_v39 }
 0x264   : > { %v1378_v33 = vpop.f32.mrf.mxu1 }
 0x265   : > { %v1158_v59 = vadd.f32 %v1377_v50, %v1328_v8 }
 0x266   : > { %v1379_v24 = vpop.f32.mrf.mxu1 }
 0x267   : > { %1166 = vst [vmem:[%s2333_s14 + $0x8] sm:$0xff] %v1158_v59  ;;  %v1380_v54 = vadd.f32 %v1379_v24, %v1378_v33 }
 0x269   : > { %v1159_v61 = vadd.f32 %v1380_v54, %v1328_v8 }
 0x26b   : > { %1167 = vst [vmem:[%s2333_s14 + $0x10] sm:$0xff] %v1159_v61 }
 0x274   : > { %v1381_v21 = vpop.f32.mrf.mxu1 }
 0x276   : > { %v1382_v17 = vpop.f32.mrf.mxu1 }
 0x277   : > { %v1383_v25 = vadd.f32 %v1382_v17, %v1381_v21 }
 0x279   : > { %v1160_v12 = vadd.f32 %v1383_v25, %v1328_v8 }
 0x27b   : > { %1168 = vst [vmem:[%s2333_s14 + $0x18] sm:$0xff] %v1160_v12  ;;  %v1384_v56 = vpop.f32.mrf.mxu1 }
 0x27d   : > { %v1385_v32 = vpop.f32.mrf.mxu1 }
 0x27e   : > { %v1386_v29 = vadd.f32 %v1385_v32, %v1384_v56 }
 0x27f   : > { %v1387_v6 = vpop.f32.mrf.mxu1 }
 0x280   : > { %v1161_v30 = vadd.f32 %v1386_v29, %v1328_v8 }
 0x281   : > { %v1388_v5 = vpop.f32.mrf.mxu1 }
 0x282   : > { %1169 = vst [vmem:[%s2333_s14 + $0x20] sm:$0xff] %v1161_v30  ;;  %v1389_v16 = vadd.f32 %v1388_v5, %v1387_v6 }
 0x284   : > { %v1162_v45 = vadd.f32 %v1389_v16, %v1328_v8 }
 0x285   : > { %v1390_v47 = vpop.f32.mrf.mxu1 }
 0x286   : > { %1170 = vst [vmem:[%s2333_s14 + $0x28] sm:$0xff] %v1162_v45 }
 0x287   : > { %v1391_v37 = vpop.f32.mrf.mxu1 }
 0x288   : > { %v1392_v18 = vadd.f32 %v1391_v37, %v1390_v47 }
 0x28a   : > { %v1163_v31 = vadd.f32 %v1392_v18, %v1328_v8 }
 0x28c   : > { %1171 = vst [vmem:[%s2333_s14 + $0x30] sm:$0xff] %v1163_v31 }
 0x294   : > { %v1393_v58 = vpop.f32.mrf.mxu1 }
 0x296   : > { %v1394_v3 = vpop.f32.mrf.mxu1 }
 0x297   : > { %v1395_v4 = vadd.f32 %v1394_v3, %v1393_v58  ;;  %1180 = sbr.rel (!%p2489_p0) target bundleno = 695 (0x2b7), region = 64 }
 0x299   : > { %v1164_v23 = vadd.f32 %v1395_v4, %v1328_v8 }
 0x29b   : > { %1172 = vst [vmem:[%s2333_s14 + $0x38] sm:$0xff] %v1164_v23 }
 0x29c   : > { %s2502_s27 = smov (!%p1183_p3, %s1182_s27), 8 }
 0x29d   : > { %s2347_s28 = sshll.u32 %s2502_s27, 7 }
 0x29e   : > { %s1187_s30 = ssub.s32 1024, %s2347_s28 }
 0x29f   : > { %1188 = vsyncadd %s1174_s13, %s1187_s30  ;;  %p1332_p10 = scmp.ne.s32.totalorder %s2347_s28, 0  ;;  %s1339_s7 = sshll.u32 %s1699_s21, 10 }
 0x2a0   : > { %s2357_s24 = scalar_lea.hbm %s2415_s5, %s1339_s7  ;;  %s1193_s25 = sshll.u32 %s2333_s14, 4  ;;  %s2360_s25 = int_to_ptr.vmem [resolvable:$true] %s1193_s25 }
 0x2a1   : > { %s1623_s26 = scalar_lea.vmem %s2360_s25, %s2347_s28  ;;  %s1719_s29 = smov [#allocation9]  }
 0x2a2   : > { %p1624_p13 = scmp.ne.s32.totalorder %s2360_s25, %s1623_s26  ;;  %s1627_s6 = sshll.u32 %s1719_s29, 4  ;;  %s1628_s6 = int_to_ptr.vmem [resolvable:$false] %s1627_s6 }
 0x2a3   : > { %s1629_s21 = scalar_lea.vmem %s1628_s6, 2048  ;;  %p1630_p7 = scmp.lt.s32.totalorder %s2360_s25, %s1628_s6 }
 0x2a4   : > { %p1625_p1 = pnand %p1624_p13, %p1332_p10  ;;  %p1631_p12 = scmp.lt.s32.totalorder %s1629_s21, %s1623_s26 }
 0x2a6   : > { %p1626_p6 = pneg %p1625_p1  ;;  %p1632_p11 = por %p1631_p12, %p1630_p7 }
 0x2a8   : > { %p1633_p5 = pnand %p1632_p11, %p1626_p6 }
 0x2aa   : > { %1636 = shalt.err (!%p1633_p5)
}
 0x2ab   : > { %s1637_s10 = scalar_lea.hbm %s2357_s24, %s2347_s28  ;;  %s1641_s16 = scalar_lea.hbm %s2415_s5, 1920 }
 0x2ac   : > { %p1638_p8 = scmp.ne.s32.totalorder %s2357_s24, %s1637_s10  ;;  %p1642_p0 = scmp.lt.s32.totalorder %s2357_s24, %s2415_s5 }
 0x2ad   : > { %p1643_p3 = scmp.lt.s32.totalorder %s1641_s16, %s1637_s10 }
 0x2ae   : > { %p1639_p2 = pnand %p1638_p8, %p1332_p10 }
 0x2af   : > { %p1644_p13 = por %p1643_p3, %p1642_p0 }
 0x2b0   : > { %p1640_p4 = pneg %p1639_p2 }
 0x2b2   : > { %p1645_p1 = pnand %p1644_p13, %p1640_p4 }
 0x2b4   : > { %1648 = shalt.err (!%p1645_p1)
}
 0x2b5   : > { %s1720_s7 = smov 128   ;;  %s1721_s11 = smov 8  }
 0x2b6   : > { %1199 = dma.vmem_to_hbm [thread:$0]  (%p1332_p10), %s2360_s25, %s2347_s28, %s2357_s24, %s1174_s13, %s1720_s7, %s1720_s7, %s1721_s11  }
 0x2b7 PF: > { %s1208_s12 = sand.u32 1, %s1687_s18   ;;  %p2490_p6 = scmp.ne.s32.totalorder %s2440_s9, 0 }
 0x2b8   : > { %s1209_s26 = scalar_lea.sflag [#allocation5], %s1208_s12 }
 0x2b9   : > { %p1414_p7 = pnand %p1315_p9, %p2490_p6 }
 0x2bb   : > { %p1415_p12 = pneg %p1414_p7 }
 0x2bd   : > { %1682 = dma.done.wait (%p1415_p12), %s1209_s26, 1024  }
 0x2be   : > { %1684 = vsyncadd (%p1415_p12), %s1209_s26, 4294966272  ;;  %s22_s23 = sadd.s32 1, %s1707_s23   ;;  %s2491_s17 = sld [smem:[#allocation13_spill]] }
 0x2bf   : > { %p19_p11 = scmp.ge.s32.totalorder %s22_s23, 4   ;;  %s2492_s18 = smov %s1691_s19 }
 0x2c0   : > { %s2493_s19 = smov %s1695_s20  ;;  %s2494_s20 = smov %s1814_s8 }
 0x2c1   : > { %s2495_s21 = smov %s1703_s22  ;;  %21 = sbr.rel (!%p19_p11) target bundleno = 7 (0x7), region = 106 }
 0x2c4   : > { %s2496_s22 = smov %s2491_s17 }
 0x2c6   :  { %1214 = vsyncpa [#allocation4], 1 }
 0x2c7   :  { %1216 = vsyncpa [#allocation4 + $0x1], 1 }
 0x2c8   :  { %1217 = vsyncpa [#allocation7], 1 }
 0x2c9   :  { %1218 = vsyncpa [#allocation5], 1 }
 0x2ca   :  { %1220 = vsyncpa [#allocation5 + $0x1], 1 }

// kernel: tpu_custom_call.1
= control target key start
LH: loop header
LB: loop body
LE: loop exit
PB: predicated region body
PF: predicated region fallthrough
CT: control target
= control target key end

     0   :  { %10 = vsyncpa [#allocation4], 0  ;;  %s2410_s0 = inlined_call_operand.hbm [shape: f32[114,128], index: 0, kind: input, shape index: {}]   ;;  %s2411_s1 = inlined_call_operand.hbm [shape: f32[128,256], index: 1, kind: input, shape index: {}]   ;;  %s2412_s2 = inlined_call_operand.vmem [shape: f32[1,256], index: 2, kind: input, shape index: {}]   ;;  %s2413_s3 = inlined_call_operand.hbm [shape: f32[256,128], index: 3, kind: input, shape index: {}]   ;;  %s2414_s4 = inlined_call_operand.vmem [shape: f32[1,128], index: 4, kind: input, shape index: {}]   ;;  %s2415_s5 = inlined_call_operand.hbm [shape: f32[114,128], index: 5, kind: output, shape index: {}]  }
   0x1   :  { %12 = vsyncpa [#allocation4 + $0x1], 0 }
   0x2   :  { %13 = vsyncpa [#allocation7], 0 }
   0x3   :  { %14 = vsyncpa [#allocation5], 0 }
   0x4   :  { %16 = vsyncpa [#allocation5 + $0x1], 0  ;;  %s1752_s18 = smov 0   ;;  %s1754_s19 = smov 0  }
   0x5   :  { %s1756_s20 = smov 0   ;;  %s1758_s21 = smov 0  }
   0x6   :  { %s1760_s22 = smov 0   ;;  %s1762_s23 = smov 0  }
   0x7 LB: > { %s1309_s24 = sadd.s32 4294967295, %s1707_s23   ;;  %s1310_s25 = sadd.s32 4294967294, %s1707_s23   ;;  %s1707_s23 = sphi %s1762_s23, %s22_s23   ;;  %s1703_s22 = sphi %s1760_s22, %s2496_s22   ;;  %s1699_s21 = sphi %s1758_s21, %s2495_s21   ;;  %s1695_s20 = sphi %s1756_s20, %s2494_s20   ;;  %s1691_s19 = sphi %s1754_s19, %s2493_s19   ;;  %s1687_s18 = sphi %s1752_s18, %s2492_s18  }
   0x8   : > { %s34_s26 = sadd.s32 1, %s1703_s22  ;;  %s41_s27 = sadd.s32 1, %s1695_s20 }
   0x9   : > { %p36_p0 = scmp.ge.s32.totalorder %s34_s26, 2  ;;  %p48_p1 = scmp.ne.s32.totalorder %s1695_s20, %s1691_s19 }
   0xa   : > { %p49_p2 = scmp.eq.s32.totalorder %s1707_s23, 0  ;;  %p54_p3 = scmp.ne.s32.totalorder %s1691_s19, %s1687_s18 }
   0xb   : > { %s2498_s26 = smov (%p36_p0, %s34_s26), 0  ;;  %p1797_p5 = scmp.eq.s32.totalorder %s1309_s24, 0 }
   0xc   : > { %2435 = sst [smem:[#allocation13_spill]] %s2498_s26  ;;  %p1793_p4 = por %p49_p2, %p48_p1 }
   0xd   : > { %s2437_s29 = scalar_select %p1797_p5, 1, 0 }
   0xe   : > { %s38_s30 = ssub.s32 %s1703_s22, %s2498_s26  ;;  %p177_p6 = scmp.eq.s32.totalorder %s1309_s24, 1 }
   0xf   : > { %p39_p7 = scmp.eq.s32.totalorder %s38_s30, 0  ;;  %p1805_p8 = por %p1797_p5, %p54_p3 }
  0x10   : > { %p1809_p9 = por %p177_p6, %p48_p1  ;;  %p183_p10 = scmp.eq.s32.totalorder %s1310_s25, 1 }
  0x11   : > { %s2438_s6 = scalar_select %p1805_p8, 1, 0 }
  0x12   : > { %s2439_s7 = scalar_select %p1809_p9, 1, 0 }
  0x13   : > { %s1814_s8 = scalar_select %p39_p7, %s1695_s20, %s41_s27  }
  0x14   : > { %p1816_p11 = por %p183_p10, %p54_p3  ;;  %p1311_p12 = scmp.ge.s32.totalorder %s1707_s23, 1 }
  0x15   : > { %p190_p13 = scmp.lt.s32.totalorder %s1707_s23, 3  ;;  %s1709_s11 = smov [#allocation6]  }
  0x16   : > { %s2440_s9 = scalar_select %p1816_p11, 1, 0 }
  0x17   : > { %p1822_p0 = pnand %p1311_p12, %p190_p13  ;;  %s205_s12 = sshll.u32 %s1709_s11, 4  ;;  %s206_s12 = int_to_ptr.vmem [resolvable:$true] %s205_s12 }
  0x18   : > { %s1710_s13 = smov [#allocation8]   ;;  %s1556_s16 = scalar_lea.vmem %s206_s12, 4096 }
  0x19   : > { %p1406_p1 = pneg %p1822_p0  ;;  %s229_s14 = sshll.u32 %s1710_s13, 4  ;;  %s230_s14 = int_to_ptr.vmem [resolvable:$true] %s229_s14 }
  0x1a   : > { %p1557_p6 = scmp.ne.s32.totalorder %s206_s12, %s1556_s16  ;;  %p1564_p12 = scmp.lt.s32.totalorder %s206_s12, %s206_s12 }
  0x1b   : > { %p1830_p2 = pnand %p1406_p1, %p1797_p5  ;;  %p1565_p13 = scmp.lt.s32.totalorder %s1556_s16, %s1556_s16 }
  0x1d   : > { %p1547_p3 = pneg %p1830_p2  ;;  %p1566_p11 = por %p1565_p13, %p1564_p12 }
  0x1f   : > { %p1559_p7 = pnand %p1557_p6, %p1547_p3 }
  0x21   : > { %p1560_p10 = pneg %p1559_p7 }
  0x23   : > { %p1567_p9 = pnand %p1566_p11, %p1560_p10 }
  0x25   : > { %1570 = shalt.err (!%p1567_p9)
}
  0x26   : > { %s1711_s17 = smov 256   ;;  %s1712_s24 = smov 16  }
  0x27   : > { %1409 = dma.hbm_to_vmem [thread:$0]  (!%p1830_p2), %s2411_s1, 4096, %s206_s12, [#allocation7], %s1711_s17, %s1711_s17, %s1712_s24  }
  0x28   : > { %s1582_s30 = scalar_lea.vmem %s230_s14, 4096  ;;  %p1590_p5 = scmp.lt.s32.totalorder %s230_s14, %s230_s14 }
  0x29   : > { %p1583_p1 = scmp.ne.s32.totalorder %s230_s14, %s1582_s30  ;;  %p1591_p8 = scmp.lt.s32.totalorder %s1582_s30, %s1582_s30 }
  0x2b   : > { %p1585_p6 = pnand %p1583_p1, %p1547_p3  ;;  %p1592_p12 = por %p1591_p8, %p1590_p5 }
  0x2d   : > { %p1586_p7 = pneg %p1585_p6 }
  0x2f   : > { %p1593_p11 = pnand %p1592_p12, %p1586_p7 }
  0x31   : > { %1596 = shalt.err (!%p1593_p11)
}
  0x32   : > { %s1713_s11 = smov 128   ;;  %s1714_s13 = smov 8  }
  0x33   : > { %1412 = dma.hbm_to_vmem [thread:$0]  (!%p1830_p2), %s2413_s3, 4096, %s230_s14, [#allocation7], %s1713_s11, %s1713_s11, %s1714_s13  }
  0x34   : > { %p1315_p9 = scmp.ge.s32.totalorder %s1707_s23, 2 }
  0x36   : > { %242 = sbr.rel (%p1315_p9) target bundleno = 91 (0x5b), region = 32 }
  0x3b   : > { %245 = sbr.rel (!%p1793_p4) target bundleno = 91 (0x5b), region = 36  ;;  %s246_s12 = sand.u32 (%p1793_p4), 1, %s1695_s20  }
  0x3c   : > { %s1317_s17 = sshll.u32 (%p1793_p4), %s1703_s22, 3  ;;  %s1316_s24 = sshll.u32 (%p1793_p4), %s246_s12, 6 }
  0x3d   : > { %s252_s25 = ssub.s32 (%p1793_p4), 15, %s1317_s17  ;;  %s1862_s14 = scalar_lea.sflag (%p1793_p4), [#allocation4], %s246_s12 }
  0x3e   : > { %p253_p5 = scmp.lt.s32.totalorder (%p1793_p4), %s252_s25, 8  ;;  %s250_s27 = scalar_lea.vmem (%p1793_p4), [#allocation3], %s1316_s24 }
  0x40   : > { %s2500_s25 = smov (!%p253_p5, %s252_s25), 8 }
  0x41   : > { %s1859_s15 = sshll.u32 %s2500_s25, 7 }
  0x42   : > { %s257_s26 = ssub.s32 1024, %s1859_s15 }
  0x43   : > { %258 = vsyncadd %s1862_s14, %s257_s26  ;;  %p1319_p4 = scmp.ne.s32.totalorder %s1859_s15, 0  ;;  %s1338_s28 = sshll.u32 %s1703_s22, 10 }
  0x44   : > { %s1870_s13 = scalar_lea.hbm %s2410_s0, %s1338_s28  ;;  %s263_s16 = sshll.u32 %s250_s27, 4  ;;  %s1872_s16 = int_to_ptr.vmem [resolvable:$true] %s263_s16 }
  0x45   : > { %s1597_s12 = scalar_lea.hbm %s1870_s13, %s1859_s15  ;;  %s1601_s25 = scalar_lea.hbm %s2410_s0, 1920 }
  0x46   : > { %p1598_p8 = scmp.ne.s32.totalorder %s1870_s13, %s1597_s12  ;;  %p1603_p10 = scmp.lt.s32.totalorder %s1601_s25, %s1597_s12 }
  0x48   : > { %p1599_p2 = pnand %p1598_p8, %p1319_p4 }
  0x4a   : > { %p1600_p3 = pneg %p1599_p2 }
  0x4c   : > { %p1605_p13 = pnand %p1603_p10, %p1600_p3 }
  0x4e   : > { %1608 = shalt.err (!%p1605_p13)
}
  0x4f   : > { %s1609_s26 = scalar_lea.vmem %s1872_s16, %s1859_s15  ;;  %s1715_s27 = smov [#allocation3]  }
  0x50   : > { %p1610_p1 = scmp.ne.s32.totalorder %s1872_s16, %s1609_s26  ;;  %s1613_s28 = sshll.u32 %s1715_s27, 4  ;;  %s1614_s28 = int_to_ptr.vmem [resolvable:$false] %s1613_s28 }
  0x51   : > { %s1615_s30 = scalar_lea.vmem %s1614_s28, 2048  ;;  %p1616_p12 = scmp.lt.s32.totalorder %s1872_s16, %s1614_s28 }
  0x52   : > { %p1611_p6 = pnand %p1610_p1, %p1319_p4  ;;  %p1617_p11 = scmp.lt.s32.totalorder %s1615_s30, %s1609_s26 }
  0x54   : > { %p1612_p7 = pneg %p1611_p6  ;;  %p1618_p5 = por %p1617_p11, %p1616_p12 }
  0x56   : > { %p1619_p8 = pnand %p1618_p5, %p1612_p7 }
  0x58   : > { %1622 = shalt.err (!%p1619_p8)
}
  0x59   : > { %s1716_s11 = smov 128   ;;  %s1717_s12 = smov 8  }
  0x5a   : > { %269 = dma.hbm_to_vmem [thread:$0]  (%p1319_p4), %s1870_s13, %s1859_s15, %s1872_s16, %s1862_s14, %s1716_s11, %s1716_s11, %s1717_s12  }
  0x5b PF: > { %275 = sbr.rel (%p1822_p0) target bundleno = 695 (0x2b7), region = 40 }
  0x60   : > { %s1897_s17 = sand.u32 1, %s1691_s19   ;;  %p2443_p2 = scmp.ne.s32.totalorder %s2438_s6, 0 }
  0x61   : > { %s1324_s24 = sshll.u32 %s1897_s17, 6  ;;  %s278_s25 = scalar_lea.sflag [#allocation4], %s1897_s17 }
  0x62   : > { %s1903_s26 = scalar_lea.vmem [#allocation3], %s1324_s24 }
  0x63   : > { %1674 = dma.done.wait (%p2443_p2), %s278_s25, 1024  }
  0x64   : > { %1676 = vsyncadd (%p2443_p2), %s278_s25, 4294966272  ;;  %p2444_p4 = scmp.ne.s32.totalorder %s2437_s29, 0 }
  0x66   : > { %1678 = dma.done.wait (%p2444_p4), [#allocation7], 8192  }
  0x67   : > { %1680 = vsyncadd (%p2444_p4), [#allocation7], 4294959104  ;;  %v1718_v0 = vmov 0.0   ;;  %v388_v1 = vld [vmem:[#allocation6 + $0xf8] sm:$0xff]  ;;  %v387_v2 = vld [vmem:[#allocation6 + $0xf0] sm:$0xff]  ;;  %s2333_s14 = scalar_lea.vmem [#allocation9], %s1324_s24 }
  0x68   : > { %465 = vmatprep.mubr.f32.mxu0 %v1718_v0  ;;  %v386_v3 = vld [vmem:[#allocation6 + $0xe8] sm:$0xff]  ;;  %401 = vmatprep.subr.mxu0 %v388_v1  ;;  %v385_v4 = vld [vmem:[#allocation6 + $0xe0] sm:$0xff]  ;;  %v384_v5 = vld [vmem:[#allocation6 + $0xd8] sm:$0xff]  ;;  %s1174_s13 = scalar_lea.sflag [#allocation5], %s1897_s17  ;;  %p2489_p0 = scmp.ne.s32.totalorder %s2439_s7, 0 }
  0x69   : > { %402 = vmatpush1.msra.mxu0 %v387_v2  ;;  %v383_v6 = vld [vmem:[#allocation6 + $0xd0] sm:$0xff]  ;;  %v382_v7 = vld [vmem:[#allocation6 + $0xc8] sm:$0xff]  ;;  %v381_v8 = vld [vmem:[#allocation6 + $0xc0] sm:$0xff]  ;;  %s1330_s16 = sshll.u32 (%p2489_p0), %s1699_s21, 3 }
  0x6a   : > { %403 = vmatprep.subr.mxu0 %v386_v3  ;;  %v380_v9 = vld [vmem:[#allocation6 + $0xb8] sm:$0xff]  ;;  %v379_v10 = vld [vmem:[#allocation6 + $0xb0] sm:$0xff]  ;;  %v378_v11 = vld [vmem:[#allocation6 + $0xa8] sm:$0xff]  ;;  %s1182_s27 = ssub.s32 (%p2489_p0), 15, %s1330_s16 }
  0x6b   : > { %404 = vmatpush1.msra.mxu0 %v385_v4  ;;  %v377_v12 = vld [vmem:[#allocation6 + $0xa0] sm:$0xff]  ;;  %v376_v13 = vld [vmem:[#allocation6 + $0x98] sm:$0xff]  ;;  %v375_v14 = vld [vmem:[#allocation6 + $0x90] sm:$0xff]  ;;  %p1183_p3 = scmp.lt.s32.totalorder (%p2489_p0), %s1182_s27, 8 }
  0x6c   : > { %405 = vmatprep.subr.mxu0 %v384_v5  ;;  %v374_v15 = vld [vmem:[#allocation6 + $0x88] sm:$0xff]  ;;  %v373_v16 = vld [vmem:[#allocation6 + $0x80] sm:$0xff]  ;;  %v372_v17 = vld [vmem:[#allocation6 + $0x78] sm:$0xff] }
  0x6d   : > { %406 = vmatpush1.msra.mxu0 %v383_v6  ;;  %v371_v18 = vld [vmem:[#allocation6 + $0x70] sm:$0xff]  ;;  %v370_v19 = vld [vmem:[#allocation6 + $0x68] sm:$0xff]  ;;  %v369_v20 = vld [vmem:[#allocation6 + $0x60] sm:$0xff] }
  0x6e   : > { %407 = vmatprep.subr.mxu0 %v382_v7  ;;  %v368_v21 = vld [vmem:[#allocation6 + $0x58] sm:$0xff]  ;;  %v367_v22 = vld [vmem:[#allocation6 + $0x50] sm:$0xff]  ;;  %v366_v23 = vld [vmem:[#allocation6 + $0x48] sm:$0xff] }
  0x6f   : > { %408 = vmatpush1.msra.mxu0 %v381_v8  ;;  %v365_v24 = vld [vmem:[#allocation6 + $0x40] sm:$0xff]  ;;  %v364_v25 = vld [vmem:[#allocation6 + $0x38] sm:$0xff]  ;;  %v363_v26 = vld [vmem:[#allocation6 + $0x30] sm:$0xff] }
  0x70   : > { %409 = vmatprep.subr.mxu0 %v380_v9  ;;  %v362_v27 = vld [vmem:[#allocation6 + $0x28] sm:$0xff]  ;;  %v361_v28 = vld [vmem:[#allocation6 + $0x20] sm:$0xff]  ;;  %v360_v29 = vld [vmem:[#allocation6 + $0x18] sm:$0xff]  ;;  %v391_v9 = vlaneseq }
  0x71   : > { %410 = vmatpush1.msra.mxu0 %v379_v10  ;;  %v359_v30 = vld [vmem:[#allocation6 + $0x10] sm:$0xff]  ;;  %v358_v31 = vld [vmem:[#allocation6 + $0x8] sm:$0xff]  ;;  %v357_v32 = vld [vmem:[#allocation6] sm:$0xff] }
  0x72   : > { %411 = vmatprep.subr.mxu0 %v378_v11  ;;  %v349_v33 = vld [vmem:[%s1903_s26] sm:$0xff]  ;;  %v350_v34 = vld [vmem:[%s1903_s26 + $0x8] sm:$0xff]  ;;  %v351_v35 = vld [vmem:[%s1903_s26 + $0x10] sm:$0xff]  ;;  %v392_v10 = vshrl.u32 %v391_v9, 7 }
  0x73   : > { %412 = vmatpush1.msra.mxu0 %v377_v12  ;;  %v352_v36 = vld [vmem:[%s1903_s26 + $0x18] sm:$0xff]  ;;  %v353_v37 = vld [vmem:[%s1903_s26 + $0x20] sm:$0xff]  ;;  %v354_v38 = vld [vmem:[%s1903_s26 + $0x28] sm:$0xff] }
  0x74   : > { %413 = vmatprep.subr.mxu0 %v376_v13  ;;  %v355_v39 = vld [vmem:[%s1903_s26 + $0x30] sm:$0xff]  ;;  %v356_v40 = vld [vmem:[%s1903_s26 + $0x38] sm:$0xff]  ;;  %v1015_v45 = vld [vmem:[#allocation8 + $0xe8] sm:$0xff]  ;;  %v393_v11 = vsub.s32 0, %v392_v10  ;;  %v397_v13 = vsub.s32 1, %v392_v10 }
  0x75   : > { %414 = vmatpush1.msra.mxu0 %v375_v14  ;;  %v1017_v41 = vld [vmem:[#allocation8 + $0xf8] sm:$0xff]  ;;  %v1016_v43 = vld [vmem:[#allocation8 + $0xf0] sm:$0xff]  ;;  %v999_v46 = vld [vmem:[#allocation8 + $0x68] sm:$0xff] }
  0x76   : > { %415 = vmatprep.subr.mxu0 %v374_v15  ;;  %1340 = vmatprep.subr.mxu1 %v1017_v41  ;;  %v1001_v42 = vld [vmem:[#allocation8 + $0x78] sm:$0xff]  ;;  %v1000_v44 = vld [vmem:[#allocation8 + $0x70] sm:$0xff]  ;;  %v1014_v47 = vld [vmem:[#allocation8 + $0xe0] sm:$0xff] }
  0x77   : > { %416 = vmatpush1.msra.mxu0 %v373_v16  ;;  %1341 = vmatpush3.msra.mxu1 %v1001_v42  ;;  %v998_v48 = vld [vmem:[#allocation8 + $0x60] sm:$0xff]  ;;  %v1013_v49 = vld [vmem:[#allocation8 + $0xd8] sm:$0xff]  ;;  %v1012_v51 = vld [vmem:[#allocation8 + $0xd0] sm:$0xff] }
  0x78   : > { %417 = vmatprep.subr.mxu0 %v372_v17  ;;  %1342 = vmatprep.subr.mxu1 %v1016_v43  ;;  %v997_v50 = vld [vmem:[#allocation8 + $0x58] sm:$0xff]  ;;  %v996_v52 = vld [vmem:[#allocation8 + $0x50] sm:$0xff]  ;;  %v1011_v53 = vld [vmem:[#allocation8 + $0xc8] sm:$0xff] }
  0x79   : > { %418 = vmatpush1.msra.mxu0 %v371_v18  ;;  %1343 = vmatpush3.msra.mxu1 %v1000_v44  ;;  %v995_v54 = vld [vmem:[#allocation8 + $0x48] sm:$0xff]  ;;  %v1010_v55 = vld [vmem:[#allocation8 + $0xc0] sm:$0xff]  ;;  %v1009_v57 = vld [vmem:[#allocation8 + $0xb8] sm:$0xff] }
  0x7a   : > { %419 = vmatprep.subr.mxu0 %v370_v19  ;;  %1344 = vmatprep.subr.mxu1 %v1015_v45  ;;  %v994_v56 = vld [vmem:[#allocation8 + $0x40] sm:$0xff]  ;;  %v993_v58 = vld [vmem:[#allocation8 + $0x38] sm:$0xff]  ;;  %v1008_v59 = vld [vmem:[#allocation8 + $0xb0] sm:$0xff] }
  0x7b   : > { %420 = vmatpush1.msra.mxu0 %v369_v20  ;;  %1345 = vmatpush3.msra.mxu1 %v999_v46  ;;  %v992_v60 = vld [vmem:[#allocation8 + $0x30] sm:$0xff]  ;;  %v1007_v61 = vld [vmem:[#allocation8 + $0xa8] sm:$0xff]  ;;  %v1006_v63 = vld [vmem:[#allocation8 + $0xa0] sm:$0xff] }
  0x7c   : > { %421 = vmatprep.subr.mxu0 %v368_v21  ;;  %1346 = vmatprep.subr.mxu1 %v1014_v47  ;;  %v991_v62 = vld [vmem:[#allocation8 + $0x28] sm:$0xff]  ;;  %v1005_v1 = vld [vmem:[#allocation8 + $0x98] sm:$0xff]  ;;  %v1004_v3 = vld [vmem:[#allocation8 + $0x90] sm:$0xff] }
  0x7d   : > { %422 = vmatpush1.msra.mxu0 %v367_v22  ;;  %1347 = vmatpush3.msra.mxu1 %v998_v48  ;;  %v989_v2 = vld [vmem:[#allocation8 + $0x18] sm:$0xff]  ;;  %v988_v4 = vld [vmem:[#allocation8 + $0x10] sm:$0xff]  ;;  %v1003_v5 = vld [vmem:[#allocation8 + $0x88] sm:$0xff] }
  0x7e   : > { %423 = vmatprep.subr.mxu0 %v366_v23  ;;  %1348 = vmatprep.subr.mxu1 %v1013_v49  ;;  %v987_v6 = vld [vmem:[#allocation8 + $0x8] sm:$0xff]  ;;  %v1002_v7 = vld [vmem:[#allocation8 + $0x80] sm:$0xff] }
  0x7f   : > { %424 = vmatpush1.msra.mxu0 %v365_v24  ;;  %1349 = vmatpush3.msra.mxu1 %v997_v50  ;;  %v986_v8 = vld [vmem:[#allocation8] sm:$0xff] }
  0x80   : > { %425 = vmatprep.subr.mxu0 %v364_v25  ;;  %1350 = vmatprep.subr.mxu1 %v1012_v51  ;;  %v389_v12 = vld [vmem:[%s2412_s2] sm:$0x3] }
  0x81   : > { %426 = vmatpush1.msra.mxu0 %v363_v26  ;;  %1351 = vmatpush3.msra.mxu1 %v996_v52  ;;  %v1932_v14 = vrot.slane %v389_v12, %v393_v11  ;;  %v1934_v15 = vrot.slane %v389_v12, %v397_v13 }
  0x82   : > { %427 = vmatprep.subr.mxu0 %v362_v27  ;;  %1352 = vmatprep.subr.mxu1 %v1011_v53 }
  0x83   : > { %428 = vmatpush1.msra.mxu0 %v361_v28  ;;  %1353 = vmatpush3.msra.mxu1 %v995_v54 }
  0x84   : > { %429 = vmatprep.subr.mxu0 %v360_v29  ;;  %1354 = vmatprep.subr.mxu1 %v1010_v55 }
  0x85   : > { %430 = vmatpush1.msra.mxu0 %v359_v30  ;;  %1355 = vmatpush3.msra.mxu1 %v994_v56 }
  0x86   : > { %431 = vmatprep.subr.mxu0 %v358_v31  ;;  %1356 = vmatprep.subr.mxu1 %v1009_v57 }
  0x87   : > { %432 = vmatpush1.msra.mxu0 %v357_v32  ;;  %1357 = vmatpush3.msra.mxu1 %v993_v58 }
  0x88   : > { %466 = vmatmul.mubr.f32.vlgmr.msra.gmra.mxu0 %v349_v33  ;;  %1358 = vmatprep.subr.mxu1 %v1008_v59 }
  0x89   : > { %471 = vmatprep.mubr.f32.mxu0 %v1718_v0  ;;  %1359 = vmatpush3.msra.mxu1 %v992_v60 }
  0x8a   : > { %1360 = vmatprep.subr.mxu1 %v1007_v61 }
  0x8b   : > { %1361 = vmatpush3.msra.mxu1 %v991_v62 }
  0x8c   : > { %472 = vmatmul.mubr.f32.gmra.mxu0 %v350_v34  ;;  %1362 = vmatprep.subr.mxu1 %v1006_v63 }
  0x8d   : > { %477 = vmatprep.mubr.f32.mxu0 %v1718_v0 }
  0x90   : > { %478 = vmatmul.mubr.f32.gmra.mxu0 %v351_v35 }
  0x91   : > { %483 = vmatprep.mubr.f32.mxu0 %v1718_v0 }
  0x94   : > { %484 = vmatmul.mubr.f32.gmra.mxu0 %v352_v36 }
  0x95   : > { %489 = vmatprep.mubr.f32.mxu0 %v1718_v0 }
  0x98   : > { %490 = vmatmul.mubr.f32.gmra.mxu0 %v353_v37 }
  0x99   : > { %495 = vmatprep.mubr.f32.mxu0 %v1718_v0 }
  0x9c   : > { %496 = vmatmul.mubr.f32.gmra.mxu0 %v354_v38 }
  0x9d   : > { %501 = vmatprep.mubr.f32.mxu0 %v1718_v0 }
  0xa0   : > { %502 = vmatmul.mubr.f32.gmra.mxu0 %v355_v39 }
  0xa1   : > { %507 = vmatprep.mubr.f32.mxu0 %v1718_v0  ;;  %v990_v0 = vld [vmem:[#allocation8 + $0x20] sm:$0xff] }
  0xa2   : > { %1363 = vmatpush3.msra.mxu1 %v990_v0 }
  0xa3   : > { %1364 = vmatprep.subr.mxu1 %v1005_v1 }
  0xa4   : > { %508 = vmatmul.mubr.f32.gmra.mxu0 %v356_v40  ;;  %1365 = vmatpush3.msra.mxu1 %v989_v2 }
  0xa5   : > { %1366 = vmatprep.subr.mxu1 %v1004_v3 }
  0xa6   : > { %1367 = vmatpush3.msra.mxu1 %v988_v4 }
  0xa7   : > { %1368 = vmatprep.subr.mxu1 %v1003_v5 }
  0xa8   : > { %1369 = vmatpush3.msra.mxu1 %v987_v6 }
  0xa9   : > { %1370 = vmatprep.subr.mxu1 %v1002_v7 }
  0xaa   : > { %1371 = vmatpush3.msra.mxu1 %v986_v8 }
 0x148   : > { %v467_v16 = vpop.f32.mrf.mxu0 }
 0x149   : > { %v468_v17 = vadd.f32 %v467_v16, %v1932_v14 }
 0x14a   : > { %v469_v18 = vpop.f32.mrf.mxu0 }
 0x14b   : > { %v1937_v19 = vmul.f32 0.70710677, %v468_v17  ;;  %v470_v20 = vadd.f32 %v469_v18, %v1934_v15  ;;  %v1976_v57 = vmul.f32 0.5, %v468_v17 }
 0x14c   : > { %v473_v21 = vpop.f32.mrf.mxu0 }
 0x14d   : > { %v546_v22 = vand.u32 2147483647, %v1937_v19  ;;  %v1941_v23 = vmul.f32 0.70710677, %v470_v20  ;;  %v474_v24 = vadd.f32 %v473_v21, %v1932_v14  ;;  %v1991_v10 = vmul.f32 0.5, %v470_v20 }
 0x14e   : > { %v475_v25 = vpop.f32.mrf.mxu0  ;;  %vm898_vm1 = vcmp.ge.f32.partialorder %v1937_v19, 0.0 }
 0x14f   : > { %v562_v26 = vmul.f32 0.3275911, %v546_v22  ;;  %v547_v27 = vand.u32 2147483647, %v1941_v23  ;;  %v1945_v28 = vmul.f32 0.70710677, %v474_v24  ;;  %v1948_v29 = vadd.f32 %v475_v25, %v1934_v15 }
 0x150   : > { %v479_v30 = vpop.f32.mrf.mxu0  ;;  %v802_v36 = vsub.f32 0.0, %v546_v22  ;;  %v1995_v17 = vmul.f32 0.5, %v474_v24  ;;  %vm899_vm0 = vcmp.ge.f32.partialorder %v1941_v23, 0.0 }
 0x151   : > { %v1950_v31 = vadd.f32 1.0, %v562_v26  ;;  %v563_v32 = vmul.f32 0.3275911, %v547_v27  ;;  %v548_v33 = vand.u32 2147483647, %v1945_v28  ;;  %v803_v37 = vsub.f32 0.0, %v547_v27 }
 0x152   : > { %v1954_v34 = vmul.f32 0.70710677, %v1948_v29  ;;  %v481_v35 = vpop.f32.mrf.mxu0  ;;  %v480_v42 = vadd.f32 %v479_v30, %v1932_v14  ;;  %v818_v48 = vmul.f32 %v802_v36, %v546_v22  ;;  %v2005_v24 = vmul.f32 0.5, %v1948_v29 }
 0x153   : > { %1481 = vrcp.f32 %v1950_v31  ;;  %v1957_v38 = vadd.f32 1.0, %v563_v32  ;;  %v564_v39 = vmul.f32 0.3275911, %v548_v33  ;;  %v1962_v43 = vadd.f32 %v481_v35, %v1934_v15 }
 0x154   : > { %v549_v40 = vand.u32 2147483647, %v1954_v34  ;;  %v485_v41 = vpop.f32.mrf.mxu0  ;;  %v1966_v47 = vmul.f32 0.70710677, %v480_v42  ;;  %v819_v49 = vmul.f32 %v803_v37, %v547_v27  ;;  %v804_v50 = vsub.f32 0.0, %v548_v33 }
 0x155   : > { %v1964_v46 = vadd.f32 1.0, %v564_v39  ;;  %1483 = vrcp.f32 %v1957_v38  ;;  %v1973_v54 = vmul.f32 0.70710677, %v1962_v43  ;;  %v486_v55 = vadd.f32 %v485_v41, %v1932_v14 }
 0x156   : > { %v565_v44 = vmul.f32 0.3275911, %v549_v40  ;;  %v487_v45 = vpop.f32.mrf.mxu0  ;;  %v805_v52 = vsub.f32 0.0, %v549_v40  ;;  %v550_v53 = vand.u32 2147483647, %v1966_v47  ;;  %v820_v61 = vmul.f32 %v804_v50, %v548_v33 }
 0x157   : > { %1485 = vrcp.f32 %v1964_v46  ;;  %v488_v59 = vadd.f32 %v487_v45, %v1934_v15  ;;  %v834_v60 = vmul.f32 1.442695, %v818_v48  ;;  %v551_v62 = vand.u32 2147483647, %v1973_v54 }
 0x158   : > { %v1969_v51 = vadd.f32 1.0, %v565_v44  ;;  %v491_v56 = vpop.f32.mrf.mxu0  ;;  %v566_v58 = vmul.f32 0.3275911, %v550_v53  ;;  %v1981_v63 = vmul.f32 0.70710677, %v486_v55  ;;  %v821_v1 = vmul.f32 %v805_v52, %v549_v40 }
 0x159   : > { %v836_v0 = vmul.f32 1.442695, %v819_v49  ;;  %v806_v3 = vsub.f32 0.0, %v550_v53  ;;  %v567_v4 = vmul.f32 0.3275911, %v551_v62  ;;  %v807_v5 = vsub.f32 0.0, %v551_v62 }
 0x15a   : > { %1487 = vrcp.f32 %v1969_v51  ;;  %v1984_v2 = vadd.f32 1.0, %v566_v58  ;;  %v552_v6 = vand.u32 2147483647, %v1981_v63  ;;  %v493_v7 = vpop.f32.mrf.mxu0  ;;  %v1988_v8 = vmul.f32 0.70710677, %v488_v59 }
 0x15b   : > { %v492_v9 = vadd.f32 %v491_v56, %v1932_v14  ;;  %v838_v11 = vmul.f32 1.442695, %v820_v61  ;;  %v1993_v12 = vadd.f32 1.0, %v567_v4  ;;  %v840_v22 = vmul.f32 1.442695, %v821_v1 }
 0x15c   : > { %1489 = vrcp.f32 %v1984_v2  ;;  %v568_v13 = vmul.f32 0.3275911, %v552_v6  ;;  %v808_v18 = vsub.f32 0.0, %v552_v6  ;;  %v553_v21 = vand.u32 2147483647, %v1988_v8  ;;  %v497_v30 = vpop.f32.mrf.mxu0 }
 0x15d   : > { %1491 = vpow2.f32 %v834_v60  ;;  %v822_v25 = vmul.f32 %v806_v3, %v550_v53  ;;  %v823_v26 = vmul.f32 %v807_v5, %v551_v62  ;;  %v2001_v33 = vmul.f32 0.70710677, %v492_v9 }
 0x15e   : > { %1493 = vpow2.f32 %v836_v0  ;;  %v1998_v27 = vadd.f32 1.0, %v568_v13  ;;  %v569_v20 = vmul.f32 0.3275911, %v553_v21  ;;  %v809_v32 = vsub.f32 0.0, %v553_v21  ;;  %v499_v48 = vpop.f32.mrf.mxu0 }
 0x15f   : > { %1495 = vrcp.f32 %v1993_v12  ;;  %v2007_v36 = vmul.f32 0.5, %v480_v42  ;;  %v824_v39 = vmul.f32 %v808_v18, %v552_v6  ;;  %v494_v41 = vadd.f32 %v493_v7, %v1934_v15 }
 0x160   : > { %v1482_v16 = vpop.eup %1481  ;;  %1497 = vpow2.f32 %v838_v11  ;;  %v2010_v40 = vadd.f32 1.0, %v569_v20  ;;  %v842_v44 = vmul.f32 1.442695, %v822_v25  ;;  %v2014_v45 = vmul.f32 0.5, %v1962_v43  ;;  %v503_v4 = vpop.f32.mrf.mxu0 }
 0x161   : > { %v610_v35 = vmul.f32 %v1482_v16, %v1950_v31  ;;  %1499 = vrcp.f32 %v1998_v27  ;;  %v554_v31 = vand.u32 2147483647, %v2001_v33  ;;  %v844_v29 = vmul.f32 1.442695, %v823_v26 }
 0x162   : > { %v1484_v37 = vpop.eup %1483  ;;  %1501 = vpow2.f32 %v840_v22  ;;  %v2017_v49 = vmul.f32 0.5, %v486_v55  ;;  %v825_v42 = vmul.f32 %v809_v32, %v553_v21  ;;  %v2021_v56 = vmul.f32 0.5, %v488_v59  ;;  %v505_v20 = vpop.f32.mrf.mxu0 }
 0x163   : > { %1503 = vrcp.f32 %v2010_v40  ;;  %v626_v52 = vsub.f32 2.0, %v610_v35  ;;  %v611_v53 = vmul.f32 %v1484_v37, %v1957_v38  ;;  %v570_v58 = vmul.f32 0.3275911, %v554_v31 }
 0x164   : > { %2445 = vst [vmem:[#allocation14_spill] sm:$0xff] %v2017_v49  ;;  %v1486_v50 = vpop.eup %1485  ;;  %v846_v60 = vmul.f32 1.442695, %v824_v39  ;;  %v2023_v61 = vmul.f32 0.5, %v492_v9  ;;  %v2025_v43 = vmul.f32 0.70710677, %v494_v41  ;;  %v2028_v62 = vadd.f32 %v497_v30, %v1932_v14 }
 0x165   : > { %1505 = vpow2.f32 %v842_v44  ;;  %v2030_v0 = vadd.f32 1.0, %v570_v58  ;;  %v810_v1 = vsub.f32 0.0, %v554_v31  ;;  %v500_v3 = vadd.f32 %v499_v48, %v1934_v15 }
 0x166   : > { %2446 = vst [vmem:[#allocation15_spill] sm:$0xff] %v2023_v61  ;;  %2447 = vst [vmem:[#allocation16_spill] sm:$0xff] %v2025_v43  ;;  %v612_v38 = vmul.f32 %v1486_v50, %v1964_v46  ;;  %1507 = vpow2.f32 %v844_v29  ;;  %v848_v59 = vmul.f32 1.442695, %v825_v42  ;;  %v555_v5 = vand.u32 2147483647, %v2025_v43 }
 0x167   : > { %2448 = vst [vmem:[#allocation17_spill] sm:$0xff] %v2028_v62  ;;  %v1488_v55 = vpop.eup %1487  ;;  %v2035_v7 = vmul.f32 %v1482_v16, %v626_v52  ;;  %v627_v9 = vsub.f32 2.0, %v611_v53  ;;  %1509 = vrcp.f32 %v2030_v0  ;;  %v2039_v11 = vmul.f32 0.70710677, %v2028_v62 }
 0x168   : > { %v613_v18 = vmul.f32 %v1488_v55, %v1969_v51  ;;  %1511 = vpow2.f32 %v846_v60  ;;  %v571_v21 = vmul.f32 0.3275911, %v555_v5  ;;  %v811_v46 = vsub.f32 0.0, %v555_v5 }
 0x169   : > { %v1490_v6 = vpop.eup %1489  ;;  %2449 = vst [vmem:[#allocation18_spill] sm:$0xff] %v2039_v11  ;;  %v826_v25 = vmul.f32 %v810_v1, %v554_v31  ;;  %v2046_v26 = vmul.f32 0.5, %v494_v41  ;;  %v556_v16 = vand.u32 2147483647, %v2039_v11  ;;  %v2049_v30 = vmul.f32 0.70710677, %v500_v3 }
 0x16a   : > { %v2041_v13 = vpop.eup %1491  ;;  %v628_v32 = vsub.f32 2.0, %v612_v38  ;;  %v614_v35 = vmul.f32 %v1490_v6, %v1984_v2  ;;  %1513 = vpow2.f32 %v848_v59  ;;  %v2052_v39 = vadd.f32 1.0, %v571_v21  ;;  %v509_v59 = vpop.f32.mrf.mxu0 }
 0x16b   : > { %v2044_v22 = vpop.eup %1493  ;;  %2450 = vst [vmem:[#allocation19_spill] sm:$0xff] %v2046_v26  ;;  %2451 = vst [vmem:[#allocation20_spill] sm:$0xff] %v2049_v30  ;;  %v827_v44 = vmul.f32 %v811_v46, %v555_v5  ;;  %v572_v48 = vmul.f32 0.3275911, %v556_v16  ;;  %v812_v29 = vsub.f32 0.0, %v556_v16  ;;  %v2057_v41 = vmul.f32 %v1484_v37, %v627_v9 }
 0x16c   : > { %v1496_v51 = vpop.eup %1495  ;;  %v557_v42 = vand.u32 2147483647, %v2049_v30  ;;  %v629_v52 = vsub.f32 2.0, %v613_v18  ;;  %1515 = vrcp.f32 %v2052_v39  ;;  %v2061_v53 = vadd.f32 %v503_v4, %v1932_v14 }
 0x16d   : > { %v2055_v31 = vpop.eup %1497  ;;  %v850_v58 = vmul.f32 1.442695, %v826_v25  ;;  %v2063_v60 = vadd.f32 1.0, %v572_v48  ;;  %v828_v1 = vmul.f32 %v812_v29, %v556_v16  ;;  %v2067_v21 = vmul.f32 %v1486_v50, %v628_v32  ;;  %v511_v32 = vpop.f32.mrf.mxu0 }
 0x16e   : > { %2452 = vst [vmem:[#allocation21_spill] sm:$0xff] %v2061_v53  ;;  %v1500_v2 = vpop.eup %1499  ;;  %v573_v38 = vmul.f32 0.3275911, %v557_v42  ;;  %v615_v37 = vmul.f32 %v1496_v51, %v1993_v12  ;;  %v2070_v9 = vmul.f32 0.5, %v500_v3  ;;  %v813_v18 = vsub.f32 0.0, %v557_v42 }
 0x16f   : > { %v2065_v5 = vpop.eup %1501  ;;  %v630_v62 = vsub.f32 2.0, %v614_v35  ;;  %v852_v4 = vmul.f32 1.442695, %v827_v44  ;;  %1517 = vrcp.f32 %v2063_v60  ;;  %v616_v16 = vmul.f32 %v1500_v2, %v1998_v27 }
 0x170   : > { %2453 = vst [vmem:[#allocation22_spill] sm:$0xff] %v2070_v9  ;;  %v1504_v46 = vpop.eup %1503  ;;  %v2073_v25 = vadd.f32 1.0, %v573_v38  ;;  %v854_v48 = vmul.f32 1.442695, %v828_v1  ;;  %v829_v29 = vmul.f32 %v813_v18, %v557_v42  ;;  %v2077_v61 = vmul.f32 0.70710677, %v2061_v53 }
 0x171   : > { %v2079_v50 = vmul.f32 %v1488_v55, %v629_v52  ;;  %1519 = vpow2.f32 %v850_v58  ;;  %v2082_v12 = vadd.f32 %v505_v20, %v1934_v15  ;;  %v2085_v3 = vadd.f32 %v509_v59, %v1932_v14 }
 0x172   : > { %2454 = vst [vmem:[#allocation23_spill] sm:$0xff] %v2077_v61  ;;  %v2087_v35 = vpop.eup %1505  ;;  %v631_v44 = vsub.f32 2.0, %v615_v37  ;;  %v617_v27 = vmul.f32 %v1504_v46, %v2010_v40  ;;  %1521 = vrcp.f32 %v2073_v25  ;;  %v856_v42 = vmul.f32 1.442695, %v829_v29 }
 0x173   : > { %2455 = vst [vmem:[#allocation24_spill] sm:$0xff] %v2082_v12  ;;  %2456 = vst [vmem:[#allocation25_spill] sm:$0xff] %v2085_v3  ;;  %v2091_v1 = vpop.eup %1507  ;;  %v2093_v55 = vmul.f32 %v1490_v6, %v630_v62  ;;  %1523 = vpow2.f32 %v852_v4  ;;  %v558_v20 = vand.u32 2147483647, %v2077_v61  ;;  %v2097_v52 = vmul.f32 0.70710677, %v2082_v12 }
 0x174   : > { %v1510_v14 = vpop.eup %1509  ;;  %v632_v58 = vsub.f32 2.0, %v616_v16  ;;  %1525 = vpow2.f32 %v854_v48  ;;  %v2100_v38 = vmul.f32 0.70710677, %v2085_v3  ;;  %v2103_v40 = vadd.f32 %v511_v32, %v1934_v15 }
 0x175   : > { %2457 = vst [vmem:[#allocation26_spill] sm:$0xff] %v2097_v52  ;;  %v2105_v59 = vpop.eup %1511  ;;  %v618_v62 = vmul.f32 %v1510_v14, %v2030_v0  ;;  %v574_v6 = vmul.f32 0.3275911, %v558_v20  ;;  %v814_v37 = vsub.f32 0.0, %v558_v20  ;;  %v559_v18 = vand.u32 2147483647, %v2097_v52 }
 0x176   : > { %2458 = vst [vmem:[#allocation27_spill] sm:$0xff] %v2100_v38  ;;  %2459 = vst [vmem:[#allocation28_spill] sm:$0xff] %v2103_v40  ;;  %v2109_v4 = vmul.f32 %v1496_v51, %v631_v44  ;;  %v633_v29 = vsub.f32 2.0, %v617_v27  ;;  %1527 = vpow2.f32 %v856_v42  ;;  %v560_v16 = vand.u32 2147483647, %v2100_v38 }
 0x177   : > { %v2112_v48 = vpop.eup %1513  ;;  %v634_v3 = vsub.f32 2.0, %v618_v62  ;;  %v2114_v53 = vadd.f32 1.0, %v574_v6  ;;  %v830_v15 = vmul.f32 %v814_v37, %v558_v20  ;;  %v575_v32 = vmul.f32 0.3275911, %v559_v18 }
 0x178   : > { %v815_v61 = vsub.f32 0.0, %v559_v18  ;;  %v576_v12 = vmul.f32 0.3275911, %v560_v16  ;;  %v816_v0 = vsub.f32 0.0, %v560_v16  ;;  %v2117_v9 = vmul.f32 0.70710677, %v2103_v40 }
 0x179   : > { %v1516_v52 = vpop.eup %1515  ;;  %v2119_v51 = vmul.f32 %v1500_v2, %v632_v58  ;;  %1529 = vrcp.f32 %v2114_v53  ;;  %v858_v44 = vmul.f32 1.442695, %v830_v15  ;;  %v2122_v27 = vadd.f32 1.0, %v575_v32 }
 0x17a   : > { %2460 = vst [vmem:[#allocation29_spill] sm:$0xff] %v2117_v9  ;;  %v619_v42 = vmul.f32 %v1516_v52, %v2052_v39  ;;  %v831_v62 = vmul.f32 %v815_v61, %v559_v18  ;;  %v2125_v6 = vadd.f32 1.0, %v576_v12  ;;  %v832_v20 = vmul.f32 %v816_v0, %v560_v16 }
 0x17b   : > { %v2127_v37 = vmul.f32 %v1504_v46, %v633_v29  ;;  %1531 = vpow2.f32 %v858_v44  ;;  %v561_v38 = vand.u32 2147483647, %v2117_v9  ;;  %v659_v40 = vmul.f32 1.0614054, %v2057_v41 }
 0x17c   : > { %v1518_v2 = vpop.eup %1517  ;;  %v2131_v58 = vmul.f32 %v1510_v14, %v634_v3  ;;  %v635_v26 = vsub.f32 2.0, %v619_v42  ;;  %1533 = vrcp.f32 %v2122_v27  ;;  %v860_v15 = vmul.f32 1.442695, %v831_v62 }
 0x17d   : > { %v620_v39 = vmul.f32 %v1518_v2, %v2063_v60  ;;  %1535 = vrcp.f32 %v2125_v6  ;;  %v577_v61 = vmul.f32 0.3275911, %v561_v38  ;;  %v817_v12 = vsub.f32 0.0, %v561_v38 }
 0x17e   : > { %v2136_v46 = vpop.eup %1519  ;;  %v2138_v18 = vmul.f32 %v1516_v52, %v635_v26  ;;  %v2140_v29 = vmul.f32 1.442695, %v832_v20  ;;  %v675_v16 = vadd.f32 -1.4531521, %v659_v40  ;;  %v658_v3 = vmul.f32 1.0614054, %v2035_v7 }
 0x17f   : > { %2461 = vst [vmem:[#allocation30_spill] sm:$0xff] %v2136_v46  ;;  %v1522_v14 = vpop.eup %1521  ;;  %v636_v32 = vsub.f32 2.0, %v620_v39  ;;  %1537 = vpow2.f32 %v860_v15  ;;  %v2143_v0 = vadd.f32 1.0, %v577_v61  ;;  %v833_v44 = vmul.f32 %v817_v12, %v561_v38 }
 0x180   : > { %2462 = vst [vmem:[#allocation31_spill] sm:$0xff] %v2140_v29  ;;  %v2145_v60 = vpop.eup %1523  ;;  %v621_v42 = vmul.f32 %v1522_v14, %v2073_v25  ;;  %v691_v62 = vmul.f32 %v675_v16, %v2057_v41  ;;  %v674_v9 = vadd.f32 -1.4531521, %v658_v3  ;;  %v661_v26 = vmul.f32 1.0614054, %v2079_v50 }
 0x181   : > { %2463 = vst [vmem:[#allocation32_spill] sm:$0xff] %v2145_v60  ;;  %v2150_v52 = vpop.eup %1525  ;;  %v2152_v40 = vmul.f32 %v1518_v2, %v636_v32  ;;  %1539 = vrcp.f32 %v2143_v0  ;;  %v864_v20 = vmul.f32 1.442695, %v833_v44  ;;  %v660_v15 = vmul.f32 1.0614054, %v2067_v21 }
 0x182   : > { %2464 = vst [vmem:[#allocation33_spill] sm:$0xff] %v2150_v52  ;;  %v637_v39 = vsub.f32 2.0, %v621_v42  ;;  %v707_v38 = vadd.f32 1.4214138, %v691_v62  ;;  %v690_v61 = vmul.f32 %v674_v9, %v2035_v7  ;;  %v677_v12 = vadd.f32 -1.4531521, %v661_v26 }
 0x183   : > { %v2157_v25 = vpop.eup %1527  ;;  %1541 = vpow2.f32 %v864_v20  ;;  %v676_v16 = vadd.f32 -1.4531521, %v660_v15  ;;  %v663_v3 = vmul.f32 1.0614054, %v2109_v4  ;;  %v662_v29 = vmul.f32 1.0614054, %v2093_v55 }
 0x184   : > { %2465 = vst [vmem:[#allocation34_spill] sm:$0xff] %v2157_v25  ;;  %v2161_v2 = vmul.f32 %v1522_v14, %v637_v39  ;;  %v723_v32 = vmul.f32 %v707_v38, %v2057_v41  ;;  %v706_v44 = vadd.f32 1.4214138, %v690_v61  ;;  %v693_v52 = vmul.f32 %v677_v12, %v2079_v50 }
 0x185   : > { %v692_v42 = vmul.f32 %v676_v16, %v2067_v21  ;;  %v679_v62 = vadd.f32 -1.4531521, %v663_v3  ;;  %v678_v9 = vadd.f32 -1.4531521, %v662_v29  ;;  %v665_v26 = vmul.f32 1.0614054, %v2127_v37 }
 0x186   : > { %v1530_v25 = vpop.eup %1529  ;;  %v739_v20 = vadd.f32 -0.28449672, %v723_v32  ;;  %v722_v15 = vmul.f32 %v706_v44, %v2035_v7  ;;  %v709_v49 = vadd.f32 1.4214138, %v693_v52  ;;  %v2169_v46 = vmul.f32 1.0614054, %v2119_v51 }
 0x187   : > { %v622_v14 = vmul.f32 %v1530_v25, %v2114_v53  ;;  %v708_v39 = vadd.f32 1.4214138, %v692_v42  ;;  %v695_v38 = vmul.f32 %v679_v62, %v2109_v4  ;;  %v694_v61 = vmul.f32 %v678_v9, %v2093_v55 }
 0x188   : > { %v2174_v12 = vpop.eup %1531  ;;  %v755_v29 = vmul.f32 %v739_v20, %v2057_v41  ;;  %v738_v16 = vadd.f32 -0.28449672, %v722_v15  ;;  %v725_v3 = vmul.f32 %v709_v49, %v2079_v50  ;;  %v681_v32 = vadd.f32 -1.4531521, %v665_v26 }
 0x189   : > { %2466 = vst [vmem:[#allocation35_spill] sm:$0xff] %v2174_v12  ;;  %v1534_v44 = vpop.eup %1533  ;;  %v638_v52 = vsub.f32 2.0, %v622_v14  ;;  %v724_v60 = vmul.f32 %v708_v39, %v2067_v21  ;;  %v711_v30 = vadd.f32 1.4214138, %v695_v38  ;;  %v710_v11 = vadd.f32 1.4214138, %v694_v61 }
 0x18a   : > { %v1536_v53 = vpop.eup %1535  ;;  %v623_v42 = vmul.f32 %v1534_v44, %v2122_v27  ;;  %v771_v62 = vadd.f32 0.2548296, %v755_v29  ;;  %v754_v9 = vmul.f32 %v738_v16, %v2035_v7  ;;  %v741_v43 = vadd.f32 -0.28449672, %v725_v3 }
 0x18b   : > { %v2181_v12 = vmul.f32 %v1530_v25, %v638_v52  ;;  %v624_v20 = vmul.f32 %v1536_v53, %v2125_v6  ;;  %v740_v49 = vadd.f32 -0.28449672, %v724_v60  ;;  %v727_v26 = vmul.f32 %v711_v30, %v2109_v4 }
 0x18c   : > { %v2186_v15 = vpop.eup %1537  ;;  %v639_v14 = vsub.f32 2.0, %v623_v42  ;;  %v787_v39 = vmul.f32 %v771_v62, %v2057_v41  ;;  %v770_v38 = vadd.f32 0.2548296, %v754_v9  ;;  %v757_v27 = vmul.f32 %v741_v43, %v2079_v50 }
 0x18d   : > { %v640_v61 = vsub.f32 2.0, %v624_v20  ;;  %v756_v25 = vmul.f32 %v740_v49, %v2067_v21  ;;  %v743_v29 = vadd.f32 -0.28449672, %v727_v26  ;;  %v726_v6 = vmul.f32 %v710_v11, %v2093_v55 }
 0x18e   : > { %v1540_v16 = vpop.eup %1539  ;;  %v2193_v60 = vmul.f32 %v1534_v44, %v639_v14  ;;  %v867_v30 = vmul.f32 %v2044_v22, %v787_v39  ;;  %v786_v3 = vmul.f32 %v770_v38, %v2035_v7  ;;  %v773_v52 = vadd.f32 0.2548296, %v757_v27 }
 0x18f   : > { %vm901_vm2 = vcmp.ge.f32.partialorder %v1954_v34, 0.0  ;;  %v2198_v41 = vmul.f32 %v1536_v53, %v640_v61  ;;  %v625_v43 = vmul.f32 %v1540_v16, %v2143_v0  ;;  %v772_v42 = vadd.f32 0.2548296, %v756_v25 }
 0x190   : > { %v759_v62 = vmul.f32 %v743_v29, %v2109_v4  ;;  %v2202_v9 = vpop.eup %1541  ;;  %vm900_vm3 = vcmp.ge.f32.partialorder %v1945_v28, 0.0  ;;  %v883_v11 = vsub.f32 1.0, %v867_v30  ;;  %v866_v44 = vmul.f32 %v2041_v13, %v786_v3 }
 0x191   : > { %v789_v22 = vmul.f32 %v773_v52, %v2079_v50  ;;  %v742_v7 = vadd.f32 -0.28449672, %v726_v6  ;;  %v641_v20 = vsub.f32 2.0, %v625_v43  ;;  %v788_v49 = vmul.f32 %v772_v42, %v2067_v21 }
 0x192   : > { %v775_v53 = vadd.f32 0.2548296, %v759_v62  ;;  %v697_v26 = vmul.f32 %v681_v32, %v2127_v37  ;;  %vm903_vm4 = vcmp.ge.f32.partialorder %v1973_v54, 0.0  ;;  %v915_v0 = vsub.f32 0.0, %v883_v11 }
 0x193   : > { %v882_v14 = vsub.f32 1.0, %v866_v44  ;;  %v869_v39 = vmul.f32 %v2065_v5, %v789_v22  ;;  %v758_v38 = vmul.f32 %v742_v7, %v2093_v55  ;;  %v2212_v27 = vmul.f32 %v1540_v16, %v641_v20 }
 0x194   : > { %v868_v13 = vmul.f32 %v2055_v31, %v788_v49  ;;  %v791_v50 = vmul.f32 %v775_v53, %v2109_v4  ;;  %v713_v61 = vadd.f32 1.4214138, %v697_v26  ;;  %v931_v21 = vsel %vm899_vm0, %v883_v11, %v915_v0 }
 0x195   : > { %v914_v25 = vsub.f32 0.0, %v882_v14  ;;  %v885_v32 = vsub.f32 1.0, %v869_v39  ;;  %v774_v29 = vadd.f32 0.2548296, %v758_v38  ;;  %vm902_vm5 = vcmp.ge.f32.partialorder %v1966_v47, 0.0 }
 0x196   : > { %v947_v6 = vadd.f32 1.0, %v931_v21  ;;  %v884_v30 = vsub.f32 1.0, %v868_v13  ;;  %v871_v5 = vmul.f32 %v2091_v1, %v791_v50  ;;  %v729_v16 = vmul.f32 %v713_v61, %v2127_v37 }
 0x197   : > { %v930_v31 = vsel %vm898_vm1, %v882_v14, %v914_v25  ;;  %v917_v3 = vsub.f32 0.0, %v885_v32  ;;  %v790_v4 = vmul.f32 %v774_v29, %v2093_v55  ;;  %v680_v23 = vadd.f32 -1.4531521, %v2169_v46 }
 0x198   : > { %v963_v52 = vmul.f32 %v947_v6, %v1991_v10  ;;  %v946_v43 = vadd.f32 1.0, %v930_v31  ;;  %v916_v42 = vsub.f32 0.0, %v884_v30  ;;  %v887_v62 = vsub.f32 1.0, %v871_v5 }
 0x199   : > { %v933_v11 = vsel %vm901_vm2, %v885_v32, %v917_v3  ;;  %v870_v1 = vmul.f32 %v2087_v35, %v790_v4  ;;  %v745_v44 = vadd.f32 -0.28449672, %v729_v16  ;;  %v696_v22 = vmul.f32 %v680_v23, %v2119_v51 }
 0x19a   : > { %1082 = vmatprep.mubr.f32.mxu1 %v963_v52  ;;  %v962_v19 = vmul.f32 %v946_v43, %v1976_v57  ;;  %v949_v7 = vadd.f32 1.0, %v933_v11  ;;  %v932_v55 = vsel %vm900_vm3, %v884_v30, %v916_v42  ;;  %v919_v46 = vsub.f32 0.0, %v887_v62 }
 0x19b   : > { %v948_v10 = vadd.f32 1.0, %v932_v55  ;;  %v886_v20 = vsub.f32 1.0, %v870_v1  ;;  %v761_v49 = vmul.f32 %v745_v44, %v2127_v37  ;;  %v712_v53 = vadd.f32 1.4214138, %v696_v22 }
 0x19c   : > { %1083 = vmatmul.mubr.f32.vlgmr.msra.gmra.mxu1 %v962_v19  ;;  %v965_v34 = vmul.f32 %v949_v7, %v2005_v24  ;;  %v935_v35 = vsel %vm903_vm4, %v887_v62, %v919_v46  ;;  %v667_v26 = vmul.f32 1.0614054, %v2138_v18  ;;  %v666_v57 = vmul.f32 1.0614054, %v2131_v58 }
 0x19d   : > { %v964_v0 = vmul.f32 %v948_v10, %v1995_v17  ;;  %v951_v28 = vadd.f32 1.0, %v935_v35  ;;  %v918_v14 = vsub.f32 0.0, %v886_v20  ;;  %v777_v39 = vadd.f32 0.2548296, %v761_v49 }
 0x19e   : > { %vm905_vm6 = vcmp.ge.f32.partialorder %v1988_v8, 0.0  ;;  %1087 = vmatprep.mubr.f32.mxu1 %v965_v34  ;;  %v728_v38 = vmul.f32 %v712_v53, %v2119_v51  ;;  %v683_v13 = vadd.f32 -1.4531521, %v667_v26  ;;  %v682_v50 = vadd.f32 -1.4531521, %v666_v57 }
 0x19f   : > { %v669_v24 = vmul.f32 1.0614054, %v2161_v2  ;;  %v967_v54 = vmul.f32 %v951_v28, %v2014_v45  ;;  %v934_v61 = vsel %vm902_vm5, %v886_v20, %v918_v14  ;;  %v793_v21 = vmul.f32 %v777_v39, %v2127_v37 }
 0x1a0   : > { %v668_v17 = vmul.f32 1.0614054, %v2152_v40  ;;  %1088 = vmatmul.mubr.f32.gmra.mxu1 %v964_v0  ;;  %v950_v25 = vadd.f32 1.0, %v934_v61  ;;  %v744_v32 = vadd.f32 -0.28449672, %v728_v38  ;;  %v699_v29 = vmul.f32 %v683_v13, %v2138_v18 }
 0x1a1   : > { %v698_v6 = vmul.f32 %v682_v50, %v2131_v58  ;;  %1092 = vmatprep.mubr.f32.mxu1 %v967_v54  ;;  %v873_v30 = vmul.f32 %v2112_v48, %v793_v21  ;;  %v685_v5 = vadd.f32 -1.4531521, %v669_v24  ;;  %v671_v45 = vmul.f32 1.0614054, %v2193_v60  ;;  %v2467_v50 = vld [vmem:[#allocation16_spill] sm:$0xff] }
 0x1a2   : > { %v684_v16 = vadd.f32 -1.4531521, %v668_v17  ;;  %v966_v47 = vmul.f32 %v950_v25, %v2007_v36  ;;  %v760_v37 = vmul.f32 %v744_v32, %v2119_v51  ;;  %v715_v31 = vadd.f32 1.4214138, %v699_v29 }
 0x1a3   : > { %v714_v3 = vadd.f32 1.4214138, %v698_v6  ;;  %v889_v4 = vsub.f32 1.0, %v873_v30  ;;  %v701_v23 = vmul.f32 %v685_v5, %v2161_v2  ;;  %v687_v43 = vadd.f32 -1.4531521, %v671_v45  ;;  %v2468_v5 = vld [vmem:[#allocation18_spill] sm:$0xff] }
 0x1a4   : > { %v700_v52 = vmul.f32 %v684_v16, %v2152_v40  ;;  %1093 = vmatmul.mubr.f32.gmra.mxu1 %v966_v47  ;;  %v776_v42 = vadd.f32 0.2548296, %v760_v37  ;;  %v731_v48 = vmul.f32 %v715_v31, %v2138_v18  ;;  %v670_v11 = vmul.f32 1.0614054, %v2181_v12  ;;  %v2469_v16 = vld [vmem:[#allocation20_spill] sm:$0xff] }
 0x1a5   : > { %v730_v62 = vmul.f32 %v714_v3, %v2131_v58  ;;  %vm904_vm7 = vcmp.ge.f32.partialorder %v1981_v63, 0.0  ;;  %v921_v36 = vsub.f32 0.0, %v889_v4  ;;  %v717_v1 = vadd.f32 1.4214138, %v701_v23  ;;  %v2470_v47 = vld [vmem:[#allocation32_spill] sm:$0xff]  ;;  %v2473_v63 = vld [vmem:[#allocation34_spill] sm:$0xff] }
 0x1a6   : > { %v716_v44 = vadd.f32 1.4214138, %v700_v52  ;;  %v703_v22 = vmul.f32 %v687_v43, %v2193_v60  ;;  %v792_v19 = vmul.f32 %v776_v42, %v2119_v51  ;;  %v747_v7 = vadd.f32 -0.28449672, %v731_v48 }
 0x1a7   : > { %v746_v55 = vadd.f32 -0.28449672, %v730_v62  ;;  %v686_v46 = vadd.f32 -1.4531521, %v670_v11  ;;  %v937_v10 = vsel %vm905_vm6, %v889_v4, %v921_v36  ;;  %v733_v20 = vmul.f32 %v717_v1, %v2161_v2  ;;  %v2472_v11 = vld [vmem:[#allocation14_spill] sm:$0xff] }
 0x1a8   : > { %v732_v49 = vmul.f32 %v716_v44, %v2152_v40  ;;  %v719_v53 = vadd.f32 1.4214138, %v703_v22  ;;  %v953_v34 = vadd.f32 1.0, %v937_v10  ;;  %v872_v35 = vmul.f32 %v2105_v59, %v792_v19  ;;  %v2474_v44 = vld [vmem:[#allocation33_spill] sm:$0xff] }
 0x1a9   : > { %v763_v26 = vmul.f32 %v747_v7, %v2138_v18  ;;  %v762_v57 = vmul.f32 %v746_v55, %v2131_v58  ;;  %v749_v0 = vadd.f32 -0.28449672, %v733_v20  ;;  %v702_v14 = vmul.f32 %v686_v46, %v2181_v12 }
 0x1aa   : > { %v748_v51 = vadd.f32 -0.28449672, %v732_v49  ;;  %v735_v28 = vmul.f32 %v719_v53, %v2193_v60  ;;  %v969_v8 = vmul.f32 %v953_v34, %v2021_v56  ;;  %v888_v39 = vsub.f32 1.0, %v872_v35 }
 0x1ab   : > { %v779_v38 = vadd.f32 0.2548296, %v763_v26  ;;  %v778_v13 = vadd.f32 0.2548296, %v762_v57  ;;  %vm906_vm8 = vcmp.ge.f32.partialorder %v2001_v33, 0.0  ;;  %vm907_vm9 = vcmp.ge.f32.partialorder %v2467_v50, 0.0 }
 0x1ac   : > { %v765_v59 = vmul.f32 %v749_v0, %v2161_v2  ;;  %v764_v24 = vmul.f32 %v748_v51, %v2152_v40  ;;  %v751_v54 = vadd.f32 -0.28449672, %v735_v28  ;;  %v718_v61 = vadd.f32 1.4214138, %v702_v14  ;;  %1097 = vmatprep.mubr.f32.mxu1 %v969_v8 }
 0x1ad   : > { %v920_v21 = vsub.f32 0.0, %v888_v39  ;;  %v795_v17 = vmul.f32 %v779_v38, %v2138_v18  ;;  %v794_v25 = vmul.f32 %v778_v13, %v2131_v58  ;;  %v673_v56 = vmul.f32 1.0614054, %v2212_v27  ;;  %v2471_v18 = vld [vmem:[#allocation30_spill] sm:$0xff]  ;;  %v2476_v13 = vld [vmem:[#allocation15_spill] sm:$0xff] }
 0x1ae   : > { %v781_v32 = vadd.f32 0.2548296, %v765_v59  ;;  %v780_v29 = vadd.f32 0.2548296, %v764_v24  ;;  %v767_v6 = vmul.f32 %v751_v54, %v2193_v60  ;;  %v734_v30 = vmul.f32 %v718_v61, %v2181_v12 }
 0x1af   : > { %vm908_vm10 = vcmp.ge.f32.partialorder %v2468_v5, 0.0  ;;  %vm909_vm11 = vcmp.ge.f32.partialorder %v2469_v16, 0.0  ;;  %v936_v45 = vsel %vm904_vm7, %v888_v39, %v920_v21  ;;  %v875_v37 = vmul.f32 %v2470_v47, %v795_v17  ;;  %v2475_v39 = vld [vmem:[#allocation19_spill] sm:$0xff]  ;;  %v2482_v47 = vld [vmem:[#allocation24_spill] sm:$0xff] }
 0x1b0   : > { %v874_v31 = vmul.f32 %v2471_v18, %v794_v25  ;;  %v689_v58 = vadd.f32 -1.4531521, %v673_v56  ;;  %v952_v3 = vadd.f32 1.0, %v936_v45  ;;  %v797_v4 = vmul.f32 %v781_v32, %v2161_v2  ;;  %v2477_v21 = vld [vmem:[#allocation35_spill] sm:$0xff]  ;;  %v2478_v25 = vld [vmem:[#allocation26_spill] sm:$0xff] }
 0x1b1   : > { %v796_v23 = vmul.f32 %v780_v29, %v2152_v40  ;;  %v783_v52 = vadd.f32 0.2548296, %v767_v6  ;;  %v891_v43 = vsub.f32 1.0, %v875_v37  ;;  %v750_v48 = vadd.f32 -0.28449672, %v734_v30  ;;  %v2480_v29 = vld [vmem:[#allocation17_spill] sm:$0xff] }
 0x1b2   : > { %v890_v42 = vsub.f32 1.0, %v874_v31  ;;  %v705_v62 = vmul.f32 %v689_v58, %v2212_v27  ;;  %v968_v36 = vmul.f32 %v952_v3, %v2472_v11  ;;  %v877_v1 = vmul.f32 %v2473_v63, %v797_v4  ;;  %v2481_v30 = vld [vmem:[#allocation22_spill] sm:$0xff] }
 0x1b3   : > { %v876_v22 = vmul.f32 %v2474_v44, %v796_v23  ;;  %v799_v19 = vmul.f32 %v783_v52, %v2193_v60  ;;  %v923_v7 = vsub.f32 0.0, %v891_v43  ;;  %v766_v2 = vmul.f32 %v750_v48, %v2181_v12  ;;  %v2483_v23 = vld [vmem:[#allocation23_spill] sm:$0xff] }
 0x1b4   : > { %v922_v55 = vsub.f32 0.0, %v890_v42  ;;  %v721_v46 = vadd.f32 1.4214138, %v705_v62  ;;  %1098 = vmatmul.mubr.f32.gmra.mxu1 %v968_v36  ;;  %v893_v40 = vsub.f32 1.0, %v877_v1  ;;  %v672_v49 = vmul.f32 1.0614054, %v2198_v41 }
 0x1b5   : > { %v892_v10 = vsub.f32 1.0, %v876_v22  ;;  %v879_v20 = vmul.f32 %v2186_v15, %v799_v19  ;;  %v939_v53 = vsel %vm907_vm9, %v891_v43, %v923_v7  ;;  %v782_v35 = vadd.f32 0.2548296, %v766_v2  ;;  %v2484_v62 = vld [vmem:[#allocation21_spill] sm:$0xff] }
 0x1b6   : > { %v938_v34 = vsel %vm906_vm8, %v890_v42, %v922_v55  ;;  %v737_v60 = vmul.f32 %v721_v46, %v2212_v27  ;;  %v955_v26 = vadd.f32 1.0, %v939_v53  ;;  %v925_v0 = vsub.f32 0.0, %v893_v40  ;;  %v2485_v2 = vld [vmem:[#allocation29_spill] sm:$0xff] }
 0x1b7   : > { %v954_v57 = vadd.f32 1.0, %v938_v34  ;;  %v924_v51 = vsub.f32 0.0, %v892_v10  ;;  %v895_v28 = vsub.f32 1.0, %v879_v20  ;;  %v798_v14 = vmul.f32 %v782_v35, %v2181_v12  ;;  %v2479_v12 = vld [vmem:[#allocation31_spill] sm:$0xff] }
 0x1b8   : > { %v753_v8 = vadd.f32 -0.28449672, %v737_v60  ;;  %v688_v15 = vadd.f32 -1.4531521, %v672_v49  ;;  %v971_v38 = vmul.f32 %v955_v26, %v2475_v39  ;;  %v941_v33 = vsel %vm909_vm11, %v893_v40, %v925_v0  ;;  %v2487_v60 = vld [vmem:[#allocation27_spill] sm:$0xff] }
 0x1b9   : > { %v970_v50 = vmul.f32 %v954_v57, %v2476_v13  ;;  %v940_v59 = vsel %vm908_vm10, %v892_v10, %v924_v51  ;;  %v957_v24 = vadd.f32 1.0, %v941_v33  ;;  %v927_v61 = vsub.f32 0.0, %v895_v28  ;;  %v2486_v10 = vld [vmem:[#allocation28_spill] sm:$0xff]  ;;  %v2488_v57 = vld [vmem:[#allocation25_spill] sm:$0xff] }
 0x1ba   : > { %v956_v54 = vadd.f32 1.0, %v940_v59  ;;  %v878_v17 = vmul.f32 %v2477_v21, %v798_v14  ;;  %vm911_vm12 = vcmp.ge.f32.partialorder %v2478_v25, 0.0  ;;  %1543 = vpow2.f32 %v2479_v12  ;;  %1102 = vmatprep.mubr.f32.mxu1 %v971_v38 }
 0x1bb   : > { %v769_v56 = vmul.f32 %v753_v8, %v2212_v27  ;;  %v704_v32 = vmul.f32 %v688_v15, %v2198_v41  ;;  %v524_v6 = vmul.f32 0.5, %v2480_v29  ;;  %1103 = vmatmul.mubr.f32.gmra.mxu1 %v970_v50  ;;  %v973_v5 = vmul.f32 %v957_v24, %v2481_v30  ;;  %v1328_v8 = vld [vmem:[%s2414_s4] ss:$0 sm:$0xff] }
 0x1bc   : > { %v943_v16 = vsel %vm911_vm12, %v895_v28, %v927_v61  ;;  %v894_v45 = vsub.f32 1.0, %v878_v17  ;;  %v527_v37 = vmul.f32 0.5, %v2482_v47  ;;  %vm910_vm13 = vcmp.ge.f32.partialorder %v2483_v23, 0.0 }
 0x1bd   : > { %v959_v18 = vadd.f32 1.0, %v943_v16  ;;  %v785_v31 = vadd.f32 0.2548296, %v769_v56  ;;  %v720_v58 = vadd.f32 1.4214138, %v704_v32  ;;  %1107 = vmatprep.mubr.f32.mxu1 %v973_v5  ;;  %v972_v3 = vmul.f32 %v956_v54, %v524_v6 }
 0x1be   : > { %v926_v4 = vsub.f32 0.0, %v894_v45  ;;  %v526_v11 = vmul.f32 0.5, %v2484_v62  ;;  %vm913_vm14 = vcmp.ge.f32.partialorder %v2485_v2, 0.0  ;;  %v529_v20 = vmul.f32 0.5, %v2486_v10 }
 0x1bf   : > { %v975_v52 = vmul.f32 %v959_v18, %v527_v37  ;;  %v801_v43 = vmul.f32 %v785_v31, %v2212_v27  ;;  %v736_v42 = vmul.f32 %v720_v58, %v2198_v41  ;;  %1108 = vmatmul.mubr.f32.gmra.mxu1 %v972_v3  ;;  %vm912_vm15 = vcmp.ge.f32.partialorder %v2487_v60, 0.0 }
 0x1c0   : > { %v942_v48 = vsel %vm910_vm13, %v894_v45, %v926_v4  ;;  %v528_v0 = vmul.f32 0.5, %v2488_v57 }
 0x1c1   : > { %1112 = vmatprep.mubr.f32.mxu1 %v975_v52  ;;  %v958_v36 = vadd.f32 1.0, %v942_v48  ;;  %v881_v63 = vmul.f32 %v2202_v9, %v801_v43  ;;  %v752_v1 = vadd.f32 -0.28449672, %v736_v42 }
 0x1c3   : > { %v974_v44 = vmul.f32 %v958_v36, %v526_v11  ;;  %v897_v22 = vsub.f32 1.0, %v881_v63  ;;  %v768_v19 = vmul.f32 %v752_v1, %v2198_v41 }
 0x1c5   : > { %1113 = vmatmul.mubr.f32.gmra.mxu1 %v974_v44  ;;  %v929_v7 = vsub.f32 0.0, %v897_v22  ;;  %v784_v55 = vadd.f32 0.2548296, %v768_v19 }
 0x1c7   : > { %v945_v27 = vsel %vm913_vm14, %v897_v22, %v929_v7  ;;  %v800_v46 = vmul.f32 %v784_v55, %v2198_v41  ;;  %v1544_v40 = vpop.eup %1543 }
 0x1c8   : > { %v961_v49 = vadd.f32 1.0, %v945_v27 }
 0x1c9   : > { %v880_v53 = vmul.f32 %v1544_v40, %v800_v46 }
 0x1ca   : > { %v977_v34 = vmul.f32 %v961_v49, %v529_v20 }
 0x1cb   : > { %v896_v9 = vsub.f32 1.0, %v880_v53 }
 0x1cc   : > { %1117 = vmatprep.mubr.f32.mxu1 %v977_v34 }
 0x1cd   : > { %v928_v35 = vsub.f32 0.0, %v896_v9 }
 0x1cf   : > { %v944_v26 = vsel %vm912_vm15, %v896_v9, %v928_v35 }
 0x1d0   : > { %v960_v51 = vadd.f32 1.0, %v944_v26 }
 0x1d2   : > { %v976_v28 = vmul.f32 %v960_v51, %v528_v0 }
 0x1d4   : > { %1118 = vmatmul.mubr.f32.gmra.mxu1 %v976_v28 }
 0x25c   : > { %v1372_v14 = vpop.f32.mrf.mxu1 }
 0x25e   : > { %v1373_v41 = vpop.f32.mrf.mxu1 }
 0x25f   : > { %v1374_v15 = vadd.f32 %v1373_v41, %v1372_v14 }
 0x260   : > { %v1375_v39 = vpop.f32.mrf.mxu1 }
 0x261   : > { %v1157_v38 = vadd.f32 %v1374_v15, %v1328_v8 }
 0x262   : > { %v1376_v13 = vpop.f32.mrf.mxu1 }
 0x263   : > { %1165 = vst [vmem:[%s2333_s14] sm:$0xff] %v1157_v38  ;;  %v1377_v50 = vadd.f32 %v1376_v13, %v1375_v39 }
 0x264   : > { %v1378_v33 = vpop.f32.mrf.mxu1 }
 0x265   : > { %v1158_v59 = vadd.f32 %v1377_v50, %v1328_v8 }
 0x266   : > { %v1379_v24 = vpop.f32.mrf.mxu1 }
 0x267   : > { %1166 = vst [vmem:[%s2333_s14 + $0x8] sm:$0xff] %v1158_v59  ;;  %v1380_v54 = vadd.f32 %v1379_v24, %v1378_v33 }
 0x269   : > { %v1159_v61 = vadd.f32 %v1380_v54, %v1328_v8 }
 0x26b   : > { %1167 = vst [vmem:[%s2333_s14 + $0x10] sm:$0xff] %v1159_v61 }
 0x274   : > { %v1381_v21 = vpop.f32.mrf.mxu1 }
 0x276   : > { %v1382_v17 = vpop.f32.mrf.mxu1 }
 0x277   : > { %v1383_v25 = vadd.f32 %v1382_v17, %v1381_v21 }
 0x279   : > { %v1160_v12 = vadd.f32 %v1383_v25, %v1328_v8 }
 0x27b   : > { %1168 = vst [vmem:[%s2333_s14 + $0x18] sm:$0xff] %v1160_v12  ;;  %v1384_v56 = vpop.f32.mrf.mxu1 }
 0x27d   : > { %v1385_v32 = vpop.f32.mrf.mxu1 }
 0x27e   : > { %v1386_v29 = vadd.f32 %v1385_v32, %v1384_v56 }
 0x27f   : > { %v1387_v6 = vpop.f32.mrf.mxu1 }
 0x280   : > { %v1161_v30 = vadd.f32 %v1386_v29, %v1328_v8 }
 0x281   : > { %v1388_v5 = vpop.f32.mrf.mxu1 }
 0x282   : > { %1169 = vst [vmem:[%s2333_s14 + $0x20] sm:$0xff] %v1161_v30  ;;  %v1389_v16 = vadd.f32 %v1388_v5, %v1387_v6 }
 0x284   : > { %v1162_v45 = vadd.f32 %v1389_v16, %v1328_v8 }
 0x285   : > { %v1390_v47 = vpop.f32.mrf.mxu1 }
 0x286   : > { %1170 = vst [vmem:[%s2333_s14 + $0x28] sm:$0xff] %v1162_v45 }
 0x287   : > { %v1391_v37 = vpop.f32.mrf.mxu1 }
 0x288   : > { %v1392_v18 = vadd.f32 %v1391_v37, %v1390_v47 }
 0x28a   : > { %v1163_v31 = vadd.f32 %v1392_v18, %v1328_v8 }
 0x28c   : > { %1171 = vst [vmem:[%s2333_s14 + $0x30] sm:$0xff] %v1163_v31 }
 0x294   : > { %v1393_v58 = vpop.f32.mrf.mxu1 }
 0x296   : > { %v1394_v3 = vpop.f32.mrf.mxu1 }
 0x297   : > { %v1395_v4 = vadd.f32 %v1394_v3, %v1393_v58  ;;  %1180 = sbr.rel (!%p2489_p0) target bundleno = 695 (0x2b7), region = 64 }
 0x299   : > { %v1164_v23 = vadd.f32 %v1395_v4, %v1328_v8 }
 0x29b   : > { %1172 = vst [vmem:[%s2333_s14 + $0x38] sm:$0xff] %v1164_v23 }
 0x29c   : > { %s2502_s27 = smov (!%p1183_p3, %s1182_s27), 8 }
 0x29d   : > { %s2347_s28 = sshll.u32 %s2502_s27, 7 }
 0x29e   : > { %s1187_s30 = ssub.s32 1024, %s2347_s28 }
 0x29f   : > { %1188 = vsyncadd %s1174_s13, %s1187_s30  ;;  %p1332_p10 = scmp.ne.s32.totalorder %s2347_s28, 0  ;;  %s1339_s7 = sshll.u32 %s1699_s21, 10 }
 0x2a0   : > { %s2357_s24 = scalar_lea.hbm %s2415_s5, %s1339_s7  ;;  %s1193_s25 = sshll.u32 %s2333_s14, 4  ;;  %s2360_s25 = int_to_ptr.vmem [resolvable:$true] %s1193_s25 }
 0x2a1   : > { %s1623_s26 = scalar_lea.vmem %s2360_s25, %s2347_s28  ;;  %s1719_s29 = smov [#allocation9]  }
 0x2a2   : > { %p1624_p13 = scmp.ne.s32.totalorder %s2360_s25, %s1623_s26  ;;  %s1627_s6 = sshll.u32 %s1719_s29, 4  ;;  %s1628_s6 = int_to_ptr.vmem [resolvable:$false] %s1627_s6 }
 0x2a3   : > { %s1629_s21 = scalar_lea.vmem %s1628_s6, 2048  ;;  %p1630_p7 = scmp.lt.s32.totalorder %s2360_s25, %s1628_s6 }
 0x2a4   : > { %p1625_p1 = pnand %p1624_p13, %p1332_p10  ;;  %p1631_p12 = scmp.lt.s32.totalorder %s1629_s21, %s1623_s26 }
 0x2a6   : > { %p1626_p6 = pneg %p1625_p1  ;;  %p1632_p11 = por %p1631_p12, %p1630_p7 }
 0x2a8   : > { %p1633_p5 = pnand %p1632_p11, %p1626_p6 }
 0x2aa   : > { %1636 = shalt.err (!%p1633_p5)
}
 0x2ab   : > { %s1637_s10 = scalar_lea.hbm %s2357_s24, %s2347_s28  ;;  %s1641_s16 = scalar_lea.hbm %s2415_s5, 1920 }
 0x2ac   : > { %p1638_p8 = scmp.ne.s32.totalorder %s2357_s24, %s1637_s10  ;;  %p1642_p0 = scmp.lt.s32.totalorder %s2357_s24, %s2415_s5 }
 0x2ad   : > { %p1643_p3 = scmp.lt.s32.totalorder %s1641_s16, %s1637_s10 }
 0x2ae   : > { %p1639_p2 = pnand %p1638_p8, %p1332_p10 }
 0x2af   : > { %p1644_p13 = por %p1643_p3, %p1642_p0 }
 0x2b0   : > { %p1640_p4 = pneg %p1639_p2 }
 0x2b2   : > { %p1645_p1 = pnand %p1644_p13, %p1640_p4 }
 0x2b4   : > { %1648 = shalt.err (!%p1645_p1)
}
 0x2b5   : > { %s1720_s7 = smov 128   ;;  %s1721_s11 = smov 8  }
 0x2b6   : > { %1199 = dma.vmem_to_hbm [thread:$0]  (%p1332_p10), %s2360_s25, %s2347_s28, %s2357_s24, %s1174_s13, %s1720_s7, %s1720_s7, %s1721_s11  }
 0x2b7 PF: > { %s1208_s12 = sand.u32 1, %s1687_s18   ;;  %p2490_p6 = scmp.ne.s32.totalorder %s2440_s9, 0 }
 0x2b8   : > { %s1209_s26 = scalar_lea.sflag [#allocation5], %s1208_s12 }
 0x2b9   : > { %p1414_p7 = pnand %p1315_p9, %p2490_p6 }
 0x2bb   : > { %p1415_p12 = pneg %p1414_p7 }
 0x2bd   : > { %1682 = dma.done.wait (%p1415_p12), %s1209_s26, 1024  }
 0x2be   : > { %1684 = vsyncadd (%p1415_p12), %s1209_s26, 4294966272  ;;  %s22_s23 = sadd.s32 1, %s1707_s23   ;;  %s2491_s17 = sld [smem:[#allocation13_spill]] }
 0x2bf   : > { %p19_p11 = scmp.ge.s32.totalorder %s22_s23, 4   ;;  %s2492_s18 = smov %s1691_s19 }
 0x2c0   : > { %s2493_s19 = smov %s1695_s20  ;;  %s2494_s20 = smov %s1814_s8 }
 0x2c1   : > { %s2495_s21 = smov %s1703_s22  ;;  %21 = sbr.rel (!%p19_p11) target bundleno = 7 (0x7), region = 106 }
 0x2c4   : > { %s2496_s22 = smov %s2491_s17 }
 0x2c6   :  { %1214 = vsyncpa [#allocation4], 1 }
 0x2c7   :  { %1216 = vsyncpa [#allocation4 + $0x1], 1 }
 0x2c8   :  { %1217 = vsyncpa [#allocation7], 1 }
 0x2c9   :  { %1218 = vsyncpa [#allocation5], 1 }
 0x2ca   :  { %1220 = vsyncpa [#allocation5 + $0x1], 1 }

</bundles_post_ra>
